<compile_context>
chip_gen: v7x
topology: tpu7x:2x2x1
jax: 0.10.0
libtpu: 0.0.40
codegen_flags: <defaults>
</compile_context>

<pallas_src>
import functools

import jax
import jax.numpy as jnp
from jax.experimental import pallas as pl
from jax.experimental.pallas import tpu as pltpu


def _leaky_relu(x, slope=0.01):
    # torch.nn.LeakyReLU default negative_slope = 0.01
    return jnp.where(x > 0, x, slope * x)


def encoder_kernel(x_ref, w1_ref, b1_ref, w2_ref, b2_ref, w3_ref, b3_ref, o_ref):
    """Fused  Linear(inp,1024) -> LeakyReLU -> Linear(1024,256) -> Linear(256,512).

    w2/b2 arrive pre-sliced to 256 columns.  Matmul inputs are bf16 (MXU-native
    on v5e/v6e/v7x) with f32 accumulation; epilogues (bias add, LeakyReLU) run
    in f32 on the VPU.  x may arrive f32 (small B) or bf16 (large B)."""
    x = x_ref[...].astype(jnp.bfloat16)                                   # (TM, inp)
    h = jnp.dot(x, w1_ref[...], preferred_element_type=jnp.float32)      # (TM, 1024) f32
    h = _leaky_relu(h + b1_ref[...])
    mu = jnp.dot(h.astype(jnp.bfloat16), w2_ref[...],
                 preferred_element_type=jnp.float32)                      # (TM, 256) f32
    mu = mu + b2_ref[...]
    out = jnp.dot(mu.astype(jnp.bfloat16), w3_ref[...],
                  preferred_element_type=jnp.float32)                     # (TM, 512) f32
    o_ref[...] = (out + b3_ref[...]).astype(o_ref.dtype)


def init_params(key, inp_size, hidden=1024, d_model=512, post_in=256):
    """Master params in f32, mirroring nn.Linear default init (U(+-1/sqrt(fan_in))).
    Weights stored as (in_features, out_features) so the kernel computes y = x @ W + b."""
    ks = jax.random.split(key, 6)

    def lin(kw, kb, fan_in, fan_out):
        bound = 1.0 / jnp.sqrt(float(fan_in))
        w = jax.random.uniform(kw, (fan_in, fan_out), jnp.float32, -bound, bound)
        b = jax.random.uniform(kb, (1, fan_out), jnp.float32, -bound, bound)
        return w, b

    w1, b1 = lin(ks[0], ks[1], inp_size, hidden)   # enc.0 : Linear(inp_size, 1024)
    w2, b2 = lin(ks[2], ks[3], hidden, d_model)    # enc.2 : Linear(1024, 512)
    w3, b3 = lin(ks[4], ks[5], post_in, d_model)   # post_enc.0 : Linear(256, 512)
    return dict(w1=w1, b1=b1, w2=w2, b2=b2, w3=w3, b3=b3)


def _tpu_generation():
    """Best-effort TPU generation from the device kind string (trace-time)."""
    try:
        kind = jax.devices()[0].device_kind.lower()
    except Exception:  # pragma: no cover
        return 0
    for g in (7, 6, 5, 4):
        if f"v{g}" in kind:
            return g
    return 0


def _pick_tm(batch, block_m, num_cores):
    """Batch tile size: full batch if small; otherwise 256-aligned tiles with the
    tile count rounded to a multiple of num_cores (v7x has 2 TensorCores)."""
    if batch <= block_m:
        return batch
    n_tiles = pl.cdiv(batch, block_m)
    n_tiles = ((n_tiles + num_cores - 1) // num_cores) * num_cores
    tm = pl.cdiv(batch, n_tiles)
    tm = ((tm + 255) // 256) * 256           # 2x256x256 MXU on v6e/v7x
    return min(tm, block_m)


@functools.partial(jax.jit, static_argnames=("block_m",))
def encoder_forward(x_nchw, params, block_m=512):
    """Equivalent of Encoder.forward(x, do_quantize=False) in eval mode.
    Returns (z_q, diff, ind) with diff=0.0, ind=None."""
    B = x_nchw.shape[0]
    x2d = x_nchw.reshape(B, -1)                         # torch: x.reshape((B, -1))
    # Small B: pass f32 and cast in-kernel (avoids a separate XLA cast op + HBM
    # round trip that is ~kernel-sized at tiny batch).  Large B: feed bf16 so the
    # kernel's arithmetic intensity stays above the v6e HBM ridge.
    if B > 1024:
        x2d = x2d.astype(jnp.bfloat16)
    inp = x2d.shape[1]
    x_bytes = 2 if x2d.dtype == jnp.bfloat16 else 4

    # Stream weights in bf16 (halves HBM->VMEM bytes; kernel is weight-DMA bound
    # at small B).  post_enc only consumes z[:, :256], so slice w2/b2 here.
    post_in = params["w3"].shape[0]                     # 256
    w1 = params["w1"].astype(jnp.bfloat16)
    b1 = params["b1"]
    w2 = params["w2"][:, :post_in].astype(jnp.bfloat16)
    b2 = params["b2"][:, :post_in]
    w3 = params["w3"].astype(jnp.bfloat16)
    b3 = params["b3"]

    hidden = w1.shape[1]                                # 1024
    d_model = w3.shape[1]                               # 512

    gen = _tpu_generation()
    num_cores = 2 if gen >= 7 else 1                    # v7x: 2 TensorCores/chip
    vmem_cap = (48 << 20) if (gen >= 7 or gen == 0) else (96 << 20)

    # Batch tiling: single full block for tiny B, 256-aligned tiles (pipelined,
    # megacore-parallel / balanced across v7x's 2 TCs) for large B.  Weights use
    # a constant index_map so they are DMA'd once and stay VMEM-resident.
    tm = _pick_tm(B, block_m, num_cores)
    grid = (pl.cdiv(B, tm),)

    def _const(shape):
        # Constant index_map => the block never changes; single-buffer it so the
        # dead second buffer doesn't consume VMEM (halves weight footprint).
        return pl.BlockSpec(shape, lambda i: (0, 0), pipeline_mode=pl.Buffered(1))

    x_spec = pl.BlockSpec((tm, inp), lambda i: (i, 0))
    out_spec = pl.BlockSpec((tm, d_model), lambda i: (i, 0))

    flops = 2 * B * (inp * hidden + hidden * post_in + post_in * d_model)
    weight_bytes = 2 * (w1.size + w2.size + w3.size) + 4 * (b1.size + b2.size + b3.size)
    bytes_accessed = weight_bytes + x_bytes * x2d.size + 4 * B * d_model

    # VMEM budget: single-buffered resident weights + double-buffered x/out tiles,
    # with ~1.5x headroom for Mosaic internal scratch; generation-aware cap.
    tile_bytes = 2 * (tm * inp * x_bytes + tm * d_model * 4)
    vmem_needed = weight_bytes + tile_bytes
    vmem_limit = int(min(max(int(1.5 * vmem_needed), 16 << 20), vmem_cap))

    z_q = pl.pallas_call(
        encoder_kernel,
        out_shape=jax.ShapeDtypeStruct((B, d_model), jnp.float32),
        grid=grid,
        in_specs=[
            x_spec,
            _const((inp, hidden)), _const((1, hidden)),
            _const((hidden, post_in)), _const((1, post_in)),
            _const((post_in, d_model)), _const((1, d_model)),
        ],
        out_specs=out_spec,
        compiler_params=pltpu.CompilerParams(
            dimension_semantics=("parallel",),
            vmem_limit_bytes=vmem_limit,
        ),
        cost_estimate=pl.CostEstimate(
            flops=flops, transcendentals=0, bytes_accessed=bytes_accessed),
    )(x2d, w1, b1, w2, b2, w3, b3)

    diff = jnp.float32(0.0)
    ind = None
    return z_q, diff, ind


def _reference_forward(x_nchw, params):
    """Pure-JAX f32 reference for correctness checking."""
    B = x_nchw.shape[0]
    x = x_nchw.reshape(B, -1).astype(jnp.float32)
    h = _leaky_relu(x @ params["w1"] + params["b1"])
    z = h @ params["w2"] + params["b2"]
    mu = z[:, :256]
    return mu @ params["w3"] + params["b3"]


if __name__ == "__main__":
    key = jax.random.PRNGKey(0)
    kx, kp = jax.random.split(key)

    # Small NCHW observation: batch=2, channels=4, spatial=16x16 -> inp_size=1024
    B, C, H, W = 2, 4, 16, 16
    inp_size = C * H * W
    x = jax.random.normal(kx, (B, C, H, W), dtype=jnp.float32)

    params = init_params(kp, inp_size)

    z_q, diff, ind = encoder_forward(x, params)
    z_q = jax.block_until_ready(z_q)

    # Verify against the pure-JAX f32 reference (loose tolerance: weights and
    # activations are streamed in bf16 inside the kernel).
    ref = _reference_forward(x, params)
    assert z_q.shape == (B, 512)
    assert jnp.allclose(z_q, ref, atol=5e-2, rtol=5e-2), "mismatch vs reference"

    print("KERNEL_OK")
</pallas_src>

<mosaic_0001>
module attributes {stable_mosaic.version = 11 : i64} {
  func.func @encoder_kernel(%arg0: i32, %arg1: memref<2x1024xf32, #tpu.memory_space<vmem>>, %arg2: memref<1024x1024xbf16, #tpu.memory_space<vmem>>, %arg3: memref<1x1024xf32, #tpu.memory_space<vmem>>, %arg4: memref<1024x256xbf16, #tpu.memory_space<vmem>>, %arg5: memref<1x256xf32, #tpu.memory_space<vmem>>, %arg6: memref<256x512xbf16, #tpu.memory_space<vmem>>, %arg7: memref<1x512xf32, #tpu.memory_space<vmem>>, %arg8: memref<2x512xf32, #tpu.memory_space<vmem>>) attributes {dimension_semantics = [#tpu.dimension_semantics<parallel>], iteration_bounds = array<i64: 1>, scalar_prefetch = 0 : i64, scratch_operands = 0 : i64, tpu.core_type = #tpu.core_type<tc>, window_params = [{transform_indices = @transform_0, window_bounds = array<i64: 2, 1024>}, {pipeline_mode = #tpu.pipeline_mode<synchronous>, transform_indices = @transform_1, window_bounds = array<i64: 1024, 1024>}, {pipeline_mode = #tpu.pipeline_mode<synchronous>, transform_indices = @transform_2, window_bounds = array<i64: 1, 1024>}, {pipeline_mode = #tpu.pipeline_mode<synchronous>, transform_indices = @transform_3, window_bounds = array<i64: 1024, 256>}, {pipeline_mode = #tpu.pipeline_mode<synchronous>, transform_indices = @transform_4, window_bounds = array<i64: 1, 256>}, {pipeline_mode = #tpu.pipeline_mode<synchronous>, transform_indices = @transform_5, window_bounds = array<i64: 256, 512>}, {pipeline_mode = #tpu.pipeline_mode<synchronous>, transform_indices = @transform_6, window_bounds = array<i64: 1, 512>}, {transform_indices = @transform_7, window_bounds = array<i64: 2, 512>}]} {
    %c0 = arith.constant 0 : index
    %c0_0 = arith.constant 0 : index
    %0 = vector.load %arg1[%c0, %c0_0] : memref<2x1024xf32, #tpu.memory_space<vmem>>, vector<2x1024xf32>
    %1 = arith.truncf %0 : vector<2x1024xf32> to vector<2x1024xbf16>
    %c0_1 = arith.constant 0 : index
    %c0_2 = arith.constant 0 : index
    %2 = vector.load %arg2[%c0_1, %c0_2] : memref<1024x1024xbf16, #tpu.memory_space<vmem>>, vector<1024x1024xbf16>
    %cst = arith.constant dense<0.000000e+00> : vector<2x1024xf32>
    %3 = tpu.matmul %1, %2, %cst {dimension_numbers = #tpu.dot_dimension_numbers<[1], [0], [0], [1], [0, 0, 1, 1], [], []>} : vector<2x1024xbf16>, vector<1024x1024xbf16>, vector<2x1024xf32> -> vector<2x1024xf32>
    %c0_3 = arith.constant 0 : index
    %c0_4 = arith.constant 0 : index
    %4 = vector.load %arg3[%c0_3, %c0_4] : memref<1x1024xf32, #tpu.memory_space<vmem>>, vector<1x1024xf32>
    %5 = vector.broadcast %4 : vector<1x1024xf32> to vector<2x1024xf32>
    %6 = arith.addf %3, %5 : vector<2x1024xf32>
    %cst_5 = arith.constant 0.000000e+00 : f32
    %7 = vector.broadcast %cst_5 : f32 to vector<2x1024xf32>
    %8 = arith.cmpf ogt, %6, %7 : vector<2x1024xf32>
    %cst_6 = arith.constant 0.00999999977 : f32
    %9 = vector.broadcast %cst_6 : f32 to vector<2x1024xf32>
    %10 = arith.mulf %9, %6 : vector<2x1024xf32>
    %11 = arith.select %8, %6, %10 : vector<2x1024xi1>, vector<2x1024xf32>
    %12 = arith.truncf %11 : vector<2x1024xf32> to vector<2x1024xbf16>
    %c0_7 = arith.constant 0 : index
    %c0_8 = arith.constant 0 : index
    %13 = vector.load %arg4[%c0_7, %c0_8] : memref<1024x256xbf16, #tpu.memory_space<vmem>>, vector<1024x256xbf16>
    %cst_9 = arith.constant dense<0.000000e+00> : vector<2x256xf32>
    %14 = tpu.matmul %12, %13, %cst_9 {dimension_numbers = #tpu.dot_dimension_numbers<[1], [0], [0], [1], [0, 0, 1, 1], [], []>} : vector<2x1024xbf16>, vector<1024x256xbf16>, vector<2x256xf32> -> vector<2x256xf32>
    %c0_10 = arith.constant 0 : index
    %c0_11 = arith.constant 0 : index
    %15 = vector.load %arg5[%c0_10, %c0_11] : memref<1x256xf32, #tpu.memory_space<vmem>>, vector<1x256xf32>
    %16 = vector.broadcast %15 : vector<1x256xf32> to vector<2x256xf32>
    %17 = arith.addf %14, %16 : vector<2x256xf32>
    %18 = arith.truncf %17 : vector<2x256xf32> to vector<2x256xbf16>
    %c0_12 = arith.constant 0 : index
    %c0_13 = arith.constant 0 : index
    %19 = vector.load %arg6[%c0_12, %c0_13] : memref<256x512xbf16, #tpu.memory_space<vmem>>, vector<256x512xbf16>
    %cst_14 = arith.constant dense<0.000000e+00> : vector<2x512xf32>
    %20 = tpu.matmul %18, %19, %cst_14 {dimension_numbers = #tpu.dot_dimension_numbers<[1], [0], [0], [1], [0, 0, 1, 1], [], []>} : vector<2x256xbf16>, vector<256x512xbf16>, vector<2x512xf32> -> vector<2x512xf32>
    %c0_15 = arith.constant 0 : index
    %c0_16 = arith.constant 0 : index
    %21 = vector.load %arg7[%c0_15, %c0_16] : memref<1x512xf32, #tpu.memory_space<vmem>>, vector<1x512xf32>
    %22 = vector.broadcast %21 : vector<1x512xf32> to vector<2x512xf32>
    %23 = arith.addf %20, %22 : vector<2x512xf32>
    %c0_17 = arith.constant 0 : index
    %c0_18 = arith.constant 0 : index
    %24 = vector.load %arg8[%c0_17, %c0_18] : memref<2x512xf32, #tpu.memory_space<vmem>>, vector<2x512xf32>
    tpu.vector_store %arg8[%c0_17, %c0_18], %23 {strides = array<i32>} : memref<2x512xf32, #tpu.memory_space<vmem>>, vector<2x512xf32>,
    return
  }
  func.func @transform_0(%arg0: i32) -> (i32, i32) {
    %c0_i32 = arith.constant 0 : i32
    %c0_i32_0 = arith.constant 0 : i32
    return %arg0, %c0_i32 : i32, i32
  }
  func.func @transform_1(%arg0: i32) -> (i32, i32) {
    %c0_i32 = arith.constant 0 : i32
    %c0_i32_0 = arith.constant 0 : i32
    %c0_i32_1 = arith.constant 0 : i32
    return %c0_i32, %c0_i32_0 : i32, i32
  }
  func.func @transform_2(%arg0: i32) -> (i32, i32) {
    %c0_i32 = arith.constant 0 : i32
    %c0_i32_0 = arith.constant 0 : i32
    %c0_i32_1 = arith.constant 0 : i32
    return %c0_i32, %c0_i32_0 : i32, i32
  }
  func.func @transform_3(%arg0: i32) -> (i32, i32) {
    %c0_i32 = arith.constant 0 : i32
    %c0_i32_0 = arith.constant 0 : i32
    %c0_i32_1 = arith.constant 0 : i32
    return %c0_i32, %c0_i32_0 : i32, i32
  }
  func.func @transform_4(%arg0: i32) -> (i32, i32) {
    %c0_i32 = arith.constant 0 : i32
    %c0_i32_0 = arith.constant 0 : i32
    %c0_i32_1 = arith.constant 0 : i32
    return %c0_i32, %c0_i32_0 : i32, i32
  }
  func.func @transform_5(%arg0: i32) -> (i32, i32) {
    %c0_i32 = arith.constant 0 : i32
    %c0_i32_0 = arith.constant 0 : i32
    %c0_i32_1 = arith.constant 0 : i32
    return %c0_i32, %c0_i32_0 : i32, i32
  }
  func.func @transform_6(%arg0: i32) -> (i32, i32) {
    %c0_i32 = arith.constant 0 : i32
    %c0_i32_0 = arith.constant 0 : i32
    %c0_i32_1 = arith.constant 0 : i32
    return %c0_i32, %c0_i32_0 : i32, i32
  }
  func.func @transform_7(%arg0: i32) -> (i32, i32) {
    %c0_i32 = arith.constant 0 : i32
    %c0_i32_0 = arith.constant 0 : i32
    return %arg0, %c0_i32 : i32, i32
  }
}

</mosaic_0001>

<bundles_post_ra>
// kernel: encoder_forward.1
= control target key start
LH: loop header
LB: loop body
LE: loop exit
PB: predicated region body
PF: predicated region fallthrough
CT: control target
= control target key end

     0   :  { %v6443_v32 = vmov 1983009808   ;;  %v35_v34 = vlaneseq  ;;  %s8776_s0 = inlined_call_operand.vmem [shape: f32[2,1024], index: 0, kind: input, shape index: {}]   ;;  %s8777_s1 = inlined_call_operand.vmem [shape: bf16[1024,1024], index: 1, kind: input, shape index: {}]   ;;  %s8778_s2 = inlined_call_operand.vmem [shape: f32[1,1024], index: 2, kind: input, shape index: {}]   ;;  %s8779_s3 = inlined_call_operand.vmem [shape: bf16[1024,256], index: 3, kind: input, shape index: {}]   ;;  %s8780_s4 = inlined_call_operand.vmem [shape: f32[1,256], index: 4, kind: input, shape index: {}]   ;;  %s8781_s5 = inlined_call_operand.vmem [shape: bf16[256,512], index: 5, kind: input, shape index: {}]   ;;  %s8782_s6 = inlined_call_operand.vmem [shape: f32[1,512], index: 6, kind: input, shape index: {}]   ;;  %s8783_s7 = inlined_call_operand.hbm [shape: f32[2,512], index: 7, kind: output, shape index: {}]  }
   0x1   :  { %v81_v0 = vld [vmem:[%s8777_s1] sm:$0xff]  ;;  %v33_v33 = vunpack.c.l.s4 %v6443_v32 }
   0x2   :  { %v85_v1 = vld [vmem:[%s8777_s1 + $0x20] sm:$0xff]  ;;  %v6551_v44 = vshrl.u32 %v35_v34, 7 }
   0x3   :  { %v209_v2 = vld [vmem:[%s8777_s1 + $0x400] sm:$0xff]  ;;  %v5355_v3 = vcombine.high %v81_v0, %v85_v1  ;;  %v5354_v5 = vcombine.low %v81_v0, %v85_v1  ;;  %v34_v43 = vunpack.c.0.s8 %v33_v33 }
   0x4   :  { %v213_v4 = vld [vmem:[%s8777_s1 + $0x420] sm:$0xff] }
   0x5   :  { %v89_v6 = vld [vmem:[%s8777_s1 + $0x40] sm:$0xff]  ;;  %v5483_v8 = vcombine.high %v209_v2, %v213_v4  ;;  %v5482_v9 = vcombine.low %v209_v2, %v213_v4  ;;  %3195 = vmatprep.subr.bf16.mxu1 %v5355_v3  ;;  %v6566_v53 = vsub.s32 %v34_v43, %v6551_v44 }
   0x6   :  { %v93_v7 = vld [vmem:[%s8777_s1 + $0x60] sm:$0xff]  ;;  %3196 = vmatpush1.bf16.msra.mxu1 %v5354_v5 }
   0x7   :  { %v5363_v10 = vcombine.high %v89_v6, %v93_v7  ;;  %v217_v11 = vld [vmem:[%s8777_s1 + $0x440] sm:$0xff]  ;;  %3236 = vmatprep.subr.bf16.mxu0 %v5483_v8  ;;  %v5362_v18 = vcombine.low %v89_v6, %v93_v7 }
   0x8   :  { %v221_v12 = vld [vmem:[%s8777_s1 + $0x460] sm:$0xff]  ;;  %3237 = vmatpush1.bf16.msra.mxu0 %v5482_v9 }
   0x9   :  { %v97_v13 = vld [vmem:[%s8777_s1 + $0x80] sm:$0xff]  ;;  %v5491_v14 = vcombine.high %v217_v11, %v221_v12  ;;  %3197 = vmatprep.subr.bf16.mxu1 %v5363_v10  ;;  %v5490_v19 = vcombine.low %v217_v11, %v221_v12 }
   0xa   :  { %v101_v15 = vld [vmem:[%s8777_s1 + $0xa0] sm:$0xff]  ;;  %3198 = vmatpush1.bf16.msra.mxu1 %v5362_v18 }
   0xb   :  { %v225_v16 = vld [vmem:[%s8777_s1 + $0x480] sm:$0xff]  ;;  %v5371_v20 = vcombine.high %v97_v13, %v101_v15  ;;  %3238 = vmatprep.subr.bf16.mxu0 %v5491_v14  ;;  %v5370_v26 = vcombine.low %v97_v13, %v101_v15 }
   0xc   :  { %v229_v17 = vld [vmem:[%s8777_s1 + $0x4a0] sm:$0xff]  ;;  %3239 = vmatpush1.bf16.msra.mxu0 %v5490_v19 }
   0xd   :  { %v5499_v21 = vcombine.high %v225_v16, %v229_v17  ;;  %v105_v22 = vld [vmem:[%s8777_s1 + $0xc0] sm:$0xff]  ;;  %3199 = vmatprep.subr.bf16.mxu1 %v5371_v20  ;;  %v5498_v27 = vcombine.low %v225_v16, %v229_v17 }
   0xe   :  { %v109_v23 = vld [vmem:[%s8777_s1 + $0xe0] sm:$0xff]  ;;  %3200 = vmatpush1.bf16.msra.mxu1 %v5370_v26 }
   0xf   :  { %v233_v24 = vld [vmem:[%s8777_s1 + $0x4c0] sm:$0xff]  ;;  %v5379_v28 = vcombine.high %v105_v22, %v109_v23  ;;  %3240 = vmatprep.subr.bf16.mxu0 %v5499_v21  ;;  %v5378_v37 = vcombine.low %v105_v22, %v109_v23 }
  0x10   :  { %v237_v25 = vld [vmem:[%s8777_s1 + $0x4e0] sm:$0xff]  ;;  %3241 = vmatpush1.bf16.msra.mxu0 %v5498_v27 }
  0x11   :  { %v5507_v29 = vcombine.high %v233_v24, %v237_v25  ;;  %v113_v30 = vld [vmem:[%s8777_s1 + $0x100] sm:$0xff]  ;;  %3201 = vmatprep.subr.bf16.mxu1 %v5379_v28  ;;  %v5506_v38 = vcombine.low %v233_v24, %v237_v25 }
  0x12   :  { %v117_v31 = vld [vmem:[%s8777_s1 + $0x120] sm:$0xff]  ;;  %3202 = vmatpush1.bf16.msra.mxu1 %v5378_v37 }
  0x13   :  { %v241_v35 = vld [vmem:[%s8777_s1 + $0x500] sm:$0xff]  ;;  %v5387_v39 = vcombine.high %v113_v30, %v117_v31  ;;  %3242 = vmatprep.subr.bf16.mxu0 %v5507_v29  ;;  %v5386_v47 = vcombine.low %v113_v30, %v117_v31 }
  0x14   :  { %v245_v36 = vld [vmem:[%s8777_s1 + $0x520] sm:$0xff]  ;;  %3243 = vmatpush1.bf16.msra.mxu0 %v5506_v38 }
  0x15   :  { %v5515_v40 = vcombine.high %v241_v35, %v245_v36  ;;  %v121_v41 = vld [vmem:[%s8777_s1 + $0x140] sm:$0xff]  ;;  %3203 = vmatprep.subr.bf16.mxu1 %v5387_v39  ;;  %v5514_v48 = vcombine.low %v241_v35, %v245_v36 }
  0x16   :  { %v125_v42 = vld [vmem:[%s8777_s1 + $0x160] sm:$0xff]  ;;  %3204 = vmatpush1.bf16.msra.mxu1 %v5386_v47 }
  0x17   :  { %v249_v45 = vld [vmem:[%s8777_s1 + $0x540] sm:$0xff]  ;;  %v5395_v49 = vcombine.high %v121_v41, %v125_v42  ;;  %3244 = vmatprep.subr.bf16.mxu0 %v5515_v40  ;;  %v5394_v56 = vcombine.low %v121_v41, %v125_v42 }
  0x18   :  { %v253_v46 = vld [vmem:[%s8777_s1 + $0x560] sm:$0xff]  ;;  %3245 = vmatpush1.bf16.msra.mxu0 %v5514_v48 }
  0x19   :  { %v5523_v50 = vcombine.high %v249_v45, %v253_v46  ;;  %v129_v51 = vld [vmem:[%s8777_s1 + $0x180] sm:$0xff]  ;;  %3205 = vmatprep.subr.bf16.mxu1 %v5395_v49  ;;  %v5522_v57 = vcombine.low %v249_v45, %v253_v46 }
  0x1a   :  { %v133_v52 = vld [vmem:[%s8777_s1 + $0x1a0] sm:$0xff]  ;;  %3206 = vmatpush1.bf16.msra.mxu1 %v5394_v56 }
  0x1b   :  { %v257_v54 = vld [vmem:[%s8777_s1 + $0x580] sm:$0xff]  ;;  %v5403_v58 = vcombine.high %v129_v51, %v133_v52  ;;  %3246 = vmatprep.subr.bf16.mxu0 %v5523_v50  ;;  %v5402_v3 = vcombine.low %v129_v51, %v133_v52 }
  0x1c   :  { %v261_v55 = vld [vmem:[%s8777_s1 + $0x5a0] sm:$0xff]  ;;  %3247 = vmatpush1.bf16.msra.mxu0 %v5522_v57 }
  0x1d   :  { %v27_v59 = vld [vmem:[%s8776_s0] sm:$0xff]  ;;  %v5531_v60 = vcombine.high %v257_v54, %v261_v55  ;;  %3207 = vmatprep.subr.bf16.mxu1 %v5403_v58  ;;  %v5530_v6 = vcombine.low %v257_v54, %v261_v55 }
  0x1e   :  { %v137_v61 = vld [vmem:[%s8777_s1 + $0x1c0] sm:$0xff]  ;;  %v6584_v63 = vrot.slane %v27_v59, %v6566_v53  ;;  %v31_v0 = vcombine.high %v27_v59, %v27_v59  ;;  %3208 = vmatpush1.bf16.msra.mxu1 %v5402_v3 }
  0x1f   :  { %v141_v62 = vld [vmem:[%s8777_s1 + $0x1e0] sm:$0xff]  ;;  %3248 = vmatprep.subr.bf16.mxu0 %v5531_v60 }
  0x20   :  { %v265_v1 = vld [vmem:[%s8777_s1 + $0x5c0] sm:$0xff]  ;;  %v46_v4 = vcombine.high %v6584_v63, %v6584_v63  ;;  %v6595_v5 = vrot.slane %v31_v0, %v6566_v53  ;;  %v5411_v7 = vcombine.high %v137_v61, %v141_v62  ;;  %v5410_v15 = vcombine.low %v137_v61, %v141_v62  ;;  %3249 = vmatpush1.bf16.msra.mxu0 %v5530_v6 }
  0x21   :  { %v269_v2 = vld [vmem:[%s8777_s1 + $0x5e0] sm:$0xff] }
  0x22   :  { %v5539_v8 = vcombine.high %v265_v1, %v269_v2  ;;  %v145_v9 = vld [vmem:[%s8777_s1 + $0x200] sm:$0xff]  ;;  %v6603_v11 = vpack.c.bf16 %v46_v4, %v46_v4  ;;  %v47_v12 = vcombine.high %v6595_v5, %v6595_v5  ;;  %3209 = vmatprep.subr.bf16.mxu1 %v5411_v7  ;;  %v5538_v17 = vcombine.low %v265_v1, %v269_v2 }
  0x23   :  { %v149_v10 = vld [vmem:[%s8777_s1 + $0x220] sm:$0xff]  ;;  %3210 = vmatpush1.bf16.msra.mxu1 %v5410_v15 }
  0x24   :  { %v273_v13 = vld [vmem:[%s8777_s1 + $0x600] sm:$0xff]  ;;  %3227 = vmatprep.mubr.bf16.mxu1 %v6603_v11  ;;  %v6614_v16 = vpack.c.bf16 %v47_v12, %v47_v12  ;;  %v5419_v18 = vcombine.high %v145_v9, %v149_v10  ;;  %3250 = vmatprep.subr.bf16.mxu0 %v5539_v8  ;;  %v5418_v24 = vcombine.low %v145_v9, %v149_v10 }
  0x25   :  { %v277_v14 = vld [vmem:[%s8777_s1 + $0x620] sm:$0xff]  ;;  %3251 = vmatpush1.bf16.msra.mxu0 %v5538_v17 }
  0x26   :  { %v5547_v19 = vcombine.high %v273_v13, %v277_v14  ;;  %v153_v20 = vld [vmem:[%s8777_s1 + $0x240] sm:$0xff]  ;;  %3268 = vmatprep.mubr.bf16.mxu0 %v6614_v16  ;;  %3211 = vmatprep.subr.bf16.mxu1 %v5419_v18  ;;  %v5546_v25 = vcombine.low %v273_v13, %v277_v14  ;;  %v6704_v13 = vld [vmem:[%s8776_s0 + $0x8] sm:$0xff] }
  0x27   :  { %v157_v21 = vld [vmem:[%s8777_s1 + $0x260] sm:$0xff]  ;;  %3212 = vmatpush1.bf16.msra.mxu1 %v5418_v24 }
  0x28   :  { %v281_v22 = vld [vmem:[%s8777_s1 + $0x640] sm:$0xff]  ;;  %v5427_v26 = vcombine.high %v153_v20, %v157_v21  ;;  %3252 = vmatprep.subr.bf16.mxu0 %v5547_v19  ;;  %v5426_v32 = vcombine.low %v153_v20, %v157_v21  ;;  %v82_v19 = vld [vmem:[%s8777_s1 + $0x8] sm:$0xff]  ;;  %v6714_v21 = vrot.slane %v6704_v13, %v6566_v53 }
  0x29   :  { %v285_v23 = vld [vmem:[%s8777_s1 + $0x660] sm:$0xff]  ;;  %3253 = vmatpush1.bf16.msra.mxu0 %v5546_v25  ;;  %v86_v20 = vld [vmem:[%s8777_s1 + $0x28] sm:$0xff] }
  0x2a   :  { %v5555_v27 = vcombine.high %v281_v22, %v285_v23  ;;  %v161_v28 = vld [vmem:[%s8777_s1 + $0x280] sm:$0xff]  ;;  %3213 = vmatprep.subr.bf16.mxu1 %v5427_v26  ;;  %v5554_v33 = vcombine.low %v281_v22, %v285_v23  ;;  %v5357_v26 = vcombine.high %v82_v19, %v86_v20 }
  0x2b   :  { %v165_v29 = vld [vmem:[%s8777_s1 + $0x2a0] sm:$0xff]  ;;  %3214 = vmatpush1.bf16.msra.mxu1 %v5426_v32 }
  0x2c   :  { %v289_v30 = vld [vmem:[%s8777_s1 + $0x680] sm:$0xff]  ;;  %v5435_v34 = vcombine.high %v161_v28, %v165_v29  ;;  %3254 = vmatprep.subr.bf16.mxu0 %v5555_v27  ;;  %v5434_v40 = vcombine.low %v161_v28, %v165_v29  ;;  %v90_v28 = vld [vmem:[%s8777_s1 + $0x48] sm:$0xff] }
  0x2d   :  { %v293_v31 = vld [vmem:[%s8777_s1 + $0x6a0] sm:$0xff]  ;;  %3255 = vmatpush1.bf16.msra.mxu0 %v5554_v33  ;;  %v94_v29 = vld [vmem:[%s8777_s1 + $0x68] sm:$0xff] }
  0x2e   :  { %v5563_v35 = vcombine.high %v289_v30, %v293_v31  ;;  %v169_v36 = vld [vmem:[%s8777_s1 + $0x2c0] sm:$0xff]  ;;  %3215 = vmatprep.subr.bf16.mxu1 %v5435_v34  ;;  %v5562_v41 = vcombine.low %v289_v30, %v293_v31  ;;  %v63_v30 = vcombine.high %v6714_v21, %v6714_v21  ;;  %v6732_v31 = vpack.c.bf16 %v6584_v63, %v6584_v63 }
  0x2f   :  { %v173_v37 = vld [vmem:[%s8777_s1 + $0x2e0] sm:$0xff]  ;;  %3216 = vmatpush1.bf16.msra.mxu1 %v5434_v40  ;;  %v5356_v34 = vcombine.low %v82_v19, %v86_v20 }
  0x30   :  { %v297_v38 = vld [vmem:[%s8777_s1 + $0x6c0] sm:$0xff]  ;;  %v5443_v42 = vcombine.high %v169_v36, %v173_v37  ;;  %3256 = vmatprep.subr.bf16.mxu0 %v5563_v35  ;;  %v5442_v49 = vcombine.low %v169_v36, %v173_v37  ;;  %v6742_v35 = vpack.c.bf16 %v6595_v5, %v6595_v5  ;;  %v5365_v37 = vcombine.high %v90_v28, %v94_v29  ;;  %v102_v5 = vld [vmem:[%s8777_s1 + $0xa8] sm:$0xff] }
  0x31   :  { %v301_v39 = vld [vmem:[%s8777_s1 + $0x6e0] sm:$0xff]  ;;  %3257 = vmatpush1.bf16.msra.mxu0 %v5562_v41  ;;  %v6756_v41 = vpack.c.bf16 %v63_v30, %v63_v30 }
  0x32   :  { %v5571_v43 = vcombine.high %v297_v38, %v301_v39  ;;  %v177_v45 = vld [vmem:[%s8777_s1 + $0x300] sm:$0xff]  ;;  %3217 = vmatprep.subr.bf16.mxu1 %v5443_v42  ;;  %v5570_v50 = vcombine.low %v297_v38, %v301_v39  ;;  %v98_v39 = vld [vmem:[%s8777_s1 + $0x88] sm:$0xff]  ;;  %v5364_v42 = vcombine.low %v90_v28, %v94_v29 }
  0x33   :  { %v181_v46 = vld [vmem:[%s8777_s1 + $0x320] sm:$0xff]  ;;  %3218 = vmatpush1.bf16.msra.mxu1 %v5442_v49 }
  0x34   :  { %v305_v47 = vld [vmem:[%s8777_s1 + $0x700] sm:$0xff]  ;;  %v5451_v51 = vcombine.high %v177_v45, %v181_v46  ;;  %3258 = vmatprep.subr.bf16.mxu0 %v5571_v43  ;;  %v5450_v58 = vcombine.low %v177_v45, %v181_v46  ;;  %v5373_v45 = vcombine.high %v98_v39, %v102_v5 }
  0x35   :  { %v309_v48 = vld [vmem:[%s8777_s1 + $0x720] sm:$0xff]  ;;  %3259 = vmatpush1.bf16.msra.mxu0 %v5570_v50  ;;  %v110_v50 = vld [vmem:[%s8777_s1 + $0xe8] sm:$0xff] }
  0x36   :  { %v5579_v52 = vcombine.high %v305_v47, %v309_v48  ;;  %v185_v54 = vld [vmem:[%s8777_s1 + $0x340] sm:$0xff]  ;;  %3219 = vmatprep.subr.bf16.mxu1 %v5451_v51  ;;  %v5578_v59 = vcombine.low %v305_v47, %v309_v48  ;;  %v106_v48 = vld [vmem:[%s8777_s1 + $0xc8] sm:$0xff]  ;;  %v5372_v51 = vcombine.low %v98_v39, %v102_v5 }
  0x37   :  { %v189_v55 = vld [vmem:[%s8777_s1 + $0x360] sm:$0xff]  ;;  %3220 = vmatpush1.bf16.msra.mxu1 %v5450_v58 }
  0x38   :  { %v313_v56 = vld [vmem:[%s8777_s1 + $0x740] sm:$0xff]  ;;  %v5459_v60 = vcombine.high %v185_v54, %v189_v55  ;;  %3260 = vmatprep.subr.bf16.mxu0 %v5579_v52  ;;  %v5458_v3 = vcombine.low %v185_v54, %v189_v55  ;;  %v5381_v54 = vcombine.high %v106_v48, %v110_v50 }
  0x39   :  { %v317_v57 = vld [vmem:[%s8777_s1 + $0x760] sm:$0xff]  ;;  %3261 = vmatpush1.bf16.msra.mxu0 %v5578_v59  ;;  %v118_v59 = vld [vmem:[%s8777_s1 + $0x128] sm:$0xff] }
  0x3a   :  { %v5587_v61 = vcombine.high %v313_v56, %v317_v57  ;;  %v193_v62 = vld [vmem:[%s8777_s1 + $0x380] sm:$0xff]  ;;  %3221 = vmatprep.subr.bf16.mxu1 %v5459_v60  ;;  %v5586_v4 = vcombine.low %v313_v56, %v317_v57  ;;  %v114_v57 = vld [vmem:[%s8777_s1 + $0x108] sm:$0xff]  ;;  %v5380_v60 = vcombine.low %v106_v48, %v110_v50 }
  0x3b   :  { %v197_v0 = vld [vmem:[%s8777_s1 + $0x3a0] sm:$0xff]  ;;  %3222 = vmatpush1.bf16.msra.mxu1 %v5458_v3 }
  0x3c   :  { %v321_v1 = vld [vmem:[%s8777_s1 + $0x780] sm:$0xff]  ;;  %v5467_v6 = vcombine.high %v193_v62, %v197_v0  ;;  %3262 = vmatprep.subr.bf16.mxu0 %v5587_v61  ;;  %v5466_v14 = vcombine.low %v193_v62, %v197_v0  ;;  %v5389_v62 = vcombine.high %v114_v57, %v118_v59 }
  0x3d   :  { %v325_v2 = vld [vmem:[%s8777_s1 + $0x7a0] sm:$0xff]  ;;  %3263 = vmatpush1.bf16.msra.mxu0 %v5586_v4  ;;  %v126_v4 = vld [vmem:[%s8777_s1 + $0x168] sm:$0xff] }
  0x3e   :  { %v5595_v7 = vcombine.high %v321_v1, %v325_v2  ;;  %v201_v8 = vld [vmem:[%s8777_s1 + $0x3c0] sm:$0xff]  ;;  %3223 = vmatprep.subr.bf16.mxu1 %v5467_v6  ;;  %v5594_v15 = vcombine.low %v321_v1, %v325_v2  ;;  %v122_v2 = vld [vmem:[%s8777_s1 + $0x148] sm:$0xff]  ;;  %v5388_v6 = vcombine.low %v114_v57, %v118_v59 }
  0x3f   :  { %v205_v9 = vld [vmem:[%s8777_s1 + $0x3e0] sm:$0xff]  ;;  %3224 = vmatpush1.bf16.msra.mxu1 %v5466_v14 }
  0x40   :  { %v329_v10 = vld [vmem:[%s8777_s1 + $0x7c0] sm:$0xff]  ;;  %v5475_v17 = vcombine.high %v201_v8, %v205_v9  ;;  %3264 = vmatprep.subr.bf16.mxu0 %v5595_v7  ;;  %v5474_v24 = vcombine.low %v201_v8, %v205_v9  ;;  %v5397_v8 = vcombine.high %v122_v2, %v126_v4 }
  0x41   :  { %v333_v12 = vld [vmem:[%s8777_s1 + $0x7e0] sm:$0xff]  ;;  %3265 = vmatpush1.bf16.msra.mxu0 %v5594_v15  ;;  %v134_v15 = vld [vmem:[%s8777_s1 + $0x1a8] sm:$0xff] }
  0x42   :  { %v5603_v18 = vcombine.high %v329_v10, %v333_v12  ;;  %v337_v22 = vld [vmem:[%s8777_s1 + $0x800] sm:$0xff]  ;;  %3225 = vmatprep.subr.bf16.mxu1 %v5475_v17  ;;  %v5602_v25 = vcombine.low %v329_v10, %v333_v12  ;;  %v130_v12 = vld [vmem:[%s8777_s1 + $0x188] sm:$0xff]  ;;  %v5396_v17 = vcombine.low %v122_v2, %v126_v4 }
  0x43   :  { %v341_v23 = vld [vmem:[%s8777_s1 + $0x820] sm:$0xff]  ;;  %3226 = vmatpush1.bf16.msra.mxu1 %v5474_v24  ;;  %v5405_v19 = vcombine.high %v130_v12, %v134_v15 }
  0x44   :  { %3266 = vmatprep.subr.bf16.mxu0 %v5603_v18  ;;  %v5611_v27 = vcombine.high %v337_v22, %v341_v23  ;;  %v345_v32 = vld [vmem:[%s8777_s1 + $0x840] sm:$0xff]  ;;  %v5610_v36 = vcombine.low %v337_v22, %v341_v23  ;;  %3359 = vmatprep.subr.bf16.mxu1 %v5357_v26  ;;  %v138_v23 = vld [vmem:[%s8777_s1 + $0x1c8] sm:$0xff]  ;;  %v5404_v26 = vcombine.low %v130_v12, %v134_v15 }
  0x45   :  { %v349_v33 = vld [vmem:[%s8777_s1 + $0x860] sm:$0xff]  ;;  %3267 = vmatpush1.bf16.msra.mxu0 %v5602_v25  ;;  %v142_v25 = vld [vmem:[%s8777_s1 + $0x1e8] sm:$0xff] }
  0x46   :  { %v353_v63 = vld [vmem:[%s8777_s1 + $0x880] sm:$0xff]  ;;  %3277 = vmatprep.subr.bf16.mxu0 %v5611_v27  ;;  %v5619_v40 = vcombine.high %v345_v32, %v349_v33  ;;  %3228 = vmatmul.mubr.bf16.vlgmr.msra.gmra.mrb[0].mxu1 %v6732_v31  ;;  %v5618_v43 = vcombine.low %v345_v32, %v349_v33  ;;  %v5413_v28 = vcombine.high %v138_v23, %v142_v25  ;;  %v146_v32 = vld [vmem:[%s8777_s1 + $0x208] sm:$0xff] }
  0x47   :  { %v357_v38 = vld [vmem:[%s8777_s1 + $0x8a0] sm:$0xff]  ;;  %3360 = vmatpush1.bf16.msra.mxu1 %v5356_v34  ;;  %3391 = vmatprep.mubr.bf16.mxu1 %v6603_v11  ;;  %v150_v34 = vld [vmem:[%s8777_s1 + $0x228] sm:$0xff] }
  0x48   :  { %3269 = vmatmul.mubr.bf16.vlgmr.msra.gmra.mrb[0].mxu0 %v6742_v35  ;;  %3361 = vmatprep.subr.bf16.mxu1 %v5365_v37  ;;  %v361_v46 = vld [vmem:[%s8777_s1 + $0x8c0] sm:$0xff]  ;;  %v5627_v49 = vcombine.high %v353_v63, %v357_v38  ;;  %v5626_v52 = vcombine.low %v353_v63, %v357_v38  ;;  %v5421_v63 = vcombine.high %v146_v32, %v150_v34 }
  0x49   :  { %3278 = vmatpush1.bf16.msra.mxu0 %v5610_v36  ;;  %v365_v47 = vld [vmem:[%s8777_s1 + $0x8e0] sm:$0xff]  ;;  %3309 = vmatprep.mubr.bf16.mxu0 %v6756_v41  ;;  %v5412_v36 = vcombine.low %v138_v23, %v142_v25 }
  0x4a   :  { %3279 = vmatprep.subr.bf16.mxu0 %v5619_v40  ;;  %v369_v55 = vld [vmem:[%s8777_s1 + $0x900] sm:$0xff]  ;;  %v5635_v58 = vcombine.high %v361_v46, %v365_v47  ;;  %v5634_v61 = vcombine.low %v361_v46, %v365_v47  ;;  %v154_v40 = vld [vmem:[%s8777_s1 + $0x248] sm:$0xff] }
  0x4b   :  { %3362 = vmatpush1.bf16.msra.mxu1 %v5364_v42  ;;  %v373_v56 = vld [vmem:[%s8777_s1 + $0x920] sm:$0xff]  ;;  %v158_v42 = vld [vmem:[%s8777_s1 + $0x268] sm:$0xff] }
  0x4c   :  { %3363 = vmatprep.subr.bf16.mxu1 %v5373_v45  ;;  %v377_v0 = vld [vmem:[%s8777_s1 + $0x940] sm:$0xff]  ;;  %v5643_v3 = vcombine.high %v369_v55, %v373_v56  ;;  %v5642_v7 = vcombine.low %v369_v55, %v373_v56  ;;  %v5429_v46 = vcombine.high %v154_v40, %v158_v42 }
  0x4d   :  { %3280 = vmatpush1.bf16.msra.mxu0 %v5618_v43  ;;  %v381_v1 = vld [vmem:[%s8777_s1 + $0x960] sm:$0xff]  ;;  %v5420_v43 = vcombine.low %v146_v32, %v150_v34 }
  0x4e   :  { %3281 = vmatprep.subr.bf16.mxu0 %v5627_v49  ;;  %v385_v9 = vld [vmem:[%s8777_s1 + $0x980] sm:$0xff]  ;;  %v5651_v14 = vcombine.high %v377_v0, %v381_v1  ;;  %v5650_v18 = vcombine.low %v377_v0, %v381_v1  ;;  %v162_v49 = vld [vmem:[%s8777_s1 + $0x288] sm:$0xff] }
  0x4f   :  { %3364 = vmatpush1.bf16.msra.mxu1 %v5372_v51  ;;  %v389_v10 = vld [vmem:[%s8777_s1 + $0x9a0] sm:$0xff]  ;;  %v166_v51 = vld [vmem:[%s8777_s1 + $0x2a8] sm:$0xff] }
  0x50   :  { %3365 = vmatprep.subr.bf16.mxu1 %v5381_v54  ;;  %v393_v20 = vld [vmem:[%s8777_s1 + $0x9c0] sm:$0xff]  ;;  %v5659_v24 = vcombine.high %v385_v9, %v389_v10  ;;  %v5658_v27 = vcombine.low %v385_v9, %v389_v10  ;;  %v5437_v55 = vcombine.high %v162_v49, %v166_v51 }
  0x51   :  { %3282 = vmatpush1.bf16.msra.mxu0 %v5626_v52  ;;  %v397_v22 = vld [vmem:[%s8777_s1 + $0x9e0] sm:$0xff]  ;;  %v5428_v52 = vcombine.low %v154_v40, %v158_v42  ;;  %v210_v42 = vld [vmem:[%s8777_s1 + $0x408] sm:$0xff] }
  0x52   :  { %3283 = vmatprep.subr.bf16.mxu0 %v5635_v58  ;;  %v401_v29 = vld [vmem:[%s8777_s1 + $0xa00] sm:$0xff]  ;;  %v5667_v33 = vcombine.high %v393_v20, %v397_v22  ;;  %v5666_v37 = vcombine.low %v393_v20, %v397_v22  ;;  %v170_v58 = vld [vmem:[%s8777_s1 + $0x2c8] sm:$0xff] }
  0x53   :  { %3366 = vmatpush1.bf16.msra.mxu1 %v5380_v60  ;;  %v405_v30 = vld [vmem:[%s8777_s1 + $0xa20] sm:$0xff]  ;;  %v174_v60 = vld [vmem:[%s8777_s1 + $0x2e8] sm:$0xff] }
  0x54   :  { %3367 = vmatprep.subr.bf16.mxu1 %v5389_v62  ;;  %v409_v38 = vld [vmem:[%s8777_s1 + $0xa40] sm:$0xff]  ;;  %v5675_v5 = vcombine.high %v401_v29, %v405_v30  ;;  %v5674_v45 = vcombine.low %v401_v29, %v405_v30  ;;  %v5445_v0 = vcombine.high %v170_v58, %v174_v60 }
  0x55   :  { %3284 = vmatpush1.bf16.msra.mxu0 %v5634_v61  ;;  %v413_v39 = vld [vmem:[%s8777_s1 + $0xa60] sm:$0xff]  ;;  %v5436_v61 = vcombine.low %v162_v49, %v166_v51  ;;  %v218_v51 = vld [vmem:[%s8777_s1 + $0x448] sm:$0xff] }
  0x56   :  { %3285 = vmatprep.subr.bf16.mxu0 %v5643_v3  ;;  %v417_v47 = vld [vmem:[%s8777_s1 + $0xa80] sm:$0xff]  ;;  %v5683_v50 = vcombine.high %v409_v38, %v413_v39  ;;  %v5682_v54 = vcombine.low %v409_v38, %v413_v39  ;;  %v178_v3 = vld [vmem:[%s8777_s1 + $0x308] sm:$0xff] }
  0x57   :  { %3368 = vmatpush1.bf16.msra.mxu1 %v5388_v6  ;;  %v421_v48 = vld [vmem:[%s8777_s1 + $0xaa0] sm:$0xff]  ;;  %v182_v6 = vld [vmem:[%s8777_s1 + $0x328] sm:$0xff] }
  0x58   :  { %3369 = vmatprep.subr.bf16.mxu1 %v5397_v8  ;;  %v425_v56 = vld [vmem:[%s8777_s1 + $0xac0] sm:$0xff]  ;;  %v5691_v59 = vcombine.high %v417_v47, %v421_v48  ;;  %v5690_v62 = vcombine.low %v417_v47, %v421_v48  ;;  %v5453_v9 = vcombine.high %v178_v3, %v182_v6 }
  0x59   :  { %3286 = vmatpush1.bf16.msra.mxu0 %v5642_v7  ;;  %v429_v57 = vld [vmem:[%s8777_s1 + $0xae0] sm:$0xff]  ;;  %v5444_v7 = vcombine.low %v170_v58, %v174_v60 }
  0x5a   :  { %3287 = vmatprep.subr.bf16.mxu0 %v5651_v14  ;;  %v433_v1 = vld [vmem:[%s8777_s1 + $0xb00] sm:$0xff]  ;;  %v5699_v4 = vcombine.high %v425_v56, %v429_v57  ;;  %v5698_v8 = vcombine.low %v425_v56, %v429_v57  ;;  %v186_v14 = vld [vmem:[%s8777_s1 + $0x348] sm:$0xff]  ;;  %v6951_v57 = vpack.c.bf16 %v6714_v21, %v6714_v21 }
  0x5b   :  { %3370 = vmatpush1.bf16.msra.mxu1 %v5396_v17  ;;  %v437_v2 = vld [vmem:[%s8777_s1 + $0xb20] sm:$0xff]  ;;  %v190_v17 = vld [vmem:[%s8777_s1 + $0x368] sm:$0xff] }
  0x5c   :  { %3371 = vmatprep.subr.bf16.mxu1 %v5405_v19  ;;  %v441_v10 = vld [vmem:[%s8777_s1 + $0xb40] sm:$0xff]  ;;  %v5707_v15 = vcombine.high %v433_v1, %v437_v2  ;;  %v5706_v19 = vcombine.low %v433_v1, %v437_v2  ;;  %v5461_v20 = vcombine.high %v186_v14, %v190_v17  ;;  %v230_v21 = vld [vmem:[%s8777_s1 + $0x4a8] sm:$0xff] }
  0x5d   :  { %3288 = vmatpush1.bf16.msra.mxu0 %v5650_v18  ;;  %v445_v12 = vld [vmem:[%s8777_s1 + $0xb60] sm:$0xff]  ;;  %v5452_v18 = vcombine.low %v178_v3, %v182_v6 }
  0x5e   :  { %3289 = vmatprep.subr.bf16.mxu0 %v5659_v24  ;;  %v449_v22 = vld [vmem:[%s8777_s1 + $0xb80] sm:$0xff]  ;;  %v194_v24 = vld [vmem:[%s8777_s1 + $0x388] sm:$0xff]  ;;  %v5715_v25 = vcombine.high %v441_v10, %v445_v12 }
  0x5f   :  { %3372 = vmatpush1.bf16.msra.mxu1 %v5404_v26  ;;  %v453_v23 = vld [vmem:[%s8777_s1 + $0xba0] sm:$0xff]  ;;  %v198_v26 = vld [vmem:[%s8777_s1 + $0x3a8] sm:$0xff] }
  0x60   :  { %3373 = vmatprep.subr.bf16.mxu1 %v5413_v28  ;;  %v5714_v28 = vcombine.low %v441_v10, %v445_v12  ;;  %v5469_v29 = vcombine.high %v194_v24, %v198_v26  ;;  %v457_v30 = vld [vmem:[%s8777_s1 + $0xbc0] sm:$0xff]  ;;  %v5723_v34 = vcombine.high %v449_v22, %v453_v23  ;;  %v5722_v38 = vcombine.low %v449_v22, %v453_v23  ;;  %v238_v10 = vld [vmem:[%s8777_s1 + $0x4e8] sm:$0xff] }
  0x61   :  { %3290 = vmatpush1.bf16.msra.mxu0 %v5658_v27  ;;  %v5460_v27 = vcombine.low %v186_v14, %v190_v17  ;;  %v461_v32 = vld [vmem:[%s8777_s1 + $0xbe0] sm:$0xff]  ;;  %v246_v22 = vld [vmem:[%s8777_s1 + $0x528] sm:$0xff] }
  0x62   :  { %3291 = vmatprep.subr.bf16.mxu0 %v5667_v33  ;;  %v202_v33 = vld [vmem:[%s8777_s1 + $0x3c8] sm:$0xff]  ;;  %v465_v40 = vld [vmem:[%s8777_s1 + $0xc00] sm:$0xff]  ;;  %v5730_v47 = vcombine.low %v457_v30, %v461_v32 }
  0x63   :  { %3374 = vmatpush1.bf16.msra.mxu1 %v5412_v36  ;;  %v206_v36 = vld [vmem:[%s8777_s1 + $0x3e8] sm:$0xff]  ;;  %v473_v49 = vld [vmem:[%s8777_s1 + $0xc40] sm:$0xff] }
  0x64   :  { %3375 = vmatprep.subr.bf16.mxu1 %v5421_v63  ;;  %v5468_v63 = vcombine.low %v194_v24, %v198_v26  ;;  %v5477_v39 = vcombine.high %v202_v33, %v206_v36  ;;  %v481_v60 = vld [vmem:[%s8777_s1 + $0xc80] sm:$0xff] }
  0x65   :  { %3292 = vmatpush1.bf16.msra.mxu0 %v5666_v37  ;;  %v48_v37 = vcombine.high %v6704_v13, %v6704_v13  ;;  %v5731_v13 = vcombine.high %v457_v30, %v461_v32  ;;  %v489_v6 = vld [vmem:[%s8777_s1 + $0xcc0] sm:$0xff]  ;;  %v254_v30 = vld [vmem:[%s8777_s1 + $0x568] sm:$0xff] }
  0x66   :  { %3293 = vmatprep.subr.bf16.mxu0 %v5675_v5  ;;  %v469_v5 = vld [vmem:[%s8777_s1 + $0xc20] sm:$0xff] }
  0x67   :  { %3376 = vmatpush1.bf16.msra.mxu1 %v5420_v43  ;;  %v214_v43 = vld [vmem:[%s8777_s1 + $0x428] sm:$0xff]  ;;  %v5738_v58 = vcombine.low %v465_v40, %v469_v5  ;;  %v497_v17 = vld [vmem:[%s8777_s1 + $0xd00] sm:$0xff] }
  0x68   :  { %3377 = vmatprep.subr.bf16.mxu1 %v5429_v46  ;;  %v5476_v46 = vcombine.low %v202_v33, %v206_v36  ;;  %v5485_v48 = vcombine.high %v210_v42, %v214_v43  ;;  %v5484_v56 = vcombine.low %v210_v42, %v214_v43  ;;  %v505_v26 = vld [vmem:[%s8777_s1 + $0xd40] sm:$0xff] }
  0x69   :  { %3294 = vmatpush1.bf16.msra.mxu0 %v5674_v45  ;;  %v6933_v45 = vrot.slane %v48_v37, %v6566_v53  ;;  %v513_v36 = vld [vmem:[%s8777_s1 + $0xd80] sm:$0xff] }
  0x6a   :  { %3295 = vmatprep.subr.bf16.mxu0 %v5683_v50  ;;  %v477_v50 = vld [vmem:[%s8777_s1 + $0xc60] sm:$0xff] }
  0x6b   :  { %3378 = vmatpush1.bf16.msra.mxu1 %v5428_v52  ;;  %v5739_v52 = vcombine.high %v465_v40, %v469_v5  ;;  %v5746_v3 = vcombine.low %v473_v49, %v477_v50  ;;  %v517_v37 = vld [vmem:[%s8777_s1 + $0xda0] sm:$0xff] }
  0x6c   :  { %3379 = vmatprep.subr.bf16.mxu1 %v5437_v55  ;;  %v64_v55 = vcombine.high %v6933_v45, %v6933_v45  ;;  %v525_v43 = vld [vmem:[%s8777_s1 + $0xde0] sm:$0xff] }
  0x6d   :  { %3296 = vmatpush1.bf16.msra.mxu0 %v5682_v54  ;;  %v222_v54 = vld [vmem:[%s8777_s1 + $0x468] sm:$0xff] }
  0x6e   :  { %3297 = vmatprep.subr.bf16.mxu0 %v5691_v59  ;;  %v5493_v59 = vcombine.high %v218_v51, %v222_v54  ;;  %v6965_v1 = vpack.c.bf16 %v64_v55, %v64_v55  ;;  %v5492_v2 = vcombine.low %v218_v51, %v222_v54  ;;  %v533_v54 = vld [vmem:[%s8777_s1 + $0xe20] sm:$0xff]  ;;  %v274_v55 = vld [vmem:[%s8777_s1 + $0x608] sm:$0xff] }
  0x6f   :  { %3380 = vmatpush1.bf16.msra.mxu1 %v5436_v61  ;;  %v485_v61 = vld [vmem:[%s8777_s1 + $0xca0] sm:$0xff] }
  0x70   :  { %3381 = vmatprep.subr.bf16.mxu1 %v5445_v0  ;;  %v5747_v0 = vcombine.high %v473_v49, %v477_v50  ;;  %v5754_v14 = vcombine.low %v481_v60, %v485_v61  ;;  %v5786_v50 = vcombine.low %v513_v36, %v517_v37 }
  0x71   :  { %3298 = vmatpush1.bf16.msra.mxu0 %v5690_v62  ;;  %v226_v62 = vld [vmem:[%s8777_s1 + $0x488] sm:$0xff] }
  0x72   :  { %3299 = vmatprep.subr.bf16.mxu0 %v5699_v4  ;;  %v5501_v4 = vcombine.high %v226_v62, %v230_v21  ;;  %v5500_v12 = vcombine.low %v226_v62, %v230_v21  ;;  %v537_v62 = vld [vmem:[%s8777_s1 + $0xe40] sm:$0xff]  ;;  %v282_v21 = vld [vmem:[%s8777_s1 + $0x648] sm:$0xff] }
  0x73   :  { %3382 = vmatpush1.bf16.msra.mxu1 %v5444_v7  ;;  %v493_v7 = vld [vmem:[%s8777_s1 + $0xce0] sm:$0xff] }
  0x74   :  { %3383 = vmatprep.subr.bf16.mxu1 %v5453_v9  ;;  %v5755_v9 = vcombine.high %v481_v60, %v485_v61  ;;  %v5762_v24 = vcombine.low %v489_v6, %v493_v7 }
  0x75   :  { %3300 = vmatpush1.bf16.msra.mxu0 %v5698_v8  ;;  %v234_v8 = vld [vmem:[%s8777_s1 + $0x4c8] sm:$0xff] }
  0x76   :  { %3301 = vmatprep.subr.bf16.mxu0 %v5707_v15  ;;  %v5509_v15 = vcombine.high %v234_v8, %v238_v10  ;;  %v5508_v23 = vcombine.low %v234_v8, %v238_v10  ;;  %v294_v10 = vld [vmem:[%s8777_s1 + $0x6a8] sm:$0xff] }
  0x77   :  { %3384 = vmatpush1.bf16.msra.mxu1 %v5452_v18  ;;  %v501_v18 = vld [vmem:[%s8777_s1 + $0xd20] sm:$0xff] }
  0x78   :  { %3385 = vmatprep.subr.bf16.mxu1 %v5461_v20  ;;  %v5763_v20 = vcombine.high %v489_v6, %v493_v7  ;;  %v5770_v33 = vcombine.low %v497_v17, %v501_v18 }
  0x79   :  { %3302 = vmatpush1.bf16.msra.mxu0 %v5706_v19  ;;  %v242_v19 = vld [vmem:[%s8777_s1 + $0x508] sm:$0xff] }
  0x7a   :  { %3303 = vmatprep.subr.bf16.mxu0 %v5715_v25  ;;  %v5517_v25 = vcombine.high %v242_v19, %v246_v22  ;;  %v5516_v32 = vcombine.low %v242_v19, %v246_v22 }
  0x7b   :  { %3386 = vmatpush1.bf16.msra.mxu1 %v5460_v27  ;;  %v509_v27 = vld [vmem:[%s8777_s1 + $0xd60] sm:$0xff] }
  0x7c   :  { %3387 = vmatprep.subr.bf16.mxu1 %v5469_v29  ;;  %v5771_v29 = vcombine.high %v497_v17, %v501_v18  ;;  %v5778_v5 = vcombine.low %v505_v26, %v509_v27 }
  0x7d   :  { %3304 = vmatpush1.bf16.msra.mxu0 %v5714_v28  ;;  %v250_v28 = vld [vmem:[%s8777_s1 + $0x548] sm:$0xff] }
  0x7e   :  { %3305 = vmatprep.subr.bf16.mxu0 %v5723_v34  ;;  %v5525_v34 = vcombine.high %v250_v28, %v254_v30  ;;  %v5524_v40 = vcombine.low %v250_v28, %v254_v30 }
  0x7f   :  { %3388 = vmatpush1.bf16.msra.mxu1 %v5468_v63  ;;  %v258_v63 = vld [vmem:[%s8777_s1 + $0x588] sm:$0xff] }
  0x80   :  { %3389 = vmatprep.subr.bf16.mxu1 %v5477_v39  ;;  %v262_v39 = vld [vmem:[%s8777_s1 + $0x5a8] sm:$0xff] }
  0x81   :  { %3306 = vmatpush1.bf16.msra.mxu0 %v5722_v38  ;;  %v5779_v38 = vcombine.high %v505_v26, %v509_v27  ;;  %v5533_v42 = vcombine.high %v258_v63, %v262_v39  ;;  %v5532_v49 = vcombine.low %v258_v63, %v262_v39 }
  0x82   :  { %3307 = vmatprep.subr.bf16.mxu0 %v5731_v13  ;;  %v521_v13 = vld [vmem:[%s8777_s1 + $0xdc0] sm:$0xff] }
  0x83   :  { %3390 = vmatpush1.bf16.msra.mxu1 %v5476_v46  ;;  %v5787_v46 = vcombine.high %v513_v36, %v517_v37  ;;  %v5794_v60 = vcombine.low %v521_v13, %v525_v43 }
  0x84   :  { %3400 = vmatprep.subr.bf16.mxu1 %v5485_v48  ;;  %v270_v48 = vld [vmem:[%s8777_s1 + $0x5e8] sm:$0xff] }
  0x85   :  { %3308 = vmatpush1.bf16.msra.mxu0 %v5730_v47  ;;  %v266_v47 = vld [vmem:[%s8777_s1 + $0x5c8] sm:$0xff] }
  0x86   :  { %3318 = vmatprep.subr.bf16.mxu0 %v5739_v52  ;;  %3392 = vmatmul.mubr.bf16.vlgmr.msra.gmra.mrb[4].mxu1 %v6732_v31  ;;  %v5541_v51 = vcombine.high %v266_v47, %v270_v48  ;;  %v529_v52 = vld [vmem:[%s8777_s1 + $0xe00] sm:$0xff] }
  0x87   :  { %3401 = vmatpush1.bf16.msra.mxu1 %v5484_v56  ;;  %3432 = vmatprep.mubr.bf16.mxu1 %v6614_v16  ;;  %v5795_v56 = vcombine.high %v521_v13, %v525_v43  ;;  %v5802_v6 = vcombine.low %v529_v52, %v533_v54 }
  0x88   :  { %3310 = vmatmul.mubr.bf16.vlgmr.msra.gmra.mrb[0].mxu0 %v6951_v57  ;;  %3402 = vmatprep.subr.bf16.mxu1 %v5493_v59  ;;  %v5540_v59 = vcombine.low %v266_v47, %v270_v48 }
  0x89   :  { %3319 = vmatpush1.bf16.msra.mxu0 %v5738_v58  ;;  %3350 = vmatprep.mubr.bf16.mxu0 %v6965_v1  ;;  %v278_v58 = vld [vmem:[%s8777_s1 + $0x628] sm:$0xff] }
  0x8a   :  { %3320 = vmatprep.subr.bf16.mxu0 %v5747_v0  ;;  %v5549_v61 = vcombine.high %v274_v55, %v278_v58  ;;  %v541_v0 = vld [vmem:[%s8777_s1 + $0xe60] sm:$0xff] }
  0x8b   :  { %3403 = vmatpush1.bf16.msra.mxu1 %v5492_v2  ;;  %v5803_v2 = vcombine.high %v529_v52, %v533_v54  ;;  %v5811_v8 = vcombine.high %v537_v62, %v541_v0 }
  0x8c   :  { %3404 = vmatprep.subr.bf16.mxu1 %v5501_v4  ;;  %v5548_v4 = vcombine.low %v274_v55, %v278_v58 }
  0x8d   :  { %3321 = vmatpush1.bf16.msra.mxu0 %v5746_v3  ;;  %v286_v3 = vld [vmem:[%s8777_s1 + $0x668] sm:$0xff] }
  0x8e   :  { %3322 = vmatprep.subr.bf16.mxu0 %v5755_v9  ;;  %v5557_v7 = vcombine.high %v282_v21, %v286_v3  ;;  %v290_v9 = vld [vmem:[%s8777_s1 + $0x688] sm:$0xff] }
  0x8f   :  { %3405 = vmatpush1.bf16.msra.mxu1 %v5500_v12 }
  0x90   :  { %3406 = vmatprep.subr.bf16.mxu1 %v5509_v15 }
  0x91   :  { %3323 = vmatpush1.bf16.msra.mxu0 %v5754_v14 }
  0x92   :  { %3324 = vmatprep.subr.bf16.mxu0 %v5763_v20 }
  0x93   :  { %3407 = vmatpush1.bf16.msra.mxu1 %v5508_v23 }
  0x94   :  { %3408 = vmatprep.subr.bf16.mxu1 %v5517_v25 }
  0x95   :  { %3325 = vmatpush1.bf16.msra.mxu0 %v5762_v24 }
  0x96   :  { %3326 = vmatprep.subr.bf16.mxu0 %v5771_v29 }
  0x97   :  { %3409 = vmatpush1.bf16.msra.mxu1 %v5516_v32 }
  0x98   :  { %3410 = vmatprep.subr.bf16.mxu1 %v5525_v34 }
  0x99   :  { %3327 = vmatpush1.bf16.msra.mxu0 %v5770_v33 }
  0x9a   :  { %3328 = vmatprep.subr.bf16.mxu0 %v5779_v38 }
  0x9b   :  { %3411 = vmatpush1.bf16.msra.mxu1 %v5524_v40 }
  0x9c   :  { %3412 = vmatprep.subr.bf16.mxu1 %v5533_v42 }
  0x9d   :  { %3329 = vmatpush1.bf16.msra.mxu0 %v5778_v5 }
  0x9e   :  { %3330 = vmatprep.subr.bf16.mxu0 %v5787_v46 }
  0x9f   :  { %3413 = vmatpush1.bf16.msra.mxu1 %v5532_v49 }
  0xa0   :  { %3414 = vmatprep.subr.bf16.mxu1 %v5541_v51 }
  0xa1   :  { %3331 = vmatpush1.bf16.msra.mxu0 %v5786_v50 }
  0xa2   :  { %3332 = vmatprep.subr.bf16.mxu0 %v5795_v56 }
  0xa3   :  { %3415 = vmatpush1.bf16.msra.mxu1 %v5540_v59 }
  0xa4   :  { %3416 = vmatprep.subr.bf16.mxu1 %v5549_v61 }
  0xa5   :  { %3333 = vmatpush1.bf16.msra.mxu0 %v5794_v60 }
  0xa6   :  { %3334 = vmatprep.subr.bf16.mxu0 %v5803_v2 }
  0xa7   :  { %12 = vsyncpa [#allocation3], 0  ;;  %v545_v12 = vld [vmem:[%s8777_s1 + $0xe80] sm:$0xff]  ;;  %3417 = vmatpush1.bf16.msra.mxu1 %v5548_v4  ;;  %v5556_v15 = vcombine.low %v282_v21, %v286_v3  ;;  %v5810_v17 = vcombine.low %v537_v62, %v541_v0  ;;  %v5565_v18 = vcombine.high %v290_v9, %v294_v10  ;;  %v298_v20 = vld [vmem:[%s8777_s1 + $0x6c8] sm:$0xff]  ;;  %v5564_v25 = vcombine.low %v290_v9, %v294_v10 }
  0xa8   :  { %v549_v14 = vld [vmem:[%s8777_s1 + $0xea0] sm:$0xff]  ;;  %3418 = vmatprep.subr.bf16.mxu1 %v5557_v7  ;;  %v302_v22 = vld [vmem:[%s8777_s1 + $0x6e8] sm:$0xff]  ;;  %v83_v4 = vld [vmem:[%s8777_s1 + $0x10] sm:$0xff] }
  0xa9   :  { %3335 = vmatpush1.bf16.msra.mxu0 %v5802_v6  ;;  %v5819_v19 = vcombine.high %v545_v12, %v549_v14  ;;  %v553_v23 = vld [vmem:[%s8777_s1 + $0xec0] sm:$0xff]  ;;  %v5818_v26 = vcombine.low %v545_v12, %v549_v14  ;;  %v5573_v27 = vcombine.high %v298_v20, %v302_v22  ;;  %v306_v29 = vld [vmem:[%s8777_s1 + $0x708] sm:$0xff]  ;;  %v5572_v34 = vcombine.low %v298_v20, %v302_v22  ;;  %v87_v6 = vld [vmem:[%s8777_s1 + $0x30] sm:$0xff] }
  0xaa   :  { %3336 = vmatprep.subr.bf16.mxu0 %v5811_v8  ;;  %v557_v24 = vld [vmem:[%s8777_s1 + $0xee0] sm:$0xff]  ;;  %v310_v30 = vld [vmem:[%s8777_s1 + $0x728] sm:$0xff]  ;;  %v5359_v10 = vcombine.high %v83_v4, %v87_v6  ;;  %v5358_v20 = vcombine.low %v83_v4, %v87_v6 }
  0xab   :  { %3419 = vmatpush1.bf16.msra.mxu1 %v5556_v15  ;;  %v5827_v28 = vcombine.high %v553_v23, %v557_v24  ;;  %v561_v32 = vld [vmem:[%s8777_s1 + $0xf00] sm:$0xff]  ;;  %v5826_v36 = vcombine.low %v553_v23, %v557_v24  ;;  %v5581_v37 = vcombine.high %v306_v29, %v310_v30  ;;  %v314_v38 = vld [vmem:[%s8777_s1 + $0x748] sm:$0xff]  ;;  %v5580_v42 = vcombine.low %v306_v29, %v310_v30  ;;  %v91_v15 = vld [vmem:[%s8777_s1 + $0x50] sm:$0xff] }
  0xac   :  { %3420 = vmatprep.subr.bf16.mxu1 %v5565_v18  ;;  %v565_v33 = vld [vmem:[%s8777_s1 + $0xf20] sm:$0xff]  ;;  %v318_v39 = vld [vmem:[%s8777_s1 + $0x768] sm:$0xff]  ;;  %v7153_v18 = vpack.c.bf16 %v6933_v45, %v6933_v45  ;;  %v99_v45 = vld [vmem:[%s8777_s1 + $0x90] sm:$0xff] }
  0xad   :  { %3337 = vmatpush1.bf16.msra.mxu0 %v5810_v17  ;;  %v5835_v63 = vcombine.high %v561_v32, %v565_v33  ;;  %v569_v40 = vld [vmem:[%s8777_s1 + $0xf40] sm:$0xff]  ;;  %v5834_v13 = vcombine.low %v561_v32, %v565_v33  ;;  %v5589_v43 = vcombine.high %v314_v38, %v318_v39  ;;  %v322_v47 = vld [vmem:[%s8777_s1 + $0x788] sm:$0xff]  ;;  %v5588_v51 = vcombine.low %v314_v38, %v318_v39  ;;  %v95_v17 = vld [vmem:[%s8777_s1 + $0x70] sm:$0xff] }
  0xae   :  { %3338 = vmatprep.subr.bf16.mxu0 %v5819_v19  ;;  %v573_v5 = vld [vmem:[%s8777_s1 + $0xf60] sm:$0xff]  ;;  %v326_v48 = vld [vmem:[%s8777_s1 + $0x7a8] sm:$0xff]  ;;  %v5367_v23 = vcombine.high %v91_v15, %v95_v17 }
  0xaf   :  { %3421 = vmatpush1.bf16.msra.mxu1 %v5564_v25  ;;  %v5843_v46 = vcombine.high %v569_v40, %v573_v5  ;;  %v577_v49 = vld [vmem:[%s8777_s1 + $0xf80] sm:$0xff]  ;;  %v5842_v52 = vcombine.low %v569_v40, %v573_v5  ;;  %v5597_v54 = vcombine.high %v322_v47, %v326_v48  ;;  %v330_v56 = vld [vmem:[%s8777_s1 + $0x7c8] sm:$0xff]  ;;  %v5596_v61 = vcombine.low %v322_v47, %v326_v48 }
  0xb0   :  { %3422 = vmatprep.subr.bf16.mxu1 %v5573_v27  ;;  %v581_v50 = vld [vmem:[%s8777_s1 + $0xfa0] sm:$0xff]  ;;  %v334_v58 = vld [vmem:[%s8777_s1 + $0x7e8] sm:$0xff] }
  0xb1   :  { %3339 = vmatpush1.bf16.msra.mxu0 %v5818_v26  ;;  %v5851_v55 = vcombine.high %v577_v49, %v581_v50  ;;  %v585_v59 = vld [vmem:[%s8777_s1 + $0xfc0] sm:$0xff]  ;;  %v5850_v62 = vcombine.low %v577_v49, %v581_v50  ;;  %v5605_v0 = vcombine.high %v330_v56, %v334_v58  ;;  %v338_v2 = vld [vmem:[%s8777_s1 + $0x808] sm:$0xff]  ;;  %v5604_v7 = vcombine.low %v330_v56, %v334_v58  ;;  %v103_v26 = vld [vmem:[%s8777_s1 + $0xb0] sm:$0xff] }
  0xb2   :  { %3340 = vmatprep.subr.bf16.mxu0 %v5827_v28  ;;  %v589_v60 = vld [vmem:[%s8777_s1 + $0xfe0] sm:$0xff]  ;;  %v342_v3 = vld [vmem:[%s8777_s1 + $0x828] sm:$0xff]  ;;  %v5366_v28 = vcombine.low %v91_v15, %v95_v17  ;;  %v5375_v30 = vcombine.high %v99_v45, %v103_v26 }
  0xb3   :  { %3423 = vmatpush1.bf16.msra.mxu1 %v5572_v34  ;;  %v5859_v21 = vcombine.high %v585_v59, %v589_v60  ;;  %v5858_v8 = vcombine.low %v585_v59, %v589_v60  ;;  %v5613_v9 = vcombine.high %v338_v2, %v342_v3  ;;  %v346_v12 = vld [vmem:[%s8777_s1 + $0x848] sm:$0xff]  ;;  %v5612_v19 = vcombine.low %v338_v2, %v342_v3  ;;  %v107_v34 = vld [vmem:[%s8777_s1 + $0xd0] sm:$0xff] }
  0xb4   :  { %3424 = vmatprep.subr.bf16.mxu1 %v5581_v37  ;;  %v350_v14 = vld [vmem:[%s8777_s1 + $0x868] sm:$0xff] }
  0xb5   :  { %3341 = vmatpush1.bf16.msra.mxu0 %v5826_v36  ;;  %v5621_v22 = vcombine.high %v346_v12, %v350_v14  ;;  %v354_v24 = vld [vmem:[%s8777_s1 + $0x888] sm:$0xff]  ;;  %v5620_v27 = vcombine.low %v346_v12, %v350_v14  ;;  %v111_v36 = vld [vmem:[%s8777_s1 + $0xf0] sm:$0xff] }
  0xb6   :  { %3342 = vmatprep.subr.bf16.mxu0 %v5835_v63  ;;  %v358_v25 = vld [vmem:[%s8777_s1 + $0x8a8] sm:$0xff]  ;;  %v5374_v63 = vcombine.low %v99_v45, %v103_v26  ;;  %v5383_v39 = vcombine.high %v107_v34, %v111_v36 }
  0xb7   :  { %3425 = vmatpush1.bf16.msra.mxu1 %v5580_v42  ;;  %v5629_v29 = vcombine.high %v354_v24, %v358_v25  ;;  %v362_v32 = vld [vmem:[%s8777_s1 + $0x8c8] sm:$0xff]  ;;  %v5628_v37 = vcombine.low %v354_v24, %v358_v25  ;;  %v115_v42 = vld [vmem:[%s8777_s1 + $0x110] sm:$0xff] }
  0xb8   :  { %3426 = vmatprep.subr.bf16.mxu1 %v5589_v43  ;;  %v366_v33 = vld [vmem:[%s8777_s1 + $0x8e8] sm:$0xff] }
  0xb9   :  { %3343 = vmatpush1.bf16.msra.mxu0 %v5834_v13  ;;  %v5637_v38 = vcombine.high %v362_v32, %v366_v33  ;;  %v370_v40 = vld [vmem:[%s8777_s1 + $0x908] sm:$0xff]  ;;  %v119_v13 = vld [vmem:[%s8777_s1 + $0x130] sm:$0xff]  ;;  %v5636_v43 = vcombine.low %v362_v32, %v366_v33 }
  0xba   :  { %3344 = vmatprep.subr.bf16.mxu0 %v5843_v46  ;;  %v374_v5 = vld [vmem:[%s8777_s1 + $0x928] sm:$0xff]  ;;  %v5382_v46 = vcombine.low %v107_v34, %v111_v36  ;;  %v5391_v48 = vcombine.high %v115_v42, %v119_v13 }
  0xbb   :  { %3427 = vmatpush1.bf16.msra.mxu1 %v5588_v51  ;;  %v5645_v47 = vcombine.high %v370_v40, %v374_v5  ;;  %v378_v49 = vld [vmem:[%s8777_s1 + $0x948] sm:$0xff]  ;;  %v123_v51 = vld [vmem:[%s8777_s1 + $0x150] sm:$0xff] }
  0xbc   :  { %3428 = vmatprep.subr.bf16.mxu1 %v5597_v54  ;;  %v382_v50 = vld [vmem:[%s8777_s1 + $0x968] sm:$0xff]  ;;  %v5644_v54 = vcombine.low %v370_v40, %v374_v5 }
  0xbd   :  { %3345 = vmatpush1.bf16.msra.mxu0 %v5842_v52  ;;  %v127_v52 = vld [vmem:[%s8777_s1 + $0x170] sm:$0xff]  ;;  %v5653_v56 = vcombine.high %v378_v49, %v382_v50  ;;  %v386_v59 = vld [vmem:[%s8777_s1 + $0x988] sm:$0xff] }
  0xbe   :  { %3346 = vmatprep.subr.bf16.mxu0 %v5851_v55  ;;  %v5390_v55 = vcombine.low %v115_v42, %v119_v13  ;;  %v5399_v58 = vcombine.high %v123_v51, %v127_v52  ;;  %v390_v60 = vld [vmem:[%s8777_s1 + $0x9a8] sm:$0xff] }
  0xbf   :  { %3429 = vmatpush1.bf16.msra.mxu1 %v5596_v61  ;;  %v131_v61 = vld [vmem:[%s8777_s1 + $0x190] sm:$0xff]  ;;  %v5661_v2 = vcombine.high %v386_v59, %v390_v60  ;;  %v394_v4 = vld [vmem:[%s8777_s1 + $0x9c8] sm:$0xff] }
  0xc0   :  { %3430 = vmatprep.subr.bf16.mxu1 %v5605_v0  ;;  %v5652_v0 = vcombine.low %v378_v49, %v382_v50  ;;  %v398_v6 = vld [vmem:[%s8777_s1 + $0x9e8] sm:$0xff] }
  0xc1   :  { %3347 = vmatpush1.bf16.msra.mxu0 %v5850_v62  ;;  %v135_v62 = vld [vmem:[%s8777_s1 + $0x1b0] sm:$0xff]  ;;  %v5669_v12 = vcombine.high %v394_v4, %v398_v6  ;;  %v402_v15 = vld [vmem:[%s8777_s1 + $0xa08] sm:$0xff] }
  0xc2   :  { %3348 = vmatprep.subr.bf16.mxu0 %v5859_v21  ;;  %v5398_v21 = vcombine.low %v123_v51, %v127_v52  ;;  %v5407_v3 = vcombine.high %v131_v61, %v135_v62  ;;  %v406_v17 = vld [vmem:[%s8777_s1 + $0xa28] sm:$0xff] }
  0xc3   :  { %3431 = vmatpush1.bf16.msra.mxu1 %v5604_v7  ;;  %v139_v7 = vld [vmem:[%s8777_s1 + $0x1d0] sm:$0xff]  ;;  %v5677_v24 = vcombine.high %v402_v15, %v406_v17  ;;  %v410_v45 = vld [vmem:[%s8777_s1 + $0xa48] sm:$0xff] }
  0xc4   :  { %3441 = vmatprep.subr.bf16.mxu1 %v5613_v9  ;;  %v5660_v9 = vcombine.low %v386_v59, %v390_v60  ;;  %v414_v26 = vld [vmem:[%s8777_s1 + $0xa68] sm:$0xff] }
  0xc5   :  { %3349 = vmatpush1.bf16.msra.mxu0 %v5858_v8  ;;  %v143_v8 = vld [vmem:[%s8777_s1 + $0x1f0] sm:$0xff]  ;;  %v5685_v32 = vcombine.high %v410_v45, %v414_v26  ;;  %v418_v34 = vld [vmem:[%s8777_s1 + $0xa88] sm:$0xff] }
  0xc6   :  { %3523 = vmatprep.subr.bf16.mxu0 %v5359_v10  ;;  %3433 = vmatmul.mubr.bf16.vlgmr.msra.gmra.mrb[4].mxu1 %v6742_v35  ;;  %v5406_v10 = vcombine.low %v131_v61, %v135_v62  ;;  %v5415_v14 = vcombine.high %v139_v7, %v143_v8  ;;  %v422_v36 = vld [vmem:[%s8777_s1 + $0xaa8] sm:$0xff] }
  0xc7   :  { %3442 = vmatpush1.bf16.msra.mxu1 %v5612_v19  ;;  %3473 = vmatprep.mubr.bf16.mxu1 %v6756_v41  ;;  %v147_v19 = vld [vmem:[%s8777_s1 + $0x210] sm:$0xff]  ;;  %v5693_v40 = vcombine.high %v418_v34, %v422_v36  ;;  %v426_v42 = vld [vmem:[%s8777_s1 + $0xac8] sm:$0xff] }
  0xc8   :  { %3351 = vmatmul.mubr.bf16.vlgmr.msra.gmra.mrb[0].mxu0 %v7153_v18  ;;  %3443 = vmatprep.subr.bf16.mxu1 %v5621_v22  ;;  %v5668_v22 = vcombine.low %v394_v4, %v398_v6  ;;  %v430_v13 = vld [vmem:[%s8777_s1 + $0xae8] sm:$0xff] }
  0xc9   :  { %3524 = vmatpush1.bf16.msra.mxu0 %v5358_v20  ;;  %3555 = vmatprep.mubr.bf16.mxu0 %v6603_v11  ;;  %v151_v20 = vld [vmem:[%s8777_s1 + $0x230] sm:$0xff]  ;;  %v5701_v49 = vcombine.high %v426_v42, %v430_v13  ;;  %v434_v51 = vld [vmem:[%s8777_s1 + $0xb08] sm:$0xff] }
  0xca   :  { %3525 = vmatprep.subr.bf16.mxu0 %v5367_v23  ;;  %v5414_v23 = vcombine.low %v139_v7, %v143_v8  ;;  %v5423_v25 = vcombine.high %v147_v19, %v151_v20  ;;  %v438_v52 = vld [vmem:[%s8777_s1 + $0xb28] sm:$0xff] }
  0xcb   :  { %3444 = vmatpush1.bf16.msra.mxu1 %v5620_v27  ;;  %v155_v27 = vld [vmem:[%s8777_s1 + $0x250] sm:$0xff]  ;;  %v5709_v59 = vcombine.high %v434_v51, %v438_v52  ;;  %v442_v61 = vld [vmem:[%s8777_s1 + $0xb48] sm:$0xff] }
  0xcc   :  { %3445 = vmatprep.subr.bf16.mxu1 %v5629_v29  ;;  %v5676_v29 = vcombine.low %v402_v15, %v406_v17  ;;  %v446_v62 = vld [vmem:[%s8777_s1 + $0xb68] sm:$0xff] }
  0xcd   :  { %3526 = vmatpush1.bf16.msra.mxu0 %v5366_v28  ;;  %v159_v28 = vld [vmem:[%s8777_s1 + $0x270] sm:$0xff]  ;;  %v5717_v4 = vcombine.high %v442_v61, %v446_v62  ;;  %v450_v7 = vld [vmem:[%s8777_s1 + $0xb88] sm:$0xff] }
  0xce   :  { %3527 = vmatprep.subr.bf16.mxu0 %v5375_v30  ;;  %v5422_v30 = vcombine.low %v147_v19, %v151_v20  ;;  %v5431_v33 = vcombine.high %v155_v27, %v159_v28  ;;  %v454_v8 = vld [vmem:[%s8777_s1 + $0xba8] sm:$0xff] }
  0xcf   :  { %3446 = vmatpush1.bf16.msra.mxu1 %v5628_v37  ;;  %v163_v37 = vld [vmem:[%s8777_s1 + $0x290] sm:$0xff]  ;;  %v5725_v15 = vcombine.high %v450_v7, %v454_v8  ;;  %v458_v19 = vld [vmem:[%s8777_s1 + $0xbc8] sm:$0xff] }
  0xd0   :  { %3447 = vmatprep.subr.bf16.mxu1 %v5637_v38  ;;  %v5684_v38 = vcombine.low %v410_v45, %v414_v26  ;;  %v462_v20 = vld [vmem:[%s8777_s1 + $0xbe8] sm:$0xff] }
  0xd1   :  { %3528 = vmatpush1.bf16.msra.mxu0 %v5374_v63  ;;  %v167_v63 = vld [vmem:[%s8777_s1 + $0x2b0] sm:$0xff]  ;;  %v5733_v45 = vcombine.high %v458_v19, %v462_v20 }
  0xd2   :  { %3529 = vmatprep.subr.bf16.mxu0 %v5383_v39  ;;  %v5430_v39 = vcombine.low %v155_v27, %v159_v28  ;;  %v5439_v5 = vcombine.high %v163_v37, %v167_v63  ;;  %v466_v27 = vld [vmem:[%s8777_s1 + $0xc08] sm:$0xff] }
  0xd3   :  { %3448 = vmatpush1.bf16.msra.mxu1 %v5636_v43  ;;  %v171_v43 = vld [vmem:[%s8777_s1 + $0x2d0] sm:$0xff]  ;;  %v470_v28 = vld [vmem:[%s8777_s1 + $0xc28] sm:$0xff] }
  0xd4   :  { %3449 = vmatprep.subr.bf16.mxu1 %v5645_v47  ;;  %v5692_v47 = vcombine.low %v418_v34, %v422_v36  ;;  %v5741_v34 = vcombine.high %v466_v27, %v470_v28 }
  0xd5   :  { %3530 = vmatpush1.bf16.msra.mxu0 %v5382_v46  ;;  %v175_v46 = vld [vmem:[%s8777_s1 + $0x2f0] sm:$0xff] }
  0xd6   :  { %3531 = vmatprep.subr.bf16.mxu0 %v5391_v48  ;;  %v5438_v48 = vcombine.low %v163_v37, %v167_v63  ;;  %v5447_v50 = vcombine.high %v171_v43, %v175_v46  ;;  %v474_v37 = vld [vmem:[%s8777_s1 + $0xc48] sm:$0xff] }
  0xd7   :  { %3450 = vmatpush1.bf16.msra.mxu1 %v5644_v54  ;;  %v179_v54 = vld [vmem:[%s8777_s1 + $0x310] sm:$0xff]  ;;  %v478_v63 = vld [vmem:[%s8777_s1 + $0xc68] sm:$0xff] }
  0xd8   :  { %3451 = vmatprep.subr.bf16.mxu1 %v5653_v56  ;;  %v5700_v56 = vcombine.low %v426_v42, %v430_v13  ;;  %v5749_v42 = vcombine.high %v474_v37, %v478_v63 }
  0xd9   :  { %3532 = vmatpush1.bf16.msra.mxu0 %v5390_v55  ;;  %v183_v55 = vld [vmem:[%s8777_s1 + $0x330] sm:$0xff] }
  0xda   :  { %3533 = vmatprep.subr.bf16.mxu0 %v5399_v58  ;;  %v5446_v58 = vcombine.low %v171_v43, %v175_v46  ;;  %v5455_v60 = vcombine.high %v179_v54, %v183_v55  ;;  %v482_v43 = vld [vmem:[%s8777_s1 + $0xc88] sm:$0xff] }
  0xdb   :  { %3452 = vmatpush1.bf16.msra.mxu1 %v5652_v0  ;;  %v187_v0 = vld [vmem:[%s8777_s1 + $0x350] sm:$0xff]  ;;  %v486_v46 = vld [vmem:[%s8777_s1 + $0xca8] sm:$0xff] }
  0xdc   :  { %3453 = vmatprep.subr.bf16.mxu1 %v5661_v2  ;;  %v5708_v2 = vcombine.low %v434_v51, %v438_v52  ;;  %v5757_v51 = vcombine.high %v482_v43, %v486_v46 }
  0xdd   :  { %3534 = vmatpush1.bf16.msra.mxu0 %v5398_v21  ;;  %v191_v21 = vld [vmem:[%s8777_s1 + $0x370] sm:$0xff] }
  0xde   :  { %3535 = vmatprep.subr.bf16.mxu0 %v5407_v3  ;;  %v5454_v3 = vcombine.low %v179_v54, %v183_v55  ;;  %v5463_v6 = vcombine.high %v187_v0, %v191_v21  ;;  %v490_v54 = vld [vmem:[%s8777_s1 + $0xcc8] sm:$0xff] }
  0xdf   :  { %3454 = vmatpush1.bf16.msra.mxu1 %v5660_v9  ;;  %v195_v9 = vld [vmem:[%s8777_s1 + $0x390] sm:$0xff]  ;;  %v494_v55 = vld [vmem:[%s8777_s1 + $0xce8] sm:$0xff] }
  0xe0   :  { %3455 = vmatprep.subr.bf16.mxu1 %v5669_v12  ;;  %v5716_v12 = vcombine.low %v442_v61, %v446_v62  ;;  %v5765_v61 = vcombine.high %v490_v54, %v494_v55 }
  0xe1   :  { %3536 = vmatpush1.bf16.msra.mxu0 %v5406_v10  ;;  %v199_v10 = vld [vmem:[%s8777_s1 + $0x3b0] sm:$0xff] }
  0xe2   :  { %3537 = vmatprep.subr.bf16.mxu0 %v5415_v14  ;;  %v5462_v14 = vcombine.low %v187_v0, %v191_v21  ;;  %v5471_v17 = vcombine.high %v195_v9, %v199_v10  ;;  %v498_v0 = vld [vmem:[%s8777_s1 + $0xd08] sm:$0xff] }
  0xe3   :  { %3456 = vmatpush1.bf16.msra.mxu1 %v5668_v22  ;;  %v203_v22 = vld [vmem:[%s8777_s1 + $0x3d0] sm:$0xff]  ;;  %v502_v21 = vld [vmem:[%s8777_s1 + $0xd28] sm:$0xff] }
  0xe4   :  { %3457 = vmatprep.subr.bf16.mxu1 %v5677_v24  ;;  %v5724_v24 = vcombine.low %v450_v7, %v454_v8  ;;  %v5773_v7 = vcombine.high %v498_v0, %v502_v21 }
  0xe5   :  { %3538 = vmatpush1.bf16.msra.mxu0 %v5414_v23  ;;  %v207_v23 = vld [vmem:[%s8777_s1 + $0x3f0] sm:$0xff] }
  0xe6   :  { %3539 = vmatprep.subr.bf16.mxu0 %v5423_v25  ;;  %v5470_v25 = vcombine.low %v195_v9, %v199_v10  ;;  %v5479_v26 = vcombine.high %v203_v22, %v207_v23  ;;  %v506_v9 = vld [vmem:[%s8777_s1 + $0xd48] sm:$0xff] }
  0xe7   :  { %3458 = vmatpush1.bf16.msra.mxu1 %v5676_v29  ;;  %v211_v29 = vld [vmem:[%s8777_s1 + $0x410] sm:$0xff]  ;;  %v510_v10 = vld [vmem:[%s8777_s1 + $0xd68] sm:$0xff] }
  0xe8   :  { %3459 = vmatprep.subr.bf16.mxu1 %v5685_v32  ;;  %v5732_v32 = vcombine.low %v458_v19, %v462_v20  ;;  %v5781_v19 = vcombine.high %v506_v9, %v510_v10 }
  0xe9   :  { %3540 = vmatpush1.bf16.msra.mxu0 %v5422_v30  ;;  %v215_v30 = vld [vmem:[%s8777_s1 + $0x430] sm:$0xff] }
  0xea   :  { %3541 = vmatprep.subr.bf16.mxu0 %v5431_v33  ;;  %v5478_v33 = vcombine.low %v203_v22, %v207_v23  ;;  %v5487_v36 = vcombine.high %v211_v29, %v215_v30  ;;  %v514_v22 = vld [vmem:[%s8777_s1 + $0xd88] sm:$0xff] }
  0xeb   :  { %3460 = vmatpush1.bf16.msra.mxu1 %v5684_v38  ;;  %v219_v38 = vld [vmem:[%s8777_s1 + $0x450] sm:$0xff]  ;;  %v518_v23 = vld [vmem:[%s8777_s1 + $0xda8] sm:$0xff] }
  0xec   :  { %3461 = vmatprep.subr.bf16.mxu1 %v5693_v40  ;;  %v5740_v40 = vcombine.low %v466_v27, %v470_v28  ;;  %v5789_v27 = vcombine.high %v514_v22, %v518_v23 }
  0xed   :  { %3542 = vmatpush1.bf16.msra.mxu0 %v5430_v39  ;;  %v223_v39 = vld [vmem:[%s8777_s1 + $0x470] sm:$0xff] }
  0xee   :  { %3543 = vmatprep.subr.bf16.mxu0 %v5439_v5  ;;  %v5486_v5 = vcombine.low %v211_v29, %v215_v30  ;;  %v5495_v13 = vcombine.high %v219_v38, %v223_v39  ;;  %v522_v30 = vld [vmem:[%s8777_s1 + $0xdc8] sm:$0xff] }
  0xef   :  { %3462 = vmatpush1.bf16.msra.mxu1 %v5692_v47  ;;  %v227_v47 = vld [vmem:[%s8777_s1 + $0x490] sm:$0xff] }
  0xf0   :  { %3463 = vmatprep.subr.bf16.mxu1 %v5701_v49  ;;  %v5748_v49 = vcombine.low %v474_v37, %v478_v63  ;;  %v5788_v63 = vcombine.low %v514_v22, %v518_v23  ;;  %v307_v22 = vld [vmem:[%s8777_s1 + $0x710] sm:$0xff] }
  0xf1   :  { %3544 = vmatpush1.bf16.msra.mxu0 %v5438_v48  ;;  %v231_v48 = vld [vmem:[%s8777_s1 + $0x4b0] sm:$0xff] }
  0xf2   :  { %3545 = vmatprep.subr.bf16.mxu0 %v5447_v50  ;;  %v5494_v50 = vcombine.low %v219_v38, %v223_v39  ;;  %v5503_v52 = vcombine.high %v227_v47, %v231_v48  ;;  %v311_v23 = vld [vmem:[%s8777_s1 + $0x730] sm:$0xff] }
  0xf3   :  { %3464 = vmatpush1.bf16.msra.mxu1 %v5700_v56  ;;  %v235_v56 = vld [vmem:[%s8777_s1 + $0x4d0] sm:$0xff] }
  0xf4   :  { %3465 = vmatprep.subr.bf16.mxu1 %v5709_v59  ;;  %v5756_v59 = vcombine.low %v482_v43, %v486_v46  ;;  %v275_v43 = vld [vmem:[%s8777_s1 + $0x610] sm:$0xff] }
  0xf5   :  { %3546 = vmatpush1.bf16.msra.mxu0 %v5446_v58  ;;  %v239_v58 = vld [vmem:[%s8777_s1 + $0x4f0] sm:$0xff] }
  0xf6   :  { %3547 = vmatprep.subr.bf16.mxu0 %v5455_v60  ;;  %v5502_v60 = vcombine.low %v227_v47, %v231_v48  ;;  %v5511_v62 = vcombine.high %v235_v56, %v239_v58  ;;  %v279_v46 = vld [vmem:[%s8777_s1 + $0x630] sm:$0xff] }
  0xf7   :  { %3466 = vmatpush1.bf16.msra.mxu1 %v5708_v2  ;;  %v243_v2 = vld [vmem:[%s8777_s1 + $0x510] sm:$0xff] }
  0xf8   :  { %3467 = vmatprep.subr.bf16.mxu1 %v5717_v4  ;;  %v5764_v4 = vcombine.low %v490_v54, %v494_v55  ;;  %v283_v54 = vld [vmem:[%s8777_s1 + $0x650] sm:$0xff] }
  0xf9   :  { %3548 = vmatpush1.bf16.msra.mxu0 %v5454_v3  ;;  %v247_v3 = vld [vmem:[%s8777_s1 + $0x530] sm:$0xff] }
  0xfa   :  { %3549 = vmatprep.subr.bf16.mxu0 %v5463_v6  ;;  %v5510_v6 = vcombine.low %v235_v56, %v239_v58  ;;  %v5519_v8 = vcombine.high %v243_v2, %v247_v3  ;;  %v287_v55 = vld [vmem:[%s8777_s1 + $0x670] sm:$0xff]  ;;  %v5550_v58 = vcombine.low %v275_v43, %v279_v46 }
  0xfb   :  { %3468 = vmatpush1.bf16.msra.mxu1 %v5716_v12  ;;  %v251_v12 = vld [vmem:[%s8777_s1 + $0x550] sm:$0xff] }
  0xfc   :  { %3469 = vmatprep.subr.bf16.mxu1 %v5725_v15  ;;  %v5772_v15 = vcombine.low %v498_v0, %v502_v21  ;;  %v291_v0 = vld [vmem:[%s8777_s1 + $0x690] sm:$0xff] }
  0xfd   :  { %3550 = vmatpush1.bf16.msra.mxu0 %v5462_v14  ;;  %v255_v14 = vld [vmem:[%s8777_s1 + $0x570] sm:$0xff] }
  0xfe   :  { %3551 = vmatprep.subr.bf16.mxu0 %v5471_v17  ;;  %v5518_v17 = vcombine.low %v243_v2, %v247_v3  ;;  %v5527_v20 = vcombine.high %v251_v12, %v255_v14  ;;  %v295_v21 = vld [vmem:[%s8777_s1 + $0x6b0] sm:$0xff]  ;;  %v5558_v3 = vcombine.low %v283_v54, %v287_v55 }
  0xff   :  { %3470 = vmatpush1.bf16.msra.mxu1 %v5724_v24  ;;  %v259_v24 = vld [vmem:[%s8777_s1 + $0x590] sm:$0xff] }
 0x100   :  { %3471 = vmatprep.subr.bf16.mxu1 %v5733_v45  ;;  %v5780_v45 = vcombine.low %v506_v9, %v510_v10  ;;  %v299_v9 = vld [vmem:[%s8777_s1 + $0x6d0] sm:$0xff] }
 0x101   :  { %3552 = vmatpush1.bf16.msra.mxu0 %v5470_v25  ;;  %v263_v25 = vld [vmem:[%s8777_s1 + $0x5b0] sm:$0xff] }
 0x102   :  { %3553 = vmatprep.subr.bf16.mxu0 %v5479_v26  ;;  %v5526_v26 = vcombine.low %v251_v12, %v255_v14  ;;  %v5535_v29 = vcombine.high %v259_v24, %v263_v25  ;;  %v5534_v39 = vcombine.low %v259_v24, %v263_v25  ;;  %v303_v10 = vld [vmem:[%s8777_s1 + $0x6f0] sm:$0xff]  ;;  %v5566_v14 = vcombine.low %v291_v0, %v295_v21 }
 0x103   :  { %3472 = vmatpush1.bf16.msra.mxu1 %v5732_v32  ;;  %v526_v32 = vld [vmem:[%s8777_s1 + $0xde8] sm:$0xff]  ;;  %v5574_v25 = vcombine.low %v299_v9, %v303_v10 }
 0x104   :  { %3482 = vmatprep.subr.bf16.mxu1 %v5741_v34  ;;  %v267_v34 = vld [vmem:[%s8777_s1 + $0x5d0] sm:$0xff]  ;;  %v5796_v47 = vcombine.low %v522_v30, %v526_v32 }
 0x105   :  { %3554 = vmatpush1.bf16.msra.mxu0 %v5478_v33 }
 0x106   :  { %3564 = vmatprep.subr.bf16.mxu0 %v5487_v36  ;;  %3474 = vmatmul.mubr.bf16.vlgmr.msra.gmra.mrb[4].mxu1 %v6951_v57  ;;  %v271_v36 = vld [vmem:[%s8777_s1 + $0x5f0] sm:$0xff] }
 0x107   :  { %3483 = vmatpush1.bf16.msra.mxu1 %v5740_v40  ;;  %3514 = vmatprep.mubr.bf16.mxu1 %v6965_v1  ;;  %v5797_v40 = vcombine.high %v522_v30, %v526_v32  ;;  %v5542_v48 = vcombine.low %v267_v34, %v271_v36  ;;  %v315_v30 = vld [vmem:[%s8777_s1 + $0x750] sm:$0xff] }
 0x108   :  { %3556 = vmatmul.mubr.bf16.vlgmr.msra.gmra.mrb[4].mxu0 %v6732_v31  ;;  %3484 = vmatprep.subr.bf16.mxu1 %v5749_v42  ;;  %v530_v42 = vld [vmem:[%s8777_s1 + $0xe08] sm:$0xff]  ;;  %v319_v32 = vld [vmem:[%s8777_s1 + $0x770] sm:$0xff] }
 0x109   :  { %3565 = vmatpush1.bf16.msra.mxu0 %v5486_v5  ;;  %3596 = vmatprep.mubr.bf16.mxu0 %v6614_v16  ;;  %v5543_v5 = vcombine.high %v267_v34, %v271_v36  ;;  %v5582_v36 = vcombine.low %v307_v22, %v311_v23 }
 0x10a   :  { %3566 = vmatprep.subr.bf16.mxu0 %v5495_v13  ;;  %v534_v13 = vld [vmem:[%s8777_s1 + $0xe28] sm:$0xff] }
 0x10b   :  { %3485 = vmatpush1.bf16.msra.mxu1 %v5748_v49  ;;  %v5805_v49 = vcombine.high %v530_v42, %v534_v13  ;;  %v5804_v56 = vcombine.low %v530_v42, %v534_v13  ;;  %v5590_v13 = vcombine.low %v315_v30, %v319_v32 }
 0x10c   :  { %3486 = vmatprep.subr.bf16.mxu1 %v5757_v51  ;;  %v538_v51 = vld [vmem:[%s8777_s1 + $0xe48] sm:$0xff] }
 0x10d   :  { %3567 = vmatpush1.bf16.msra.mxu0 %v5494_v50  ;;  %v5551_v50 = vcombine.high %v275_v43, %v279_v46 }
 0x10e   :  { %3568 = vmatprep.subr.bf16.mxu0 %v5503_v52  ;;  %v542_v52 = vld [vmem:[%s8777_s1 + $0xe68] sm:$0xff] }
 0x10f   :  { %3487 = vmatpush1.bf16.msra.mxu1 %v5756_v59  ;;  %v5813_v59 = vcombine.high %v538_v51, %v542_v52  ;;  %v5812_v2 = vcombine.low %v538_v51, %v542_v52 }
 0x110   :  { %3488 = vmatprep.subr.bf16.mxu1 %v5765_v61  ;;  %v546_v61 = vld [vmem:[%s8777_s1 + $0xe88] sm:$0xff] }
 0x111   :  { %3569 = vmatpush1.bf16.msra.mxu0 %v5502_v60  ;;  %v5559_v60 = vcombine.high %v283_v54, %v287_v55 }
 0x112   :  { %3570 = vmatprep.subr.bf16.mxu0 %v5511_v62  ;;  %v550_v62 = vld [vmem:[%s8777_s1 + $0xea8] sm:$0xff] }
 0x113   :  { %3489 = vmatpush1.bf16.msra.mxu1 %v5764_v4  ;;  %v5821_v4 = vcombine.high %v546_v61, %v550_v62  ;;  %v5820_v12 = vcombine.low %v546_v61, %v550_v62 }
 0x114   :  { %3490 = vmatprep.subr.bf16.mxu1 %v5773_v7  ;;  %v554_v7 = vld [vmem:[%s8777_s1 + $0xec8] sm:$0xff] }
 0x115   :  { %3571 = vmatpush1.bf16.msra.mxu0 %v5510_v6  ;;  %v5567_v6 = vcombine.high %v291_v0, %v295_v21 }
 0x116   :  { %3572 = vmatprep.subr.bf16.mxu0 %v5519_v8  ;;  %v558_v8 = vld [vmem:[%s8777_s1 + $0xee8] sm:$0xff] }
 0x117   :  { %3491 = vmatpush1.bf16.msra.mxu1 %v5772_v15  ;;  %v5829_v15 = vcombine.high %v554_v7, %v558_v8  ;;  %v5828_v24 = vcombine.low %v554_v7, %v558_v8 }
 0x118   :  { %3492 = vmatprep.subr.bf16.mxu1 %v5781_v19  ;;  %v562_v19 = vld [vmem:[%s8777_s1 + $0xf08] sm:$0xff] }
 0x119   :  { %3573 = vmatpush1.bf16.msra.mxu0 %v5518_v17  ;;  %v7415_v28 = vpop.f32.mrb[0].mxu1  ;;  %v5575_v17 = vcombine.high %v299_v9, %v303_v10 }
 0x11a   :  { %3574 = vmatprep.subr.bf16.mxu0 %v5527_v20  ;;  %v7423_v33 = vpop.f32.mrb[1].mxu1  ;;  %v566_v20 = vld [vmem:[%s8777_s1 + $0xf28] sm:$0xff] }
 0x11b   :  { %v3233_v37 = vpop.f32.mrb[2].mxu1  ;;  %3493 = vmatpush1.bf16.msra.mxu1 %v5780_v45  ;;  %v5837_v45 = vcombine.high %v562_v19, %v566_v20  ;;  %v5836_v34 = vcombine.low %v562_v19, %v566_v20 }
 0x11c   :  { %v3234_v38 = vpop.f32.mrb[3].mxu1  ;;  %3494 = vmatprep.subr.bf16.mxu1 %v5789_v27  ;;  %v570_v27 = vld [vmem:[%s8777_s1 + $0xf48] sm:$0xff] }
 0x11d   :  { %3575 = vmatpush1.bf16.msra.mxu0 %v5526_v26  ;;  %v5583_v26 = vcombine.high %v307_v22, %v311_v23  ;;  %v578_v38 = vld [vmem:[%s8777_s1 + $0xf88] sm:$0xff] }
 0x11e   :  { %3576 = vmatprep.subr.bf16.mxu0 %v5535_v29  ;;  %v574_v29 = vld [vmem:[%s8777_s1 + $0xf68] sm:$0xff] }
 0x11f   :  { %3495 = vmatpush1.bf16.msra.mxu1 %v5788_v63  ;;  %v5845_v37 = vcombine.high %v570_v27, %v574_v29  ;;  %v5591_v63 = vcombine.high %v315_v30, %v319_v32  ;;  %v5844_v42 = vcombine.low %v570_v27, %v574_v29 }
 0x120   :  { %3496 = vmatprep.subr.bf16.mxu1 %v5797_v40  ;;  %v323_v40 = vld [vmem:[%s8777_s1 + $0x790] sm:$0xff] }
 0x121   :  { %3577 = vmatpush1.bf16.msra.mxu0 %v5534_v39  ;;  %v582_v39 = vld [vmem:[%s8777_s1 + $0xfa8] sm:$0xff] }
 0x122   :  { %3578 = vmatprep.subr.bf16.mxu0 %v5543_v5  ;;  %v327_v5 = vld [vmem:[%s8777_s1 + $0x7b0] sm:$0xff]  ;;  %v5853_v43 = vcombine.high %v578_v38, %v582_v39  ;;  %v5852_v51 = vcombine.low %v578_v38, %v582_v39 }
 0x123   :  { %3497 = vmatpush1.bf16.msra.mxu1 %v5796_v47  ;;  %v5599_v46 = vcombine.high %v323_v40, %v327_v5  ;;  %v586_v47 = vld [vmem:[%s8777_s1 + $0xfc8] sm:$0xff]  ;;  %v5598_v52 = vcombine.low %v323_v40, %v327_v5  ;;  %v124_v5 = vld [vmem:[%s8777_s1 + $0x158] sm:$0xff] }
 0x124   :  { %3498 = vmatprep.subr.bf16.mxu1 %v5805_v49  ;;  %v331_v49 = vld [vmem:[%s8777_s1 + $0x7d0] sm:$0xff] }
 0x125   :  { %3579 = vmatpush1.bf16.msra.mxu0 %v5542_v48  ;;  %v590_v48 = vld [vmem:[%s8777_s1 + $0xfe8] sm:$0xff] }
 0x126   :  { %3580 = vmatprep.subr.bf16.mxu0 %v5551_v50  ;;  %v335_v50 = vld [vmem:[%s8777_s1 + $0x7f0] sm:$0xff]  ;;  %v5861_v54 = vcombine.high %v586_v47, %v590_v48  ;;  %v5860_v61 = vcombine.low %v586_v47, %v590_v48 }
 0x127   :  { %3499 = vmatpush1.bf16.msra.mxu1 %v5804_v56  ;;  %v5607_v55 = vcombine.high %v331_v49, %v335_v50  ;;  %v84_v56 = vld [vmem:[%s8777_s1 + $0x18] sm:$0xff]  ;;  %v5606_v62 = vcombine.low %v331_v49, %v335_v50 }
 0x128   :  { %3500 = vmatprep.subr.bf16.mxu1 %v5813_v59  ;;  %v339_v59 = vld [vmem:[%s8777_s1 + $0x810] sm:$0xff]  ;;  %v132_v50 = vld [vmem:[%s8777_s1 + $0x198] sm:$0xff] }
 0x129   :  { %3581 = vmatpush1.bf16.msra.mxu0 %v5550_v58  ;;  %v88_v58 = vld [vmem:[%s8777_s1 + $0x38] sm:$0xff] }
 0x12a   :  { %3582 = vmatprep.subr.bf16.mxu0 %v5559_v60  ;;  %v343_v60 = vld [vmem:[%s8777_s1 + $0x830] sm:$0xff]  ;;  %v5361_v0 = vcombine.high %v84_v56, %v88_v58  ;;  %v5360_v7 = vcombine.low %v84_v56, %v88_v58 }
 0x12b   :  { %3501 = vmatpush1.bf16.msra.mxu1 %v5812_v2  ;;  %v5615_v21 = vcombine.high %v339_v59, %v343_v60  ;;  %v92_v2 = vld [vmem:[%s8777_s1 + $0x58] sm:$0xff]  ;;  %v5614_v8 = vcombine.low %v339_v59, %v343_v60 }
 0x12c   :  { %3502 = vmatprep.subr.bf16.mxu1 %v5821_v4  ;;  %v347_v4 = vld [vmem:[%s8777_s1 + $0x850] sm:$0xff]  ;;  %v140_v60 = vld [vmem:[%s8777_s1 + $0x1d8] sm:$0xff] }
 0x12d   :  { %3583 = vmatpush1.bf16.msra.mxu0 %v5558_v3  ;;  %v96_v3 = vld [vmem:[%s8777_s1 + $0x78] sm:$0xff] }
 0x12e   :  { %3584 = vmatprep.subr.bf16.mxu0 %v5567_v6  ;;  %v351_v6 = vld [vmem:[%s8777_s1 + $0x870] sm:$0xff]  ;;  %v5369_v9 = vcombine.high %v92_v2, %v96_v3  ;;  %v5368_v19 = vcombine.low %v92_v2, %v96_v3 }
 0x12f   :  { %3503 = vmatpush1.bf16.msra.mxu1 %v5820_v12  ;;  %v5623_v10 = vcombine.high %v347_v4, %v351_v6  ;;  %v100_v12 = vld [vmem:[%s8777_s1 + $0x98] sm:$0xff]  ;;  %v5622_v20 = vcombine.low %v347_v4, %v351_v6 }
 0x130   :  { %3504 = vmatprep.subr.bf16.mxu1 %v5829_v15  ;;  %v355_v15 = vld [vmem:[%s8777_s1 + $0x890] sm:$0xff]  ;;  %v148_v6 = vld [vmem:[%s8777_s1 + $0x218] sm:$0xff] }
 0x131   :  { %3585 = vmatpush1.bf16.msra.mxu0 %v5566_v14  ;;  %v104_v14 = vld [vmem:[%s8777_s1 + $0xb8] sm:$0xff] }
 0x132   :  { %3586 = vmatprep.subr.bf16.mxu0 %v5575_v17  ;;  %v359_v17 = vld [vmem:[%s8777_s1 + $0x8b0] sm:$0xff]  ;;  %v5377_v22 = vcombine.high %v100_v12, %v104_v14  ;;  %v5376_v27 = vcombine.low %v100_v12, %v104_v14 }
 0x133   :  { %3505 = vmatpush1.bf16.msra.mxu1 %v5828_v24  ;;  %v5631_v23 = vcombine.high %v355_v15, %v359_v17  ;;  %v108_v24 = vld [vmem:[%s8777_s1 + $0xd8] sm:$0xff]  ;;  %v5630_v29 = vcombine.low %v355_v15, %v359_v17 }
 0x134   :  { %3506 = vmatprep.subr.bf16.mxu1 %v5837_v45  ;;  %v363_v45 = vld [vmem:[%s8777_s1 + $0x8d0] sm:$0xff]  ;;  %v156_v17 = vld [vmem:[%s8777_s1 + $0x258] sm:$0xff] }
 0x135   :  { %3587 = vmatpush1.bf16.msra.mxu0 %v5574_v25  ;;  %v112_v25 = vld [vmem:[%s8777_s1 + $0xf8] sm:$0xff] }
 0x136   :  { %3588 = vmatprep.subr.bf16.mxu0 %v5583_v26  ;;  %v367_v26 = vld [vmem:[%s8777_s1 + $0x8f0] sm:$0xff]  ;;  %v5385_v30 = vcombine.high %v108_v24, %v112_v25 }
 0x137   :  { %3507 = vmatpush1.bf16.msra.mxu1 %v5836_v34  ;;  %v5639_v32 = vcombine.high %v363_v45, %v367_v26  ;;  %v116_v34 = vld [vmem:[%s8777_s1 + $0x118] sm:$0xff]  ;;  %v5638_v38 = vcombine.low %v363_v45, %v367_v26 }
 0x138   :  { %3508 = vmatprep.subr.bf16.mxu1 %v5845_v37  ;;  %v375_v37 = vld [vmem:[%s8777_s1 + $0x930] sm:$0xff]  ;;  %v164_v26 = vld [vmem:[%s8777_s1 + $0x298] sm:$0xff] }
 0x139   :  { %3589 = vmatpush1.bf16.msra.mxu0 %v5582_v36  ;;  %v120_v36 = vld [vmem:[%s8777_s1 + $0x138] sm:$0xff] }
 0x13a   :  { %3590 = vmatprep.subr.bf16.mxu0 %v5591_v63  ;;  %v5384_v63 = vcombine.low %v108_v24, %v112_v25  ;;  %v5393_v39 = vcombine.high %v116_v34, %v120_v36 }
 0x13b   :  { %3509 = vmatpush1.bf16.msra.mxu1 %v5844_v42  ;;  %v128_v42 = vld [vmem:[%s8777_s1 + $0x178] sm:$0xff] }
 0x13c   :  { %3510 = vmatprep.subr.bf16.mxu1 %v5853_v43  ;;  %v383_v43 = vld [vmem:[%s8777_s1 + $0x970] sm:$0xff]  ;;  %v5401_v48 = vcombine.high %v124_v5, %v128_v42 }
 0x13d   :  { %3591 = vmatpush1.bf16.msra.mxu0 %v5590_v13  ;;  %v379_v13 = vld [vmem:[%s8777_s1 + $0x950] sm:$0xff] }
 0x13e   :  { %3592 = vmatprep.subr.bf16.mxu0 %v5599_v46  ;;  %v5392_v46 = vcombine.low %v116_v34, %v120_v36  ;;  %v5655_v49 = vcombine.high %v379_v13, %v383_v43  ;;  %v5654_v56 = vcombine.low %v379_v13, %v383_v43  ;;  %v180_v43 = vld [vmem:[%s8777_s1 + $0x318] sm:$0xff] }
 0x13f   :  { %3511 = vmatpush1.bf16.msra.mxu1 %v5852_v51  ;;  %v136_v51 = vld [vmem:[%s8777_s1 + $0x1b8] sm:$0xff] }
 0x140   :  { %3512 = vmatprep.subr.bf16.mxu1 %v5861_v54  ;;  %v391_v54 = vld [vmem:[%s8777_s1 + $0x9b0] sm:$0xff]  ;;  %v5409_v58 = vcombine.high %v132_v50, %v136_v51 }
 0x141   :  { %3593 = vmatpush1.bf16.msra.mxu0 %v5598_v52  ;;  %v387_v52 = vld [vmem:[%s8777_s1 + $0x990] sm:$0xff] }
 0x142   :  { %3594 = vmatprep.subr.bf16.mxu0 %v5607_v55  ;;  %v5400_v55 = vcombine.low %v124_v5, %v128_v42  ;;  %v5663_v59 = vcombine.high %v387_v52, %v391_v54  ;;  %v5662_v2 = vcombine.low %v387_v52, %v391_v54  ;;  %v188_v54 = vld [vmem:[%s8777_s1 + $0x358] sm:$0xff] }
 0x143   :  { %3513 = vmatpush1.bf16.msra.mxu1 %v5860_v61  ;;  %v144_v61 = vld [vmem:[%s8777_s1 + $0x1f8] sm:$0xff] }
 0x144   :  { %3687 = vmatprep.subr.bf16.mxu1 %v5361_v0  ;;  %v399_v0 = vld [vmem:[%s8777_s1 + $0x9f0] sm:$0xff]  ;;  %v5417_v3 = vcombine.high %v140_v60, %v144_v61 }
 0x145   :  { %3595 = vmatpush1.bf16.msra.mxu0 %v5606_v62  ;;  %v395_v62 = vld [vmem:[%s8777_s1 + $0x9d0] sm:$0xff] }
 0x146   :  { %3605 = vmatprep.subr.bf16.mxu0 %v5615_v21  ;;  %3515 = vmatmul.mubr.bf16.vlgmr.msra.gmra.mrb[4].mxu1 %v7153_v18  ;;  %v5408_v21 = vcombine.low %v132_v50, %v136_v51  ;;  %v5671_v4 = vcombine.high %v395_v62, %v399_v0  ;;  %v5670_v12 = vcombine.low %v395_v62, %v399_v0  ;;  %v196_v0 = vld [vmem:[%s8777_s1 + $0x398] sm:$0xff] }
 0x147   :  { %3688 = vmatpush1.bf16.msra.mxu1 %v5360_v7  ;;  %3719 = vmatprep.mubr.bf16.mxu1 %v6603_v11  ;;  %v371_v11 = vld [vmem:[%s8777_s1 + $0x910] sm:$0xff]  ;;  %v152_v7 = vld [vmem:[%s8777_s1 + $0x238] sm:$0xff] }
 0x148   :  { %3597 = vmatmul.mubr.bf16.vlgmr.msra.gmra.mrb[4].mxu0 %v6742_v35  ;;  %3689 = vmatprep.subr.bf16.mxu1 %v5369_v9  ;;  %v5647_v40 = vcombine.high %v371_v11, %v375_v37  ;;  %v5646_v47 = vcombine.low %v371_v11, %v375_v37  ;;  %v407_v9 = vld [vmem:[%s8777_s1 + $0xa30] sm:$0xff]  ;;  %v5425_v14 = vcombine.high %v148_v6, %v152_v7  ;;  %v172_v37 = vld [vmem:[%s8777_s1 + $0x2d8] sm:$0xff] }
 0x149   :  { %3606 = vmatpush1.bf16.msra.mxu0 %v5614_v8  ;;  %3637 = vmatprep.mubr.bf16.mxu0 %v6756_v41  ;;  %v403_v8 = vld [vmem:[%s8777_s1 + $0xa10] sm:$0xff] }
 0x14a   :  { %3607 = vmatprep.subr.bf16.mxu0 %v5623_v10  ;;  %v5416_v10 = vcombine.low %v140_v60, %v144_v61  ;;  %v5679_v15 = vcombine.high %v403_v8, %v407_v9  ;;  %v5678_v24 = vcombine.low %v403_v8, %v407_v9  ;;  %v204_v9 = vld [vmem:[%s8777_s1 + $0x3d8] sm:$0xff] }
 0x14b   :  { %3690 = vmatpush1.bf16.msra.mxu1 %v5368_v19  ;;  %v160_v19 = vld [vmem:[%s8777_s1 + $0x278] sm:$0xff] }
 0x14c   :  { %3691 = vmatprep.subr.bf16.mxu1 %v5377_v22  ;;  %v415_v22 = vld [vmem:[%s8777_s1 + $0xa70] sm:$0xff]  ;;  %v5433_v25 = vcombine.high %v156_v17, %v160_v19 }
 0x14d   :  { %3608 = vmatpush1.bf16.msra.mxu0 %v5622_v20  ;;  %v411_v20 = vld [vmem:[%s8777_s1 + $0xa50] sm:$0xff] }
 0x14e   :  { %3609 = vmatprep.subr.bf16.mxu0 %v5631_v23  ;;  %v5424_v23 = vcombine.low %v148_v6, %v152_v7  ;;  %v5687_v45 = vcombine.high %v411_v20, %v415_v22  ;;  %v5686_v34 = vcombine.low %v411_v20, %v415_v22  ;;  %v212_v22 = vld [vmem:[%s8777_s1 + $0x418] sm:$0xff] }
 0x14f   :  { %3692 = vmatpush1.bf16.msra.mxu1 %v5376_v27  ;;  %v168_v27 = vld [vmem:[%s8777_s1 + $0x2b8] sm:$0xff] }
 0x150   :  { %3693 = vmatprep.subr.bf16.mxu1 %v5385_v30  ;;  %v423_v30 = vld [vmem:[%s8777_s1 + $0xab0] sm:$0xff]  ;;  %v5441_v36 = vcombine.high %v164_v26, %v168_v27 }
 0x151   :  { %3610 = vmatpush1.bf16.msra.mxu0 %v5630_v29  ;;  %v419_v29 = vld [vmem:[%s8777_s1 + $0xa90] sm:$0xff] }
 0x152   :  { %3611 = vmatprep.subr.bf16.mxu0 %v5639_v32  ;;  %v5432_v32 = vcombine.low %v156_v17, %v160_v19  ;;  %v5695_v11 = vcombine.high %v419_v29, %v423_v30  ;;  %v5694_v5 = vcombine.low %v419_v29, %v423_v30  ;;  %v220_v30 = vld [vmem:[%s8777_s1 + $0x458] sm:$0xff] }
 0x153   :  { %3694 = vmatpush1.bf16.msra.mxu1 %v5384_v63  ;;  %v176_v63 = vld [vmem:[%s8777_s1 + $0x2f8] sm:$0xff] }
 0x154   :  { %3695 = vmatprep.subr.bf16.mxu1 %v5393_v39  ;;  %v431_v39 = vld [vmem:[%s8777_s1 + $0xaf0] sm:$0xff]  ;;  %v5449_v42 = vcombine.high %v172_v37, %v176_v63 }
 0x155   :  { %3612 = vmatpush1.bf16.msra.mxu0 %v5638_v38  ;;  %v427_v38 = vld [vmem:[%s8777_s1 + $0xad0] sm:$0xff] }
 0x156   :  { %3613 = vmatprep.subr.bf16.mxu0 %v5647_v40  ;;  %v5440_v40 = vcombine.low %v164_v26, %v168_v27  ;;  %v5703_v13 = vcombine.high %v427_v38, %v431_v39  ;;  %v5702_v50 = vcombine.low %v427_v38, %v431_v39  ;;  %v228_v39 = vld [vmem:[%s8777_s1 + $0x498] sm:$0xff] }
 0x157   :  { %3696 = vmatpush1.bf16.msra.mxu1 %v5392_v46  ;;  %v184_v46 = vld [vmem:[%s8777_s1 + $0x338] sm:$0xff] }
 0x158   :  { %3697 = vmatprep.subr.bf16.mxu1 %v5401_v48  ;;  %v439_v48 = vld [vmem:[%s8777_s1 + $0xb30] sm:$0xff]  ;;  %v5457_v51 = vcombine.high %v180_v43, %v184_v46 }
 0x159   :  { %3614 = vmatpush1.bf16.msra.mxu0 %v5646_v47  ;;  %v435_v47 = vld [vmem:[%s8777_s1 + $0xb10] sm:$0xff] }
 0x15a   :  { %3615 = vmatprep.subr.bf16.mxu0 %v5655_v49  ;;  %v5448_v49 = vcombine.low %v172_v37, %v176_v63  ;;  %v5711_v52 = vcombine.high %v435_v47, %v439_v48  ;;  %v5710_v60 = vcombine.low %v435_v47, %v439_v48  ;;  %v240_v48 = vld [vmem:[%s8777_s1 + $0x4f8] sm:$0xff] }
 0x15b   :  { %3698 = vmatpush1.bf16.msra.mxu1 %v5400_v55  ;;  %v192_v55 = vld [vmem:[%s8777_s1 + $0x378] sm:$0xff] }
 0x15c   :  { %3699 = vmatprep.subr.bf16.mxu1 %v5409_v58  ;;  %v447_v58 = vld [vmem:[%s8777_s1 + $0xb70] sm:$0xff]  ;;  %v5465_v61 = vcombine.high %v188_v54, %v192_v55 }
 0x15d   :  { %3616 = vmatpush1.bf16.msra.mxu0 %v5654_v56  ;;  %v443_v56 = vld [vmem:[%s8777_s1 + $0xb50] sm:$0xff] }
 0x15e   :  { %3617 = vmatprep.subr.bf16.mxu0 %v5663_v59  ;;  %v5456_v59 = vcombine.low %v180_v43, %v184_v46  ;;  %v5719_v62 = vcombine.high %v443_v56, %v447_v58  ;;  %v5718_v6 = vcombine.low %v443_v56, %v447_v58  ;;  %v244_v56 = vld [vmem:[%s8777_s1 + $0x518] sm:$0xff] }
 0x15f   :  { %3700 = vmatpush1.bf16.msra.mxu1 %v5408_v21  ;;  %v200_v21 = vld [vmem:[%s8777_s1 + $0x3b8] sm:$0xff] }
 0x160   :  { %3701 = vmatprep.subr.bf16.mxu1 %v5417_v3  ;;  %v455_v3 = vld [vmem:[%s8777_s1 + $0xbb0] sm:$0xff]  ;;  %v5473_v7 = vcombine.high %v196_v0, %v200_v21  ;;  %v248_v58 = vld [vmem:[%s8777_s1 + $0x538] sm:$0xff] }
 0x161   :  { %3618 = vmatpush1.bf16.msra.mxu0 %v5662_v2  ;;  %v451_v2 = vld [vmem:[%s8777_s1 + $0xb90] sm:$0xff] }
 0x162   :  { %3619 = vmatprep.subr.bf16.mxu0 %v5671_v4  ;;  %v5464_v4 = vcombine.low %v188_v54, %v192_v55  ;;  %v5727_v8 = vcombine.high %v451_v2, %v455_v3  ;;  %v5726_v17 = vcombine.low %v451_v2, %v455_v3  ;;  %v252_v2 = vld [vmem:[%s8777_s1 + $0x558] sm:$0xff] }
 0x163   :  { %3702 = vmatpush1.bf16.msra.mxu1 %v5416_v10  ;;  %v208_v10 = vld [vmem:[%s8777_s1 + $0x3f8] sm:$0xff] }
 0x164   :  { %3703 = vmatprep.subr.bf16.mxu1 %v5425_v14  ;;  %v463_v14 = vld [vmem:[%s8777_s1 + $0xbf0] sm:$0xff]  ;;  %v5481_v19 = vcombine.high %v204_v9, %v208_v10  ;;  %v256_v3 = vld [vmem:[%s8777_s1 + $0x578] sm:$0xff] }
 0x165   :  { %3620 = vmatpush1.bf16.msra.mxu0 %v5670_v12  ;;  %v459_v12 = vld [vmem:[%s8777_s1 + $0xbd0] sm:$0xff] }
 0x166   :  { %3621 = vmatprep.subr.bf16.mxu0 %v5679_v15  ;;  %v5472_v15 = vcombine.low %v196_v0, %v200_v21  ;;  %v5735_v20 = vcombine.high %v459_v12, %v463_v14  ;;  %v5734_v26 = vcombine.low %v459_v12, %v463_v14  ;;  %v7788_v0 = vsub.s32 0, %v6551_v44 }
 0x167   :  { %3704 = vmatpush1.bf16.msra.mxu1 %v5424_v23  ;;  %v216_v23 = vld [vmem:[%s8777_s1 + $0x438] sm:$0xff]  ;;  %v5529_v12 = vcombine.high %v252_v2, %v256_v3 }
 0x168   :  { %3705 = vmatprep.subr.bf16.mxu1 %v5433_v25  ;;  %v471_v25 = vld [vmem:[%s8777_s1 + $0xc30] sm:$0xff]  ;;  %v5489_v27 = vcombine.high %v212_v22, %v216_v23 }
 0x169   :  { %3622 = vmatpush1.bf16.msra.mxu0 %v5678_v24  ;;  %v467_v24 = vld [vmem:[%s8777_s1 + $0xc10] sm:$0xff] }
 0x16a   :  { %3623 = vmatprep.subr.bf16.mxu0 %v5687_v45  ;;  %v5480_v45 = vcombine.low %v204_v9, %v208_v10  ;;  %v5743_v29 = vcombine.high %v467_v24, %v471_v25  ;;  %v5742_v37 = vcombine.low %v467_v24, %v471_v25  ;;  %v5520_v9 = vcombine.low %v244_v56, %v248_v58 }
 0x16b   :  { %3706 = vmatpush1.bf16.msra.mxu1 %v5432_v32  ;;  %v224_v32 = vld [vmem:[%s8777_s1 + $0x478] sm:$0xff]  ;;  %v5528_v24 = vcombine.low %v252_v2, %v256_v3 }
 0x16c   :  { %3707 = vmatprep.subr.bf16.mxu1 %v5441_v36  ;;  %v479_v36 = vld [vmem:[%s8777_s1 + $0xc70] sm:$0xff]  ;;  %v5497_v63 = vcombine.high %v220_v30, %v224_v32 }
 0x16d   :  { %3624 = vmatpush1.bf16.msra.mxu0 %v5686_v34  ;;  %v475_v34 = vld [vmem:[%s8777_s1 + $0xc50] sm:$0xff] }
 0x16e   :  { %3625 = vmatprep.subr.bf16.mxu0 %v5695_v11  ;;  %v5488_v11 = vcombine.low %v212_v22, %v216_v23  ;;  %v5751_v38 = vcombine.high %v475_v34, %v479_v36  ;;  %v5750_v43 = vcombine.low %v475_v34, %v479_v36  ;;  %v515_v22 = vld [vmem:[%s8777_s1 + $0xd90] sm:$0xff] }
 0x16f   :  { %3708 = vmatpush1.bf16.msra.mxu1 %v5440_v40  ;;  %v232_v40 = vld [vmem:[%s8777_s1 + $0x4b8] sm:$0xff]  ;;  %v519_v23 = vld [vmem:[%s8777_s1 + $0xdb0] sm:$0xff] }
 0x170   :  { %3709 = vmatprep.subr.bf16.mxu1 %v5449_v42  ;;  %v487_v42 = vld [vmem:[%s8777_s1 + $0xcb0] sm:$0xff]  ;;  %v5505_v46 = vcombine.high %v228_v39, %v232_v40 }
 0x171   :  { %3626 = vmatpush1.bf16.msra.mxu0 %v5694_v5  ;;  %v483_v5 = vld [vmem:[%s8777_s1 + $0xc90] sm:$0xff] }
 0x172   :  { %3627 = vmatprep.subr.bf16.mxu0 %v5703_v13  ;;  %v5496_v13 = vcombine.low %v220_v30, %v224_v32  ;;  %v5759_v47 = vcombine.high %v483_v5, %v487_v42  ;;  %v272_v30 = vld [vmem:[%s8777_s1 + $0x5f8] sm:$0xff]  ;;  %v523_v36 = vld [vmem:[%s8777_s1 + $0xdd0] sm:$0xff] }
 0x173   :  { %3710 = vmatpush1.bf16.msra.mxu1 %v5448_v49  ;;  %v491_v49 = vld [vmem:[%s8777_s1 + $0xcd0] sm:$0xff] }
 0x174   :  { %3711 = vmatprep.subr.bf16.mxu1 %v5457_v51  ;;  %v5504_v51 = vcombine.low %v228_v39, %v232_v40  ;;  %v5790_v40 = vcombine.low %v515_v22, %v519_v23 }
 0x175   :  { %3628 = vmatpush1.bf16.msra.mxu0 %v5702_v50  ;;  %v495_v50 = vld [vmem:[%s8777_s1 + $0xcf0] sm:$0xff] }
 0x176   :  { %3629 = vmatprep.subr.bf16.mxu0 %v5711_v52  ;;  %v5758_v52 = vcombine.low %v483_v5, %v487_v42  ;;  %v5767_v55 = vcombine.high %v491_v49, %v495_v50 }
 0x177   :  { %3712 = vmatpush1.bf16.msra.mxu1 %v5456_v59  ;;  %v503_v59 = vld [vmem:[%s8777_s1 + $0xd30] sm:$0xff] }
 0x178   :  { %3713 = vmatprep.subr.bf16.mxu1 %v5465_v61  ;;  %v5766_v61 = vcombine.low %v491_v49, %v495_v50 }
 0x179   :  { %3630 = vmatpush1.bf16.msra.mxu0 %v5710_v60 }
 0x17a   :  { %3631 = vmatprep.subr.bf16.mxu0 %v5719_v62  ;;  %v5521_v62 = vcombine.high %v244_v56, %v248_v58 }
 0x17b   :  { %3714 = vmatpush1.bf16.msra.mxu1 %v5464_v4  ;;  %v7799_v4 = vld [vmem:[%s8778_s2] sm:$0xff] }
 0x17c   :  { %3715 = vmatprep.subr.bf16.mxu1 %v5473_v7  ;;  %v507_v7 = vld [vmem:[%s8777_s1 + $0xd50] sm:$0xff]  ;;  %v598_v14 = vrot.slane %v7799_v4, %v7788_v0 }
 0x17d   :  { %3632 = vmatpush1.bf16.msra.mxu0 %v5718_v6  ;;  %v7802_v6 = vsub.s32 1, %v6551_v44 }
 0x17e   :  { %3633 = vmatprep.subr.bf16.mxu0 %v5727_v8  ;;  %v511_v8 = vld [vmem:[%s8777_s1 + $0xd70] sm:$0xff] }
 0x17f   :  { %3716 = vmatpush1.bf16.msra.mxu1 %v5472_v15  ;;  %v5783_v15 = vcombine.high %v507_v7, %v511_v8  ;;  %v5782_v25 = vcombine.low %v507_v7, %v511_v8 }
 0x180   :  { %3717 = vmatprep.subr.bf16.mxu1 %v5481_v19  ;;  %v264_v19 = vld [vmem:[%s8777_s1 + $0x5b8] sm:$0xff] }
 0x181   :  { %3634 = vmatpush1.bf16.msra.mxu0 %v5726_v17  ;;  %v260_v17 = vld [vmem:[%s8777_s1 + $0x598] sm:$0xff] }
 0x182   :  { %3635 = vmatprep.subr.bf16.mxu0 %v5735_v20  ;;  %v602_v20 = vrot.slane %v7799_v4, %v7802_v6 }
 0x183   :  { %3718 = vmatpush1.bf16.msra.mxu1 %v5480_v45  ;;  %v5537_v45 = vcombine.high %v260_v17, %v264_v19 }
 0x184   :  { %3728 = vmatprep.subr.bf16.mxu1 %v5489_v27  ;;  %v5791_v27 = vcombine.high %v515_v22, %v519_v23  ;;  %v3232_v32 = vadd.f32 %v7423_v33, %v602_v20  ;;  %v308_v22 = vld [vmem:[%s8777_s1 + $0x718] sm:$0xff] }
 0x185   :  { %3636 = vmatpush1.bf16.msra.mxu0 %v5734_v26  ;;  %v3230_v26 = vadd.f32 %v7415_v28, %v598_v14  ;;  %v527_v28 = vld [vmem:[%s8777_s1 + $0xdf0] sm:$0xff]  ;;  %v312_v23 = vld [vmem:[%s8777_s1 + $0x738] sm:$0xff] }
 0x186   :  { %3646 = vmatprep.subr.bf16.mxu0 %v5743_v29  ;;  %3720 = vmatmul.mubr.bf16.vlgmr.msra.gmra.mrb[8].mxu1 %v6732_v31  ;;  %v236_v31 = vld [vmem:[%s8777_s1 + $0x4d8] sm:$0xff]  ;;  %v5799_v42 = vcombine.high %v523_v36, %v527_v28  ;;  %v559_v14 = vld [vmem:[%s8777_s1 + $0xef0] sm:$0xff] }
 0x187   :  { %3729 = vmatpush1.bf16.msra.mxu1 %v5488_v11  ;;  %3760 = vmatprep.mubr.bf16.mxu1 %v6614_v16  ;;  %v5513_v54 = vcombine.high %v236_v31, %v240_v48  ;;  %v499_v16 = vld [vmem:[%s8777_s1 + $0xd10] sm:$0xff]  ;;  %v5512_v60 = vcombine.low %v236_v31, %v240_v48  ;;  %v268_v29 = vld [vmem:[%s8777_s1 + $0x5d8] sm:$0xff]  ;;  %v5798_v48 = vcombine.low %v523_v36, %v527_v28 }
 0x188   :  { %3638 = vmatmul.mubr.bf16.vlgmr.msra.gmra.mrb[4].mxu0 %v6951_v57  ;;  %3730 = vmatprep.subr.bf16.mxu1 %v5497_v63  ;;  %v5775_v21 = vcombine.high %v499_v16, %v503_v59  ;;  %v5774_v10 = vcombine.low %v499_v16, %v503_v59  ;;  %v5536_v63 = vcombine.low %v260_v17, %v264_v19  ;;  %v575_v36 = vld [vmem:[%s8777_s1 + $0xf70] sm:$0xff] }
 0x189   :  { %3647 = vmatpush1.bf16.msra.mxu0 %v5742_v37  ;;  %3678 = vmatprep.mubr.bf16.mxu0 %v6965_v1  ;;  %v5545_v33 = vcombine.high %v268_v29, %v272_v30  ;;  %v5544_v31 = vcombine.low %v268_v29, %v272_v30  ;;  %v316_v30 = vld [vmem:[%s8777_s1 + $0x758] sm:$0xff]  ;;  %v5584_v28 = vcombine.low %v308_v22, %v312_v23 }
 0x18a   :  { %3648 = vmatprep.subr.bf16.mxu0 %v5751_v38 }
 0x18b   :  { %3731 = vmatpush1.bf16.msra.mxu1 %v5496_v13  ;;  %v276_v13 = vld [vmem:[%s8777_s1 + $0x618] sm:$0xff] }
 0x18c   :  { %3732 = vmatprep.subr.bf16.mxu1 %v5505_v46  ;;  %v531_v46 = vld [vmem:[%s8777_s1 + $0xe10] sm:$0xff] }
 0x18d   :  { %3649 = vmatpush1.bf16.msra.mxu0 %v5750_v43  ;;  %v280_v43 = vld [vmem:[%s8777_s1 + $0x638] sm:$0xff] }
 0x18e   :  { %3650 = vmatprep.subr.bf16.mxu0 %v5759_v47  ;;  %v535_v47 = vld [vmem:[%s8777_s1 + $0xe30] sm:$0xff]  ;;  %v5553_v49 = vcombine.high %v276_v13, %v280_v43  ;;  %v5552_v56 = vcombine.low %v276_v13, %v280_v43 }
 0x18f   :  { %3733 = vmatpush1.bf16.msra.mxu1 %v5504_v51  ;;  %v5807_v50 = vcombine.high %v531_v46, %v535_v47  ;;  %v284_v51 = vld [vmem:[%s8777_s1 + $0x658] sm:$0xff]  ;;  %v5806_v58 = vcombine.low %v531_v46, %v535_v47 }
 0x190   :  { %3734 = vmatprep.subr.bf16.mxu1 %v5513_v54  ;;  %v539_v54 = vld [vmem:[%s8777_s1 + $0xe50] sm:$0xff] }
 0x191   :  { %3651 = vmatpush1.bf16.msra.mxu0 %v5758_v52  ;;  %v288_v52 = vld [vmem:[%s8777_s1 + $0x678] sm:$0xff] }
 0x192   :  { %3652 = vmatprep.subr.bf16.mxu0 %v5767_v55  ;;  %v543_v55 = vld [vmem:[%s8777_s1 + $0xe70] sm:$0xff]  ;;  %v5561_v16 = vcombine.high %v284_v51, %v288_v52  ;;  %v5560_v2 = vcombine.low %v284_v51, %v288_v52 }
 0x193   :  { %3735 = vmatpush1.bf16.msra.mxu1 %v5512_v60  ;;  %v5815_v59 = vcombine.high %v539_v54, %v543_v55  ;;  %v292_v60 = vld [vmem:[%s8777_s1 + $0x698] sm:$0xff]  ;;  %v5814_v3 = vcombine.low %v539_v54, %v543_v55 }
 0x194   :  { %3736 = vmatprep.subr.bf16.mxu1 %v5521_v62  ;;  %v547_v62 = vld [vmem:[%s8777_s1 + $0xe90] sm:$0xff] }
 0x195   :  { %3653 = vmatpush1.bf16.msra.mxu0 %v5766_v61  ;;  %v296_v61 = vld [vmem:[%s8777_s1 + $0x6b8] sm:$0xff] }
 0x196   :  { %3654 = vmatprep.subr.bf16.mxu0 %v5775_v21  ;;  %v551_v21 = vld [vmem:[%s8777_s1 + $0xeb0] sm:$0xff]  ;;  %v5569_v7 = vcombine.high %v292_v60, %v296_v61 }
 0x197   :  { %3737 = vmatpush1.bf16.msra.mxu1 %v5520_v9  ;;  %v5823_v8 = vcombine.high %v547_v62, %v551_v21  ;;  %v300_v9 = vld [vmem:[%s8777_s1 + $0x6d8] sm:$0xff]  ;;  %v5822_v17 = vcombine.low %v547_v62, %v551_v21  ;;  %v6132_v62 = vld [vmem:[%s8779_s3 + $0x4] ss:$8 sps:$4 sm:$0xff]  }
 0x198   :  { %3738 = vmatprep.subr.bf16.mxu1 %v5529_v12  ;;  %v555_v12 = vld [vmem:[%s8777_s1 + $0xed0] sm:$0xff]  ;;  %v348_v21 = vld [vmem:[%s8777_s1 + $0x858] sm:$0xff] }
 0x199   :  { %3655 = vmatpush1.bf16.msra.mxu0 %v5774_v10  ;;  %v304_v10 = vld [vmem:[%s8777_s1 + $0x6f8] sm:$0xff]  ;;  %v5831_v20 = vcombine.high %v555_v12, %v559_v14 }
 0x19a   :  { %3656 = vmatprep.subr.bf16.mxu0 %v5783_v15  ;;  %v5568_v15 = vcombine.low %v292_v60, %v296_v61  ;;  %v5577_v19 = vcombine.high %v300_v9, %v304_v10 }
 0x19b   :  { %v3352_v34 = vpop.f32.mrb[0].mxu0  ;;  %3739 = vmatpush1.bf16.msra.mxu1 %v5528_v24  ;;  %v563_v24 = vld [vmem:[%s8777_s1 + $0xf10] sm:$0xff] }
 0x19c   :  { %v7840_v11 = vadd.f32 %v3352_v34, %v3230_v26  ;;  %v3354_v37 = vpop.f32.mrb[1].mxu0  ;;  %3740 = vmatprep.subr.bf16.mxu1 %v5537_v45  ;;  %v5576_v45 = vcombine.low %v300_v9, %v304_v10  ;;  %v5830_v26 = vcombine.low %v555_v12, %v559_v14  ;;  %v571_v34 = vld [vmem:[%s8777_s1 + $0xf50] sm:$0xff]  ;;  %v356_v12 = vld [vmem:[%s8777_s1 + $0x898] sm:$0xff] }
 0x19d   :  { %v7842_v38 = vadd.f32 %v3354_v37, %v3232_v32  ;;  %v3356_v39 = vpop.f32.mrb[2].mxu0  ;;  %3657 = vmatpush1.bf16.msra.mxu0 %v5782_v25  ;;  %v567_v25 = vld [vmem:[%s8777_s1 + $0xf30] sm:$0xff]  ;;  %v320_v32 = vld [vmem:[%s8777_s1 + $0x778] sm:$0xff]  ;;  %v5846_v43 = vcombine.low %v571_v34, %v575_v36 }
 0x19e   :  { %v3357_v5 = vpop.f32.mrb[3].mxu0  ;;  %3658 = vmatprep.subr.bf16.mxu0 %v5791_v27  ;;  %v5585_v27 = vcombine.high %v308_v22, %v312_v23  ;;  %v5839_v29 = vcombine.high %v563_v24, %v567_v25  ;;  %v5838_v37 = vcombine.low %v563_v24, %v567_v25  ;;  %v5847_v39 = vcombine.high %v571_v34, %v575_v36  ;;  %v6135_v10 = vld [vmem:[%s8779_s3 + $0x14] ss:$8 sps:$4 sm:$0xff]   ;;  %v6136_v24 = vld [vmem:[%s8779_s3 + $0x20] ss:$8 sps:$4 sm:$0xff]  }
 0x19f   :  { %3741 = vmatpush1.bf16.msra.mxu1 %v5536_v63  ;;  %v5593_v63 = vcombine.high %v316_v30, %v320_v32  ;;  %v579_v5 = vld [vmem:[%s8777_s1 + $0xf90] sm:$0xff]  ;;  %v5592_v13 = vcombine.low %v316_v30, %v320_v32  ;;  %vm3852_vm0 = vcmp.gt.f32.partialorder %v7842_v38, 0.0  ;;  %v368_v22 = vld [vmem:[%s8777_s1 + $0x8f8] sm:$0xff]  ;;  %v6144_v32 = vld [vmem:[%s8779_s3 + $0x44] ss:$8 sps:$4 sm:$0xff]   ;;  %vm3851_vm1 = vcmp.gt.f32.partialorder %v7840_v11, 0.0 }
 0x1a0   :  { %3742 = vmatprep.subr.bf16.mxu1 %v5545_v33  ;;  %v328_v33 = vld [vmem:[%s8777_s1 + $0x7b8] sm:$0xff] }
 0x1a1   :  { %3659 = vmatpush1.bf16.msra.mxu0 %v5790_v40  ;;  %v324_v40 = vld [vmem:[%s8777_s1 + $0x798] sm:$0xff] }
 0x1a2   :  { %3660 = vmatprep.subr.bf16.mxu0 %v5799_v42  ;;  %v583_v42 = vld [vmem:[%s8777_s1 + $0xfb0] sm:$0xff]  ;;  %v5601_v46 = vcombine.high %v324_v40, %v328_v33  ;;  %v5600_v51 = vcombine.low %v324_v40, %v328_v33  ;;  %v380_v34 = vld [vmem:[%s8777_s1 + $0x958] sm:$0xff] }
 0x1a3   :  { %3743 = vmatpush1.bf16.msra.mxu1 %v5544_v31  ;;  %v5855_v47 = vcombine.high %v579_v5, %v583_v42  ;;  %v332_v31 = vld [vmem:[%s8777_s1 + $0x7d8] sm:$0xff]  ;;  %v5854_v52 = vcombine.low %v579_v5, %v583_v42 }
 0x1a4   :  { %3744 = vmatprep.subr.bf16.mxu1 %v5553_v49  ;;  %v587_v49 = vld [vmem:[%s8777_s1 + $0xfd0] sm:$0xff]  ;;  %v384_v36 = vld [vmem:[%s8777_s1 + $0x978] sm:$0xff] }
 0x1a5   :  { %3661 = vmatpush1.bf16.msra.mxu0 %v5798_v48  ;;  %v336_v48 = vld [vmem:[%s8777_s1 + $0x7f8] sm:$0xff]  ;;  %v5656_v5 = vcombine.low %v380_v34, %v384_v36 }
 0x1a6   :  { %3662 = vmatprep.subr.bf16.mxu0 %v5807_v50  ;;  %v591_v50 = vld [vmem:[%s8777_s1 + $0xff0] sm:$0xff]  ;;  %v5609_v54 = vcombine.high %v332_v31, %v336_v48  ;;  %v388_v40 = vld [vmem:[%s8777_s1 + $0x998] sm:$0xff] }
 0x1a7   :  { %3745 = vmatpush1.bf16.msra.mxu1 %v5552_v56  ;;  %v5863_v55 = vcombine.high %v587_v49, %v591_v50  ;;  %v340_v56 = vld [vmem:[%s8777_s1 + $0x818] sm:$0xff]  ;;  %v5862_v60 = vcombine.low %v587_v49, %v591_v50 }
 0x1a8   :  { %3746 = vmatprep.subr.bf16.mxu1 %v5561_v16  ;;  %v3860_v16 = vmul.f32 0.01, %v7842_v38  ;;  %v392_v33 = vld [vmem:[%s8777_s1 + $0x9b8] sm:$0xff] }
 0x1a9   :  { %3663 = vmatpush1.bf16.msra.mxu0 %v5806_v58  ;;  %v344_v58 = vld [vmem:[%s8777_s1 + $0x838] sm:$0xff] }
 0x1aa   :  { %3664 = vmatprep.subr.bf16.mxu0 %v5815_v59  ;;  %v5608_v59 = vcombine.low %v332_v31, %v336_v48  ;;  %v5617_v61 = vcombine.high %v340_v56, %v344_v58  ;;  %v6145_v42 = vld [vmem:[%s8779_s3 + $0x50] ss:$8 sps:$4 sm:$0xff]   ;;  %v5664_v31 = vcombine.low %v388_v40, %v392_v33  ;;  %v6148_v48 = vld [vmem:[%s8779_s3 + $0x60] ss:$8 sps:$4 sm:$0xff]   ;;  %v6153_v50 = vld [vmem:[%s8779_s3 + $0x74] ss:$8 sps:$4 sm:$0xff]  }
 0x1ab   :  { %3747 = vmatpush1.bf16.msra.mxu1 %v5560_v2  ;;  %v352_v2 = vld [vmem:[%s8777_s1 + $0x878] sm:$0xff] }
 0x1ac   :  { %3748 = vmatprep.subr.bf16.mxu1 %v5569_v7  ;;  %v3868_v7 = vsel %vm3852_vm0, %v7842_v38, %v3860_v16  ;;  %v5625_v9 = vcombine.high %v348_v21, %v352_v2  ;;  %v360_v38 = vld [vmem:[%s8777_s1 + $0x8b8] sm:$0xff] }
 0x1ad   :  { %3665 = vmatpush1.bf16.msra.mxu0 %v5814_v3  ;;  %v5616_v3 = vcombine.low %v340_v56, %v344_v58  ;;  %v3876_v14 = vpack.c.bf16 %v3868_v7, %v3868_v7  ;;  %v5632_v23 = vcombine.low %v356_v12, %v360_v38  ;;  %v6156_v58 = vld [vmem:[%s8779_s3 + $0x84] ss:$8 sps:$4 sm:$0xff]   ;;  %v412_v16 = vld [vmem:[%s8777_s1 + $0xa58] sm:$0xff] }
 0x1ae   :  { %3666 = vmatprep.subr.bf16.mxu0 %v5823_v8  ;;  %v6130_v8 = vld [vmem:[%s8779_s3] ss:$8 sps:$4 sm:$0xff]  }
 0x1af   :  { %3749 = vmatpush1.bf16.msra.mxu1 %v5568_v15  ;;  %v5624_v15 = vcombine.low %v348_v21, %v352_v2  ;;  %v6159_v21 = vld [vmem:[%s8779_s3 + $0x94] ss:$8 sps:$4 sm:$0xff]  }
 0x1b0   :  { %3750 = vmatprep.subr.bf16.mxu1 %v5577_v19  ;;  %v5633_v19 = vcombine.high %v356_v12, %v360_v38  ;;  %v420_v2 = vld [vmem:[%s8777_s1 + $0xa98] sm:$0xff] }
 0x1b1   :  { %3667 = vmatpush1.bf16.msra.mxu0 %v5822_v17  ;;  %v6133_v17 = vld [vmem:[%s8779_s3 + $0x10] ss:$8 sps:$4 sm:$0xff]  }
 0x1b2   :  { %3668 = vmatprep.subr.bf16.mxu0 %v5831_v20  ;;  %v6138_v20 = vld [vmem:[%s8779_s3 + $0x24] ss:$8 sps:$4 sm:$0xff]   ;;  %v428_v12 = vld [vmem:[%s8777_s1 + $0xad8] sm:$0xff] }
 0x1b3   :  { %3751 = vmatpush1.bf16.msra.mxu1 %v5576_v45  ;;  %v6141_v45 = vld [vmem:[%s8779_s3 + $0x34] ss:$8 sps:$4 sm:$0xff]  }
 0x1b4   :  { %3752 = vmatprep.subr.bf16.mxu1 %v5585_v27  ;;  %v432_v38 = vld [vmem:[%s8777_s1 + $0xaf8] sm:$0xff] }
 0x1b5   :  { %3669 = vmatpush1.bf16.msra.mxu0 %v5830_v26  ;;  %v372_v26 = vld [vmem:[%s8777_s1 + $0x918] sm:$0xff] }
 0x1b6   :  { %3670 = vmatprep.subr.bf16.mxu0 %v5839_v29  ;;  %v6139_v29 = vld [vmem:[%s8779_s3 + $0x30] ss:$8 sps:$4 sm:$0xff]  }
 0x1b7   :  { %3753 = vmatpush1.bf16.msra.mxu1 %v5584_v28 }
 0x1b8   :  { %3754 = vmatprep.subr.bf16.mxu1 %v5593_v63  ;;  %v5657_v63 = vcombine.high %v380_v34, %v384_v36  ;;  %v456_v34 = vld [vmem:[%s8777_s1 + $0xbb8] sm:$0xff] }
 0x1b9   :  { %3671 = vmatpush1.bf16.msra.mxu0 %v5838_v37  ;;  %v6142_v37 = vld [vmem:[%s8779_s3 + $0x40] ss:$8 sps:$4 sm:$0xff]  }
 0x1ba   :  { %3672 = vmatprep.subr.bf16.mxu0 %v5847_v39  ;;  %v6147_v39 = vld [vmem:[%s8779_s3 + $0x54] ss:$8 sps:$4 sm:$0xff]  }
 0x1bb   :  { %3755 = vmatpush1.bf16.msra.mxu1 %v5592_v13  ;;  %v5665_v13 = vcombine.high %v388_v40, %v392_v33  ;;  %v464_v40 = vld [vmem:[%s8777_s1 + $0xbf8] sm:$0xff] }
 0x1bc   :  { %3756 = vmatprep.subr.bf16.mxu1 %v5601_v46  ;;  %v396_v46 = vld [vmem:[%s8777_s1 + $0x9d8] sm:$0xff] }
 0x1bd   :  { %3673 = vmatpush1.bf16.msra.mxu0 %v5846_v43  ;;  %v6150_v43 = vld [vmem:[%s8779_s3 + $0x64] ss:$8 sps:$4 sm:$0xff]  }
 0x1be   :  { %3674 = vmatprep.subr.bf16.mxu0 %v5855_v47  ;;  %v400_v47 = vld [vmem:[%s8777_s1 + $0x9f8] sm:$0xff] }
 0x1bf   :  { %3757 = vmatpush1.bf16.msra.mxu1 %v5600_v51  ;;  %v5673_v49 = vcombine.high %v396_v46, %v400_v47  ;;  %v404_v51 = vld [vmem:[%s8777_s1 + $0xa18] sm:$0xff] }
 0x1c0   :  { %3758 = vmatprep.subr.bf16.mxu1 %v5609_v54  ;;  %v5672_v54 = vcombine.low %v396_v46, %v400_v47  ;;  %v472_v46 = vld [vmem:[%s8777_s1 + $0xc38] sm:$0xff]  ;;  %v3859_v47 = vmul.f32 0.01, %v7840_v11 }
 0x1c1   :  { %3675 = vmatpush1.bf16.msra.mxu0 %v5854_v52  ;;  %v408_v52 = vld [vmem:[%s8777_s1 + $0xa38] sm:$0xff] }
 0x1c2   :  { %3676 = vmatprep.subr.bf16.mxu0 %v5863_v55  ;;  %v6151_v55 = vld [vmem:[%s8779_s3 + $0x70] ss:$8 sps:$4 sm:$0xff]   ;;  %v5681_v56 = vcombine.high %v404_v51, %v408_v52 }
 0x1c3   :  { %3759 = vmatpush1.bf16.msra.mxu1 %v5608_v59  ;;  %v416_v59 = vld [vmem:[%s8777_s1 + $0xa78] sm:$0xff] }
 0x1c4   :  { %3769 = vmatprep.subr.bf16.mxu1 %v5617_v61  ;;  %v6154_v61 = vld [vmem:[%s8779_s3 + $0x80] ss:$8 sps:$4 sm:$0xff]   ;;  %v5688_v7 = vcombine.low %v412_v16, %v416_v59 }
 0x1c5   :  { %3677 = vmatpush1.bf16.msra.mxu0 %v5862_v60  ;;  %v5680_v60 = vcombine.low %v404_v51, %v408_v52  ;;  %v476_v51 = vld [vmem:[%s8777_s1 + $0xc58] sm:$0xff] }
 0x1c6   :  { %4663 = vmatprep.subr.bf16.mxu0 %v6132_v62  ;;  %3761 = vmatmul.mubr.bf16.vlgmr.msra.gmra.mrb[8].mxu1 %v6742_v35  ;;  %v364_v35 = vld [vmem:[%s8777_s1 + $0x8d8] sm:$0xff]  ;;  %v5689_v62 = vcombine.high %v412_v16, %v416_v59 }
 0x1c7   :  { %3770 = vmatpush1.bf16.msra.mxu1 %v5616_v3  ;;  %3801 = vmatprep.mubr.bf16.mxu1 %v6756_v41  ;;  %v5641_v25 = vcombine.high %v364_v35, %v368_v22  ;;  %v376_v41 = vld [vmem:[%s8777_s1 + $0x938] sm:$0xff]  ;;  %v5640_v27 = vcombine.low %v364_v35, %v368_v22  ;;  %v5704_v22 = vcombine.low %v428_v12, %v432_v38 }
 0x1c8   :  { %3679 = vmatmul.mubr.bf16.vlgmr.msra.gmra.mrb[4].mxu0 %v7153_v18  ;;  %3771 = vmatprep.subr.bf16.mxu1 %v5625_v9  ;;  %v5649_v30 = vcombine.high %v372_v26, %v376_v41  ;;  %v5648_v28 = vcombine.low %v372_v26, %v376_v41  ;;  %v424_v3 = vld [vmem:[%s8777_s1 + $0xab8] sm:$0xff] }
 0x1c9   :  { %4664 = vmatpush1.bf16.msra.mxu0 %v6130_v8  ;;  %4695 = vmatprep.mubr.bf16.mxu0 %v3876_v14  ;;  %v6157_v8 = vld [vmem:[%s8779_s3 + $0x90] ss:$8 sps:$4 sm:$0xff]   ;;  %v5697_v9 = vcombine.high %v420_v2, %v424_v3  ;;  %v5696_v14 = vcombine.low %v420_v2, %v424_v3  ;;  %v6183_v59 = vld [vmem:[%s8779_s3 + $0x114] ss:$8 sps:$4 sm:$0xff]   ;;  %v6186_v2 = vld [vmem:[%s8779_s3 + $0x124] ss:$8 sps:$4 sm:$0xff]  }
 0x1ca   :  { %4665 = vmatprep.subr.bf16.mxu0 %v6135_v10  ;;  %v6162_v10 = vld [vmem:[%s8779_s3 + $0xa4] ss:$8 sps:$4 sm:$0xff]   ;;  %v440_v35 = vld [vmem:[%s8777_s1 + $0xb38] sm:$0xff] }
 0x1cb   :  { %3772 = vmatpush1.bf16.msra.mxu1 %v5624_v15  ;;  %v6160_v15 = vld [vmem:[%s8779_s3 + $0xa0] ss:$8 sps:$4 sm:$0xff]   ;;  %v448_v26 = vld [vmem:[%s8777_s1 + $0xb78] sm:$0xff] }
 0x1cc   :  { %3773 = vmatprep.subr.bf16.mxu1 %v5633_v19  ;;  %v6165_v19 = vld [vmem:[%s8779_s3 + $0xb4] ss:$8 sps:$4 sm:$0xff]  }
 0x1cd   :  { %4666 = vmatpush1.bf16.msra.mxu0 %v6133_v17  ;;  %v5705_v17 = vcombine.high %v428_v12, %v432_v38  ;;  %v480_v52 = vld [vmem:[%s8777_s1 + $0xc78] sm:$0xff] }
 0x1ce   :  { %4667 = vmatprep.subr.bf16.mxu0 %v6138_v20  ;;  %v436_v20 = vld [vmem:[%s8777_s1 + $0xb18] sm:$0xff] }
 0x1cf   :  { %3774 = vmatpush1.bf16.msra.mxu1 %v5632_v23  ;;  %v6163_v23 = vld [vmem:[%s8779_s3 + $0xb0] ss:$8 sps:$4 sm:$0xff]   ;;  %v5712_v41 = vcombine.low %v436_v20, %v440_v35 }
 0x1d0   :  { %3775 = vmatprep.subr.bf16.mxu1 %v5641_v25  ;;  %v6168_v25 = vld [vmem:[%s8779_s3 + $0xc4] ss:$8 sps:$4 sm:$0xff]   ;;  %v492_v3 = vld [vmem:[%s8777_s1 + $0xcd8] sm:$0xff] }
 0x1d1   :  { %4668 = vmatpush1.bf16.msra.mxu0 %v6136_v24  ;;  %v5713_v24 = vcombine.high %v436_v20, %v440_v35  ;;  %v500_v12 = vld [vmem:[%s8777_s1 + $0xd18] sm:$0xff] }
 0x1d2   :  { %4669 = vmatprep.subr.bf16.mxu0 %v6141_v45  ;;  %v444_v45 = vld [vmem:[%s8777_s1 + $0xb58] sm:$0xff] }
 0x1d3   :  { %3776 = vmatpush1.bf16.msra.mxu1 %v5640_v27  ;;  %v6166_v27 = vld [vmem:[%s8779_s3 + $0xc0] ss:$8 sps:$4 sm:$0xff]   ;;  %v5720_v36 = vcombine.low %v444_v45, %v448_v26  ;;  %v512_v20 = vld [vmem:[%s8777_s1 + $0xd78] sm:$0xff] }
 0x1d4   :  { %3777 = vmatprep.subr.bf16.mxu1 %v5649_v30  ;;  %v6171_v30 = vld [vmem:[%s8779_s3 + $0xd4] ss:$8 sps:$4 sm:$0xff]  }
 0x1d5   :  { %4670 = vmatpush1.bf16.msra.mxu0 %v6139_v29  ;;  %v5721_v29 = vcombine.high %v444_v45, %v448_v26  ;;  %v516_v45 = vld [vmem:[%s8777_s1 + $0xd98] sm:$0xff] }
 0x1d6   :  { %4671 = vmatprep.subr.bf16.mxu0 %v6144_v32  ;;  %v452_v32 = vld [vmem:[%s8777_s1 + $0xb98] sm:$0xff] }
 0x1d7   :  { %3778 = vmatpush1.bf16.msra.mxu1 %v5648_v28  ;;  %v6169_v28 = vld [vmem:[%s8779_s3 + $0xd0] ss:$8 sps:$4 sm:$0xff]   ;;  %v5728_v33 = vcombine.low %v452_v32, %v456_v34 }
 0x1d8   :  { %3779 = vmatprep.subr.bf16.mxu1 %v5657_v63  ;;  %v6174_v63 = vld [vmem:[%s8779_s3 + $0xe4] ss:$8 sps:$4 sm:$0xff]   ;;  %v520_v26 = vld [vmem:[%s8777_s1 + $0xdb8] sm:$0xff] }
 0x1d9   :  { %4672 = vmatpush1.bf16.msra.mxu0 %v6142_v37  ;;  %v5729_v37 = vcombine.high %v452_v32, %v456_v34  ;;  %v6198_v34 = vld [vmem:[%s8779_s3 + $0x164] ss:$8 sps:$4 sm:$0xff]  }
 0x1da   :  { %4673 = vmatprep.subr.bf16.mxu0 %v6147_v39  ;;  %v460_v39 = vld [vmem:[%s8777_s1 + $0xbd8] sm:$0xff] }
 0x1db   :  { %3780 = vmatpush1.bf16.msra.mxu1 %v5656_v5  ;;  %v6172_v5 = vld [vmem:[%s8779_s3 + $0xe0] ss:$8 sps:$4 sm:$0xff]  }
 0x1dc   :  { %3781 = vmatprep.subr.bf16.mxu1 %v5665_v13  ;;  %v6177_v13 = vld [vmem:[%s8779_s3 + $0xf4] ss:$8 sps:$4 sm:$0xff]  }
 0x1dd   :  { %4674 = vmatpush1.bf16.msra.mxu0 %v6145_v42  ;;  %v5737_v42 = vcombine.high %v460_v39, %v464_v40 }
 0x1de   :  { %4675 = vmatprep.subr.bf16.mxu0 %v6150_v43  ;;  %v468_v43 = vld [vmem:[%s8777_s1 + $0xc18] sm:$0xff] }
 0x1df   :  { %3782 = vmatpush1.bf16.msra.mxu1 %v5664_v31  ;;  %v5736_v31 = vcombine.low %v460_v39, %v464_v40  ;;  %v5792_v40 = vcombine.low %v516_v45, %v520_v26 }
 0x1e0   :  { %3783 = vmatprep.subr.bf16.mxu1 %v5673_v49  ;;  %v5745_v49 = vcombine.high %v468_v43, %v472_v46 }
 0x1e1   :  { %4676 = vmatpush1.bf16.msra.mxu0 %v6148_v48  ;;  %v6175_v48 = vld [vmem:[%s8779_s3 + $0xf0] ss:$8 sps:$4 sm:$0xff]  }
 0x1e2   :  { %4677 = vmatprep.subr.bf16.mxu0 %v6153_v50  ;;  %v6180_v50 = vld [vmem:[%s8779_s3 + $0x104] ss:$8 sps:$4 sm:$0xff]  }
 0x1e3   :  { %3784 = vmatpush1.bf16.msra.mxu1 %v5672_v54  ;;  %v3867_v54 = vsel %vm3851_vm1, %v7840_v11, %v3859_v47  ;;  %v488_v11 = vld [vmem:[%s8777_s1 + $0xcb8] sm:$0xff] }
 0x1e4   :  { %3785 = vmatprep.subr.bf16.mxu1 %v5681_v56  ;;  %v6178_v56 = vld [vmem:[%s8779_s3 + $0x100] ss:$8 sps:$4 sm:$0xff]   ;;  %v3875_v16 = vpack.c.bf16 %v3867_v54, %v3867_v54  ;;  %v536_v47 = vld [vmem:[%s8777_s1 + $0xe38] sm:$0xff] }
 0x1e5   :  { %4678 = vmatpush1.bf16.msra.mxu0 %v6151_v55  ;;  %v5744_v55 = vcombine.low %v468_v43, %v472_v46  ;;  %v532_v46 = vld [vmem:[%s8777_s1 + $0xe18] sm:$0xff] }
 0x1e6   :  { %4679 = vmatprep.subr.bf16.mxu0 %v6156_v58  ;;  %v5753_v58 = vcombine.high %v476_v51, %v480_v52  ;;  %v540_v54 = vld [vmem:[%s8777_s1 + $0xe58] sm:$0xff] }
 0x1e7   :  { %3786 = vmatpush1.bf16.msra.mxu1 %v5680_v60  ;;  %v484_v60 = vld [vmem:[%s8777_s1 + $0xc98] sm:$0xff] }
 0x1e8   :  { %3787 = vmatprep.subr.bf16.mxu1 %v5689_v62  ;;  %v6181_v62 = vld [vmem:[%s8779_s3 + $0x110] ss:$8 sps:$4 sm:$0xff]  }
 0x1e9   :  { %4680 = vmatpush1.bf16.msra.mxu0 %v6154_v61  ;;  %v5752_v61 = vcombine.low %v476_v51, %v480_v52  ;;  %v5809_v51 = vcombine.high %v532_v46, %v536_v47  ;;  %v6204_v52 = vld [vmem:[%s8779_s3 + $0x184] ss:$8 sps:$4 sm:$0xff]  }
 0x1ea   :  { %4681 = vmatprep.subr.bf16.mxu0 %v6159_v21  ;;  %v5761_v21 = vcombine.high %v484_v60, %v488_v11 }
 0x1eb   :  { %3788 = vmatpush1.bf16.msra.mxu1 %v5688_v7  ;;  %v5760_v7 = vcombine.low %v484_v60, %v488_v11  ;;  %v548_v60 = vld [vmem:[%s8777_s1 + $0xe98] sm:$0xff] }
 0x1ec   :  { %3789 = vmatprep.subr.bf16.mxu1 %v5697_v9  ;;  %v552_v11 = vld [vmem:[%s8777_s1 + $0xeb8] sm:$0xff] }
 0x1ed   :  { %4682 = vmatpush1.bf16.msra.mxu0 %v6157_v8  ;;  %v6184_v8 = vld [vmem:[%s8779_s3 + $0x120] ss:$8 sps:$4 sm:$0xff]  }
 0x1ee   :  { %4683 = vmatprep.subr.bf16.mxu0 %v6162_v10  ;;  %v6189_v10 = vld [vmem:[%s8779_s3 + $0x134] ss:$8 sps:$4 sm:$0xff]  }
 0x1ef   :  { %3790 = vmatpush1.bf16.msra.mxu1 %v5696_v14  ;;  %v6187_v14 = vld [vmem:[%s8779_s3 + $0x130] ss:$8 sps:$4 sm:$0xff]  }
 0x1f0   :  { %3791 = vmatprep.subr.bf16.mxu1 %v5705_v17  ;;  %v6192_v17 = vld [vmem:[%s8779_s3 + $0x144] ss:$8 sps:$4 sm:$0xff]  }
 0x1f1   :  { %4684 = vmatpush1.bf16.msra.mxu0 %v6160_v15 }
 0x1f2   :  { %4685 = vmatprep.subr.bf16.mxu0 %v6165_v19  ;;  %v508_v19 = vld [vmem:[%s8777_s1 + $0xd58] sm:$0xff] }
 0x1f3   :  { %3792 = vmatpush1.bf16.msra.mxu1 %v5704_v22  ;;  %v609_v22 = vsub.s32 3, %v6551_v44 }
 0x1f4   :  { %3793 = vmatprep.subr.bf16.mxu1 %v5713_v24  ;;  %v5785_v24 = vcombine.high %v508_v19, %v512_v20 }
 0x1f5   :  { %4686 = vmatpush1.bf16.msra.mxu0 %v6163_v23  ;;  %v6190_v23 = vld [vmem:[%s8779_s3 + $0x140] ss:$8 sps:$4 sm:$0xff]  }
 0x1f6   :  { %4687 = vmatprep.subr.bf16.mxu0 %v6168_v25  ;;  %v6195_v25 = vld [vmem:[%s8779_s3 + $0x154] ss:$8 sps:$4 sm:$0xff]  }
 0x1f7   :  { %3794 = vmatpush1.bf16.msra.mxu1 %v5712_v41  ;;  %v610_v41 = vrot.slane %v7799_v4, %v609_v22 }
 0x1f8   :  { %3795 = vmatprep.subr.bf16.mxu1 %v5721_v29  ;;  %v6193_v29 = vld [vmem:[%s8779_s3 + $0x150] ss:$8 sps:$4 sm:$0xff]  }
 0x1f9   :  { %4688 = vmatpush1.bf16.msra.mxu0 %v6166_v27  ;;  %v5784_v27 = vcombine.low %v508_v19, %v512_v20  ;;  %v572_v19 = vld [vmem:[%s8777_s1 + $0xf58] sm:$0xff] }
 0x1fa   :  { %4689 = vmatprep.subr.bf16.mxu0 %v6171_v30  ;;  %v5793_v30 = vcombine.high %v516_v45, %v520_v26  ;;  %v576_v20 = vld [vmem:[%s8777_s1 + $0xf78] sm:$0xff] }
 0x1fb   :  { %3796 = vmatpush1.bf16.msra.mxu1 %v5720_v36  ;;  %v524_v36 = vld [vmem:[%s8777_s1 + $0xdd8] sm:$0xff] }
 0x1fc   :  { %3797 = vmatprep.subr.bf16.mxu1 %v5729_v37  ;;  %v6219_v45 = vld [vmem:[%s8779_s3 + $0x1d4] ss:$8 sps:$4 sm:$0xff]  }
 0x1fd   :  { %4690 = vmatpush1.bf16.msra.mxu0 %v6169_v28  ;;  %v528_v28 = vld [vmem:[%s8777_s1 + $0xdf8] sm:$0xff] }
 0x1fe   :  { %4691 = vmatprep.subr.bf16.mxu0 %v6174_v63  ;;  %v580_v26 = vld [vmem:[%s8777_s1 + $0xf98] sm:$0xff] }
 0x1ff   :  { %3798 = vmatpush1.bf16.msra.mxu1 %v5728_v33 }
 0x200   :  { %3799 = vmatprep.subr.bf16.mxu1 %v5737_v42  ;;  %v5801_v42 = vcombine.high %v524_v36, %v528_v28 }
 0x201   :  { %4692 = vmatpush1.bf16.msra.mxu0 %v6172_v5  ;;  %v6196_v5 = vld [vmem:[%s8779_s3 + $0x160] ss:$8 sps:$4 sm:$0xff]  }
 0x202   :  { %4693 = vmatprep.subr.bf16.mxu0 %v6177_v13  ;;  %v6201_v13 = vld [vmem:[%s8779_s3 + $0x174] ss:$8 sps:$4 sm:$0xff]  }
 0x203   :  { %3800 = vmatpush1.bf16.msra.mxu1 %v5736_v31  ;;  %v5800_v31 = vcombine.low %v524_v36, %v528_v28  ;;  %v6222_v36 = vld [vmem:[%s8779_s3 + $0x1e4] ss:$8 sps:$4 sm:$0xff]   ;;  %v588_v28 = vld [vmem:[%s8777_s1 + $0xfd8] sm:$0xff] }
 0x204   :  { %3810 = vmatprep.subr.bf16.mxu1 %v5745_v49  ;;  %v6199_v49 = vld [vmem:[%s8779_s3 + $0x170] ss:$8 sps:$4 sm:$0xff]  }
 0x205   :  { %4694 = vmatpush1.bf16.msra.mxu0 %v6175_v48 }
 0x206   :  { %4704 = vmatprep.subr.bf16.mxu0 %v6180_v50  ;;  %3802 = vmatmul.mubr.bf16.vlgmr.msra.gmra.mrb[8].mxu1 %v6951_v57  ;;  %v496_v57 = vld [vmem:[%s8777_s1 + $0xcf8] sm:$0xff] }
 0x207   :  { %3811 = vmatpush1.bf16.msra.mxu1 %v5744_v55  ;;  %3842 = vmatprep.mubr.bf16.mxu1 %v6965_v1  ;;  %v5769_v9 = vcombine.high %v492_v3, %v496_v57  ;;  %v504_v1 = vld [vmem:[%s8777_s1 + $0xd38] sm:$0xff]  ;;  %v5768_v38 = vcombine.low %v492_v3, %v496_v57 }
 0x208   :  { %4696 = vmatmul.mubr.bf16.vlgmr.msra.gmra.mrb[8].mxu0 %v3875_v16  ;;  %3812 = vmatprep.subr.bf16.mxu1 %v5753_v58  ;;  %v5777_v15 = vcombine.high %v500_v12, %v504_v1  ;;  %v5776_v35 = vcombine.low %v500_v12, %v504_v1  ;;  %v544_v55 = vld [vmem:[%s8777_s1 + $0xe78] sm:$0xff]  ;;  %v6202_v58 = vld [vmem:[%s8779_s3 + $0x180] ss:$8 sps:$4 sm:$0xff]  }
 0x209   :  { %4705 = vmatpush1.bf16.msra.mxu0 %v6178_v56  ;;  %v5808_v56 = vcombine.low %v532_v46, %v536_v47  ;;  %v5817_v16 = vcombine.high %v540_v54, %v544_v55  ;;  %v556_v3 = vld [vmem:[%s8777_s1 + $0xed8] sm:$0xff]  ;;  %v6226_v46 = vld [vmem:[%s8779_s3 + $0x200] ss:$8 sps:$4 sm:$0xff]  }
 0x20a   :  { %4706 = vmatprep.subr.bf16.mxu0 %v6183_v59  ;;  %v6207_v59 = vld [vmem:[%s8779_s3 + $0x194] ss:$8 sps:$4 sm:$0xff]  }
 0x20b   :  { %3813 = vmatpush1.bf16.msra.mxu1 %v5752_v61  ;;  %v5816_v61 = vcombine.low %v540_v54, %v544_v55  ;;  %v560_v57 = vld [vmem:[%s8777_s1 + $0xef8] sm:$0xff]  ;;  %v6238_v54 = vld [vmem:[%s8779_s3 + $0x240] ss:$8 sps:$4 sm:$0xff]  }
 0x20c   :  { %3814 = vmatprep.subr.bf16.mxu1 %v5761_v21  ;;  %v5825_v21 = vcombine.high %v548_v60, %v552_v11  ;;  %v564_v12 = vld [vmem:[%s8777_s1 + $0xf18] sm:$0xff] }
 0x20d   :  { %4707 = vmatpush1.bf16.msra.mxu0 %v6181_v62  ;;  %v6205_v62 = vld [vmem:[%s8779_s3 + $0x190] ss:$8 sps:$4 sm:$0xff]   ;;  %v6243_v55 = vld [vmem:[%s8779_s3 + $0x254] ss:$8 sps:$4 sm:$0xff]  }
 0x20e   :  { %4708 = vmatprep.subr.bf16.mxu0 %v6186_v2  ;;  %v6210_v2 = vld [vmem:[%s8779_s3 + $0x1a4] ss:$8 sps:$4 sm:$0xff]   ;;  %v568_v1 = vld [vmem:[%s8777_s1 + $0xf38] sm:$0xff] }
 0x20f   :  { %3815 = vmatpush1.bf16.msra.mxu1 %v5760_v7  ;;  %v5824_v7 = vcombine.low %v548_v60, %v552_v11  ;;  %v6247_v60 = vld [vmem:[%s8779_s3 + $0x270] ss:$8 sps:$4 sm:$0xff]   ;;  %v6252_v11 = vld [vmem:[%s8779_s3 + $0x284] ss:$8 sps:$4 sm:$0xff]  }
 0x210   :  { %3816 = vmatprep.subr.bf16.mxu1 %v5769_v9  ;;  %v5833_v9 = vcombine.high %v556_v3, %v560_v57 }
 0x211   :  { %4709 = vmatpush1.bf16.msra.mxu0 %v6184_v8  ;;  %v6208_v8 = vld [vmem:[%s8779_s3 + $0x1a0] ss:$8 sps:$4 sm:$0xff]  }
 0x212   :  { %4710 = vmatprep.subr.bf16.mxu0 %v6189_v10  ;;  %v6213_v10 = vld [vmem:[%s8779_s3 + $0x1b4] ss:$8 sps:$4 sm:$0xff]  }
 0x213   :  { %3817 = vmatpush1.bf16.msra.mxu1 %v5768_v38  ;;  %v5832_v38 = vcombine.low %v556_v3, %v560_v57  ;;  %v6256_v3 = vld [vmem:[%s8779_s3 + $0x2a0] ss:$8 sps:$4 sm:$0xff]   ;;  %v6261_v57 = vld [vmem:[%s8779_s3 + $0x2b4] ss:$8 sps:$4 sm:$0xff]  }
 0x214   :  { %3818 = vmatprep.subr.bf16.mxu1 %v5777_v15  ;;  %v5841_v15 = vcombine.high %v564_v12, %v568_v1 }
 0x215   :  { %4711 = vmatpush1.bf16.msra.mxu0 %v6187_v14  ;;  %v6211_v14 = vld [vmem:[%s8779_s3 + $0x1b0] ss:$8 sps:$4 sm:$0xff]  }
 0x216   :  { %4712 = vmatprep.subr.bf16.mxu0 %v6192_v17  ;;  %v6216_v17 = vld [vmem:[%s8779_s3 + $0x1c4] ss:$8 sps:$4 sm:$0xff]  }
 0x217   :  { %3819 = vmatpush1.bf16.msra.mxu1 %v5776_v35  ;;  %v605_v35 = vsub.s32 2, %v6551_v44 }
 0x218   :  { %3820 = vmatprep.subr.bf16.mxu1 %v5785_v24  ;;  %v6214_v24 = vld [vmem:[%s8779_s3 + $0x1c0] ss:$8 sps:$4 sm:$0xff]  }
 0x219   :  { %4713 = vmatpush1.bf16.msra.mxu0 %v6190_v23  ;;  %v8225_v32 = vpop.f32.mrb[4].mxu1  ;;  %v5840_v23 = vcombine.low %v564_v12, %v568_v1  ;;  %v6265_v12 = vld [vmem:[%s8779_s3 + $0x2d0] ss:$8 sps:$4 sm:$0xff]   ;;  %v6270_v1 = vld [vmem:[%s8779_s3 + $0x2e4] ss:$8 sps:$4 sm:$0xff]  }
 0x21a   :  { %4714 = vmatprep.subr.bf16.mxu0 %v6195_v25  ;;  %v3518_v37 = vpop.f32.mrb[5].mxu1  ;;  %v5849_v25 = vcombine.high %v572_v19, %v576_v20 }
 0x21b   :  { %v6063_v63 = vadd.f32 %v3518_v37, %v610_v41  ;;  %v3520_v39 = vpop.f32.mrb[6].mxu1  ;;  %3821 = vmatpush1.bf16.msra.mxu1 %v5784_v27  ;;  %v584_v41 = vld [vmem:[%s8777_s1 + $0xfb8] sm:$0xff]  ;;  %v606_v27 = vrot.slane %v7799_v4, %v605_v35 }
 0x21c   :  { %v3521_v33 = vpop.f32.mrb[7].mxu1  ;;  %3822 = vmatprep.subr.bf16.mxu1 %v5793_v30  ;;  %v6217_v30 = vld [vmem:[%s8779_s3 + $0x1d0] ss:$8 sps:$4 sm:$0xff]   ;;  %v6220_v39 = vld [vmem:[%s8779_s3 + $0x1e0] ss:$8 sps:$4 sm:$0xff]  }
 0x21d   :  { %4715 = vmatpush1.bf16.msra.mxu0 %v6193_v29  ;;  %vm3854_vm2 = vcmp.gt.f32.partialorder %v6063_v63, 0.0  ;;  %v3862_v43 = vmul.f32 0.01, %v6063_v63  ;;  %v5848_v29 = vcombine.low %v572_v19, %v576_v20  ;;  %v592_v4 = vld [vmem:[%s8777_s1 + $0xff8] sm:$0xff]  ;;  %v6062_v37 = vadd.f32 %v8225_v32, %v606_v27 }
 0x21e   :  { %4716 = vmatprep.subr.bf16.mxu0 %v6198_v34  ;;  %v5857_v34 = vcombine.high %v580_v26, %v584_v41  ;;  %v6225_v33 = vld [vmem:[%s8779_s3 + $0x1f4] ss:$8 sps:$4 sm:$0xff]   ;;  %v6223_v32 = vld [vmem:[%s8779_s3 + $0x1f0] ss:$8 sps:$4 sm:$0xff]   ;;  %v613_v19 = vsub.s32 4, %v6551_v44  ;;  %v617_v20 = vsub.s32 5, %v6551_v44 }
 0x21f   :  { %3823 = vmatpush1.bf16.msra.mxu1 %v5792_v40  ;;  %v3870_v48 = vsel %vm3854_vm2, %v6063_v63, %v3862_v43  ;;  %v5856_v63 = vcombine.low %v580_v26, %v584_v41  ;;  %v5865_v40 = vcombine.high %v588_v28, %v592_v4  ;;  %vm3853_vm3 = vcmp.gt.f32.partialorder %v6062_v37, 0.0 }
 0x220   :  { %3824 = vmatprep.subr.bf16.mxu1 %v5801_v42  ;;  %v3878_v50 = vpack.c.bf16 %v3870_v48, %v3870_v48  ;;  %v5864_v42 = vcombine.low %v588_v28, %v592_v4  ;;  %v6229_v48 = vld [vmem:[%s8779_s3 + $0x210] ss:$8 sps:$4 sm:$0xff]  }
 0x221   :  { %4717 = vmatpush1.bf16.msra.mxu0 %v6196_v5  ;;  %v3861_v5 = vmul.f32 0.01, %v6062_v37 }
 0x222   :  { %4718 = vmatprep.subr.bf16.mxu0 %v6201_v13  ;;  %4736 = vmatprep.mubr.bf16.mxu0 %v3878_v50  ;;  %v6228_v13 = vld [vmem:[%s8779_s3 + $0x204] ss:$8 sps:$4 sm:$0xff]   ;;  %v6232_v50 = vld [vmem:[%s8779_s3 + $0x220] ss:$8 sps:$4 sm:$0xff]  }
 0x223   :  { %3825 = vmatpush1.bf16.msra.mxu1 %v5800_v31  ;;  %v3869_v43 = vsel %vm3853_vm3, %v6062_v37, %v3861_v5  ;;  %v6231_v31 = vld [vmem:[%s8779_s3 + $0x214] ss:$8 sps:$4 sm:$0xff]  }
 0x224   :  { %3826 = vmatprep.subr.bf16.mxu1 %v5809_v51  ;;  %v3877_v47 = vpack.c.bf16 %v3869_v43, %v3869_v43  ;;  %v6235_v51 = vld [vmem:[%s8779_s3 + $0x230] ss:$8 sps:$4 sm:$0xff]   ;;  %v6324_v5 = vld [vmem:[%s8781_s5 + $0x4] ss:$16 sps:$4 sm:$0xff]  }
 0x225   :  { %4719 = vmatpush1.bf16.msra.mxu0 %v6199_v49  ;;  %v6234_v49 = vld [vmem:[%s8779_s3 + $0x224] ss:$8 sps:$4 sm:$0xff]   ;;  %v6325_v43 = vld [vmem:[%s8781_s5 + $0x20] ss:$16 sps:$4 sm:$0xff]  }
 0x226   :  { %4720 = vmatprep.subr.bf16.mxu0 %v6204_v52  ;;  %v6240_v52 = vld [vmem:[%s8779_s3 + $0x244] ss:$8 sps:$4 sm:$0xff]  }
 0x227   :  { %3827 = vmatpush1.bf16.msra.mxu1 %v5808_v56  ;;  %v6241_v56 = vld [vmem:[%s8779_s3 + $0x250] ss:$8 sps:$4 sm:$0xff]  }
 0x228   :  { %3828 = vmatprep.subr.bf16.mxu1 %v5817_v16  ;;  %v6244_v16 = vld [vmem:[%s8779_s3 + $0x260] ss:$8 sps:$4 sm:$0xff]  }
 0x229   :  { %4721 = vmatpush1.bf16.msra.mxu0 %v6202_v58  ;;  %v6246_v58 = vld [vmem:[%s8779_s3 + $0x264] ss:$8 sps:$4 sm:$0xff]  }
 0x22a   :  { %4722 = vmatprep.subr.bf16.mxu0 %v6207_v59  ;;  %v6249_v59 = vld [vmem:[%s8779_s3 + $0x274] ss:$8 sps:$4 sm:$0xff]  }
 0x22b   :  { %3829 = vmatpush1.bf16.msra.mxu1 %v5816_v61  ;;  %v6250_v61 = vld [vmem:[%s8779_s3 + $0x280] ss:$8 sps:$4 sm:$0xff]  }
 0x22c   :  { %3830 = vmatprep.subr.bf16.mxu1 %v5825_v21  ;;  %v6253_v21 = vld [vmem:[%s8779_s3 + $0x290] ss:$8 sps:$4 sm:$0xff]  }
 0x22d   :  { %4723 = vmatpush1.bf16.msra.mxu0 %v6205_v62  ;;  %v6255_v62 = vld [vmem:[%s8779_s3 + $0x294] ss:$8 sps:$4 sm:$0xff]  }
 0x22e   :  { %4724 = vmatprep.subr.bf16.mxu0 %v6210_v2  ;;  %v6258_v2 = vld [vmem:[%s8779_s3 + $0x2a4] ss:$8 sps:$4 sm:$0xff]  }
 0x22f   :  { %3831 = vmatpush1.bf16.msra.mxu1 %v5824_v7  ;;  %v6259_v7 = vld [vmem:[%s8779_s3 + $0x2b0] ss:$8 sps:$4 sm:$0xff]  }
 0x230   :  { %3832 = vmatprep.subr.bf16.mxu1 %v5833_v9  ;;  %v6262_v9 = vld [vmem:[%s8779_s3 + $0x2c0] ss:$8 sps:$4 sm:$0xff]  }
 0x231   :  { %4725 = vmatpush1.bf16.msra.mxu0 %v6208_v8  ;;  %v6264_v8 = vld [vmem:[%s8779_s3 + $0x2c4] ss:$8 sps:$4 sm:$0xff]  }
 0x232   :  { %4726 = vmatprep.subr.bf16.mxu0 %v6213_v10  ;;  %v6267_v10 = vld [vmem:[%s8779_s3 + $0x2d4] ss:$8 sps:$4 sm:$0xff]  }
 0x233   :  { %3833 = vmatpush1.bf16.msra.mxu1 %v5832_v38  ;;  %v6268_v38 = vld [vmem:[%s8779_s3 + $0x2e0] ss:$8 sps:$4 sm:$0xff]  }
 0x234   :  { %3834 = vmatprep.subr.bf16.mxu1 %v5841_v15  ;;  %v6271_v15 = vld [vmem:[%s8779_s3 + $0x2f0] ss:$8 sps:$4 sm:$0xff]  }
 0x235   :  { %4727 = vmatpush1.bf16.msra.mxu0 %v6211_v14  ;;  %v6273_v14 = vld [vmem:[%s8779_s3 + $0x2f4] ss:$8 sps:$4 sm:$0xff]  }
 0x236   :  { %4728 = vmatprep.subr.bf16.mxu0 %v6216_v17  ;;  %v6276_v17 = vld [vmem:[%s8779_s3 + $0x304] ss:$8 sps:$4 sm:$0xff]  }
 0x237   :  { %3835 = vmatpush1.bf16.msra.mxu1 %v5840_v23  ;;  %v8451_v23 = vld [vmem:[%s8778_s2] sm:$0xff] }
 0x238   :  { %3836 = vmatprep.subr.bf16.mxu1 %v5849_v25  ;;  %v618_v25 = vrot.slane %v8451_v23, %v617_v20  ;;  %v6309_v20 = vld [vmem:[%s8779_s3 + $0x3b4] ss:$8 sps:$4 sm:$0xff]  }
 0x239   :  { %4729 = vmatpush1.bf16.msra.mxu0 %v6214_v24  ;;  %v614_v24 = vrot.slane %v8451_v23, %v613_v19  ;;  %v6304_v19 = vld [vmem:[%s8779_s3 + $0x3a0] ss:$8 sps:$4 sm:$0xff]  }
 0x23a   :  { %4730 = vmatprep.subr.bf16.mxu0 %v6219_v45 }
 0x23b   :  { %3837 = vmatpush1.bf16.msra.mxu1 %v5848_v29 }
 0x23c   :  { %3838 = vmatprep.subr.bf16.mxu1 %v5857_v34 }
 0x23d   :  { %4731 = vmatpush1.bf16.msra.mxu0 %v6217_v30 }
 0x23e   :  { %4732 = vmatprep.subr.bf16.mxu0 %v6222_v36 }
 0x23f   :  { %3839 = vmatpush1.bf16.msra.mxu1 %v5856_v63  ;;  %v6274_v63 = vld [vmem:[%s8779_s3 + $0x300] ss:$8 sps:$4 sm:$0xff]  }
 0x240   :  { %3840 = vmatprep.subr.bf16.mxu1 %v5865_v40  ;;  %v6279_v40 = vld [vmem:[%s8779_s3 + $0x314] ss:$8 sps:$4 sm:$0xff]  }
 0x241   :  { %4733 = vmatpush1.bf16.msra.mxu0 %v6220_v39 }
 0x242   :  { %4734 = vmatprep.subr.bf16.mxu0 %v6225_v33  ;;  %v6322_v33 = vld [vmem:[%s8781_s5] ss:$16 sps:$4 sm:$0xff]  }
 0x243   :  { %3841 = vmatpush1.bf16.msra.mxu1 %v5864_v42  ;;  %v6327_v42 = vld [vmem:[%s8781_s5 + $0x24] ss:$16 sps:$4 sm:$0xff]  }
 0x244   :  { %5235 = vmatprep.subr.bf16.mxu1 %v6324_v5  ;;  %v6319_v5 = vld [vmem:[%s8779_s3 + $0x3f0] ss:$8 sps:$4 sm:$0xff]  }
 0x245   :  { %4735 = vmatpush1.bf16.msra.mxu0 %v6223_v32  ;;  %v6277_v32 = vld [vmem:[%s8779_s3 + $0x310] ss:$8 sps:$4 sm:$0xff]  }
 0x246   :  { %4745 = vmatprep.subr.bf16.mxu0 %v6228_v13  ;;  %3843 = vmatmul.mubr.bf16.vlgmr.msra.gmra.mrb[8].mxu1 %v7153_v18  ;;  %v6237_v18 = vld [vmem:[%s8779_s3 + $0x234] ss:$8 sps:$4 sm:$0xff]   ;;  %v6282_v13 = vld [vmem:[%s8779_s3 + $0x324] ss:$8 sps:$4 sm:$0xff]  }
 0x247   :  { %5236 = vmatpush1.bf16.msra.mxu1 %v6322_v33  ;;  %v6364_v33 = vld [vmem:[%s8781_s5 + $0x1c0] ss:$16 sps:$4 sm:$0xff]  }
 0x248   :  { %4737 = vmatmul.mubr.bf16.vlgmr.msra.gmra.mrb[8].mxu0 %v3877_v47  ;;  %5237 = vmatprep.subr.bf16.mxu1 %v6327_v42  ;;  %v6280_v47 = vld [vmem:[%s8779_s3 + $0x320] ss:$8 sps:$4 sm:$0xff]   ;;  %v621_v42 = vsub.s32 6, %v6551_v44 }
 0x249   :  { %4746 = vmatpush1.bf16.msra.mxu0 %v6226_v46  ;;  %v6330_v46 = vld [vmem:[%s8781_s5 + $0x44] ss:$16 sps:$4 sm:$0xff]  }
 0x24a   :  { %4747 = vmatprep.subr.bf16.mxu0 %v6231_v31  ;;  %v6285_v31 = vld [vmem:[%s8779_s3 + $0x334] ss:$8 sps:$4 sm:$0xff]  }
 0x24b   :  { %5238 = vmatpush1.bf16.msra.mxu1 %v6325_v43 }
 0x24c   :  { %5239 = vmatprep.subr.bf16.mxu1 %v6330_v46 }
 0x24d   :  { %4748 = vmatpush1.bf16.msra.mxu0 %v6229_v48  ;;  %v6328_v48 = vld [vmem:[%s8781_s5 + $0x40] ss:$16 sps:$4 sm:$0xff]  }
 0x24e   :  { %4749 = vmatprep.subr.bf16.mxu0 %v6234_v49  ;;  %v6333_v49 = vld [vmem:[%s8781_s5 + $0x64] ss:$16 sps:$4 sm:$0xff]  }
 0x24f   :  { %5240 = vmatpush1.bf16.msra.mxu1 %v6328_v48 }
 0x250   :  { %5241 = vmatprep.subr.bf16.mxu1 %v6333_v49 }
 0x251   :  { %4750 = vmatpush1.bf16.msra.mxu0 %v6232_v50  ;;  %v6283_v50 = vld [vmem:[%s8779_s3 + $0x330] ss:$8 sps:$4 sm:$0xff]  }
 0x252   :  { %4751 = vmatprep.subr.bf16.mxu0 %v6237_v18  ;;  %v6288_v18 = vld [vmem:[%s8779_s3 + $0x344] ss:$8 sps:$4 sm:$0xff]  }
 0x255   :  { %4752 = vmatpush1.bf16.msra.mxu0 %v6235_v51  ;;  %v6331_v51 = vld [vmem:[%s8781_s5 + $0x60] ss:$16 sps:$4 sm:$0xff]  }
 0x256   :  { %4753 = vmatprep.subr.bf16.mxu0 %v6240_v52  ;;  %v6336_v52 = vld [vmem:[%s8781_s5 + $0x84] ss:$16 sps:$4 sm:$0xff]   ;;  %5242 = vmatpush1.bf16.msra.mxu1 %v6331_v51 }
 0x257   :  { %5243 = vmatprep.subr.bf16.mxu1 %v6336_v52 }
 0x259   :  { %4754 = vmatpush1.bf16.msra.mxu0 %v6238_v54  ;;  %v6286_v54 = vld [vmem:[%s8779_s3 + $0x340] ss:$8 sps:$4 sm:$0xff]  }
 0x25a   :  { %4755 = vmatprep.subr.bf16.mxu0 %v6243_v55  ;;  %v6291_v55 = vld [vmem:[%s8779_s3 + $0x354] ss:$8 sps:$4 sm:$0xff]  }
 0x25d   :  { %4756 = vmatpush1.bf16.msra.mxu0 %v6241_v56  ;;  %v6334_v56 = vld [vmem:[%s8781_s5 + $0x80] ss:$16 sps:$4 sm:$0xff]  }
 0x25e   :  { %4757 = vmatprep.subr.bf16.mxu0 %v6246_v58  ;;  %v6339_v58 = vld [vmem:[%s8781_s5 + $0xa4] ss:$16 sps:$4 sm:$0xff]   ;;  %5244 = vmatpush1.bf16.msra.mxu1 %v6334_v56 }
 0x25f   :  { %5245 = vmatprep.subr.bf16.mxu1 %v6339_v58  ;;  %v6367_v58 = vld [vmem:[%s8781_s5 + $0x1e0] ss:$16 sps:$4 sm:$0xff]  }
 0x261   :  { %4758 = vmatpush1.bf16.msra.mxu0 %v6244_v16  ;;  %v6289_v16 = vld [vmem:[%s8779_s3 + $0x350] ss:$8 sps:$4 sm:$0xff]  }
 0x262   :  { %4759 = vmatprep.subr.bf16.mxu0 %v6249_v59  ;;  %v6294_v59 = vld [vmem:[%s8779_s3 + $0x364] ss:$8 sps:$4 sm:$0xff]  }
 0x265   :  { %4760 = vmatpush1.bf16.msra.mxu0 %v6247_v60  ;;  %v6337_v60 = vld [vmem:[%s8781_s5 + $0xa0] ss:$16 sps:$4 sm:$0xff]  }
 0x266   :  { %4761 = vmatprep.subr.bf16.mxu0 %v6252_v11  ;;  %v6342_v11 = vld [vmem:[%s8781_s5 + $0xc4] ss:$16 sps:$4 sm:$0xff]   ;;  %5246 = vmatpush1.bf16.msra.mxu1 %v6337_v60 }
 0x267   :  { %5247 = vmatprep.subr.bf16.mxu1 %v6342_v11 }
 0x269   :  { %4762 = vmatpush1.bf16.msra.mxu0 %v6250_v61  ;;  %v6292_v61 = vld [vmem:[%s8779_s3 + $0x360] ss:$8 sps:$4 sm:$0xff]  }
 0x26a   :  { %4763 = vmatprep.subr.bf16.mxu0 %v6255_v62  ;;  %v6297_v62 = vld [vmem:[%s8779_s3 + $0x374] ss:$8 sps:$4 sm:$0xff]  }
 0x26d   :  { %4764 = vmatpush1.bf16.msra.mxu0 %v6253_v21  ;;  %v6340_v21 = vld [vmem:[%s8781_s5 + $0xc0] ss:$16 sps:$4 sm:$0xff]  }
 0x26e   :  { %4765 = vmatprep.subr.bf16.mxu0 %v6258_v2  ;;  %v6345_v2 = vld [vmem:[%s8781_s5 + $0xe4] ss:$16 sps:$4 sm:$0xff]   ;;  %5248 = vmatpush1.bf16.msra.mxu1 %v6340_v21 }
 0x26f   :  { %5249 = vmatprep.subr.bf16.mxu1 %v6345_v2 }
 0x271   :  { %4766 = vmatpush1.bf16.msra.mxu0 %v6256_v3  ;;  %v6295_v3 = vld [vmem:[%s8779_s3 + $0x370] ss:$8 sps:$4 sm:$0xff]  }
 0x272   :  { %4767 = vmatprep.subr.bf16.mxu0 %v6261_v57  ;;  %v6300_v57 = vld [vmem:[%s8779_s3 + $0x384] ss:$8 sps:$4 sm:$0xff]  }
 0x275   :  { %4768 = vmatpush1.bf16.msra.mxu0 %v6259_v7  ;;  %v6343_v7 = vld [vmem:[%s8781_s5 + $0xe0] ss:$16 sps:$4 sm:$0xff]  }
 0x276   :  { %4769 = vmatprep.subr.bf16.mxu0 %v6264_v8  ;;  %v6348_v8 = vld [vmem:[%s8781_s5 + $0x104] ss:$16 sps:$4 sm:$0xff]   ;;  %5250 = vmatpush1.bf16.msra.mxu1 %v6343_v7 }
 0x277   :  { %5251 = vmatprep.subr.bf16.mxu1 %v6348_v8  ;;  %v6370_v8 = vld [vmem:[%s8781_s5 + $0x8] ss:$16 sps:$4 sm:$0xff]  }
 0x279   :  { %4770 = vmatpush1.bf16.msra.mxu0 %v6262_v9  ;;  %v6298_v9 = vld [vmem:[%s8779_s3 + $0x380] ss:$8 sps:$4 sm:$0xff]  }
 0x27a   :  { %4771 = vmatprep.subr.bf16.mxu0 %v6267_v10  ;;  %v6303_v10 = vld [vmem:[%s8779_s3 + $0x394] ss:$8 sps:$4 sm:$0xff]  }
 0x27d   :  { %4772 = vmatpush1.bf16.msra.mxu0 %v6265_v12  ;;  %v6346_v12 = vld [vmem:[%s8781_s5 + $0x100] ss:$16 sps:$4 sm:$0xff]  }
 0x27e   :  { %4773 = vmatprep.subr.bf16.mxu0 %v6270_v1  ;;  %v6351_v1 = vld [vmem:[%s8781_s5 + $0x124] ss:$16 sps:$4 sm:$0xff]   ;;  %5252 = vmatpush1.bf16.msra.mxu1 %v6346_v12  ;;  %v6373_v12 = vld [vmem:[%s8781_s5 + $0x28] ss:$16 sps:$4 sm:$0xff]  }
 0x27f   :  { %5253 = vmatprep.subr.bf16.mxu1 %v6351_v1  ;;  %v6378_v1 = vld [vmem:[%s8781_s5 + $0x4c] ss:$16 sps:$4 sm:$0xff]  }
 0x281   :  { %4774 = vmatpush1.bf16.msra.mxu0 %v6268_v38  ;;  %v6301_v38 = vld [vmem:[%s8779_s3 + $0x390] ss:$8 sps:$4 sm:$0xff]  }
 0x282   :  { %4775 = vmatprep.subr.bf16.mxu0 %v6273_v14  ;;  %v6306_v14 = vld [vmem:[%s8779_s3 + $0x3a4] ss:$8 sps:$4 sm:$0xff]  }
 0x285   :  { %4776 = vmatpush1.bf16.msra.mxu0 %v6271_v15  ;;  %v6349_v15 = vld [vmem:[%s8781_s5 + $0x120] ss:$16 sps:$4 sm:$0xff]  }
 0x286   :  { %4786 = vmatprep.subr.bf16.mxu0 %v6276_v17  ;;  %v6354_v17 = vld [vmem:[%s8781_s5 + $0x144] ss:$16 sps:$4 sm:$0xff]   ;;  %5254 = vmatpush1.bf16.msra.mxu1 %v6349_v15  ;;  %v6379_v15 = vld [vmem:[%s8781_s5 + $0x68] ss:$16 sps:$4 sm:$0xff]  }
 0x287   :  { %5255 = vmatprep.subr.bf16.mxu1 %v6354_v17  ;;  %v6384_v17 = vld [vmem:[%s8781_s5 + $0x8c] ss:$16 sps:$4 sm:$0xff]  }
 0x29b   :  { %v3680_v45 = vpop.f32.mrb[4].mxu0 }
 0x29c   :  { %v6064_v26 = vadd.f32 %v3680_v45, %v614_v24  ;;  %v3682_v41 = vpop.f32.mrb[5].mxu0  ;;  %v6352_v24 = vld [vmem:[%s8781_s5 + $0x140] ss:$16 sps:$4 sm:$0xff]  }
 0x29d   :  { %v6065_v27 = vadd.f32 %v3682_v41, %v618_v25  ;;  %v3684_v29 = vpop.f32.mrb[6].mxu0  ;;  %v6357_v25 = vld [vmem:[%s8781_s5 + $0x164] ss:$16 sps:$4 sm:$0xff]   ;;  %v6307_v45 = vld [vmem:[%s8779_s3 + $0x3b0] ss:$8 sps:$4 sm:$0xff]   ;;  %5256 = vmatpush1.bf16.msra.mxu1 %v6352_v24 }
 0x29e   :  { %vm3855_vm4 = vcmp.gt.f32.partialorder %v6064_v26, 0.0  ;;  %v3863_v30 = vmul.f32 0.01, %v6064_v26  ;;  %v3685_v34 = vpop.f32.mrb[7].mxu0  ;;  %v6355_v41 = vld [vmem:[%s8781_s5 + $0x160] ss:$16 sps:$4 sm:$0xff]   ;;  %5257 = vmatprep.subr.bf16.mxu1 %v6357_v25 }
 0x29f   :  { %vm3856_vm5 = vcmp.gt.f32.partialorder %v6065_v27, 0.0  ;;  %v3864_v36 = vmul.f32 0.01, %v6065_v27  ;;  %v6310_v29 = vld [vmem:[%s8779_s3 + $0x3c0] ss:$8 sps:$4 sm:$0xff]  }
 0x2a0   :  { %v3871_v28 = vsel %vm3855_vm4, %v6064_v26, %v3863_v30  ;;  %v6312_v26 = vld [vmem:[%s8779_s3 + $0x3c4] ss:$8 sps:$4 sm:$0xff]   ;;  %v6315_v30 = vld [vmem:[%s8779_s3 + $0x3d4] ss:$8 sps:$4 sm:$0xff]   ;;  %v6358_v34 = vld [vmem:[%s8781_s5 + $0x180] ss:$16 sps:$4 sm:$0xff]  }
 0x2a1   :  { %v3872_v4 = vsel %vm3856_vm5, %v6065_v27, %v3864_v36  ;;  %v3879_v39 = vpack.c.bf16 %v3871_v28, %v3871_v28  ;;  %v6360_v27 = vld [vmem:[%s8781_s5 + $0x184] ss:$16 sps:$4 sm:$0xff]   ;;  %5258 = vmatpush1.bf16.msra.mxu1 %v6355_v41  ;;  %v6313_v28 = vld [vmem:[%s8779_s3 + $0x3d0] ss:$8 sps:$4 sm:$0xff]   ;;  %v6390_v25 = vld [vmem:[%s8781_s5 + $0xcc] ss:$16 sps:$4 sm:$0xff]  }
 0x2a2   :  { %v3880_v37 = vpack.c.bf16 %v3872_v4, %v3872_v4  ;;  %5259 = vmatprep.subr.bf16.mxu1 %v6360_v27  ;;  %v6363_v36 = vld [vmem:[%s8781_s5 + $0x1a4] ss:$16 sps:$4 sm:$0xff]   ;;  %v6385_v24 = vld [vmem:[%s8781_s5 + $0xa8] ss:$16 sps:$4 sm:$0xff]   ;;  %v6396_v27 = vld [vmem:[%s8781_s5 + $0x10c] ss:$16 sps:$4 sm:$0xff]  }
 0x2a3   :  { %v6318_v4 = vld [vmem:[%s8779_s3 + $0x3e4] ss:$8 sps:$4 sm:$0xff]   ;;  %v6391_v41 = vld [vmem:[%s8781_s5 + $0xe8] ss:$16 sps:$4 sm:$0xff]  }
 0x2a4   :  { %4777 = vmatprep.mubr.bf16.mxu0 %v3880_v37  ;;  %v6361_v37 = vld [vmem:[%s8781_s5 + $0x1a0] ss:$16 sps:$4 sm:$0xff]  }
 0x2a5   :  { %4778 = vmatmul.mubr.bf16.vlgmr.msra.gmra.mrb[8].mxu0 %v3879_v39  ;;  %5260 = vmatpush1.bf16.msra.mxu1 %v6358_v34  ;;  %v6316_v39 = vld [vmem:[%s8779_s3 + $0x3e0] ss:$8 sps:$4 sm:$0xff]  }
 0x2a6   :  { %4787 = vmatpush1.bf16.msra.mxu0 %v6274_v63  ;;  %5261 = vmatprep.subr.bf16.mxu1 %v6363_v36  ;;  %v6366_v63 = vld [vmem:[%s8781_s5 + $0x1c4] ss:$16 sps:$4 sm:$0xff]   ;;  %v6397_v34 = vld [vmem:[%s8781_s5 + $0x128] ss:$16 sps:$4 sm:$0xff]   ;;  %v6402_v36 = vld [vmem:[%s8781_s5 + $0x14c] ss:$16 sps:$4 sm:$0xff]  }
 0x2a7   :  { %4788 = vmatprep.subr.bf16.mxu0 %v6279_v40  ;;  %v6321_v40 = vld [vmem:[%s8779_s3 + $0x3f4] ss:$8 sps:$4 sm:$0xff]  }
 0x2a9   :  { %5262 = vmatpush1.bf16.msra.mxu1 %v6361_v37  ;;  %v6403_v37 = vld [vmem:[%s8781_s5 + $0x168] ss:$16 sps:$4 sm:$0xff]  }
 0x2aa   :  { %4789 = vmatpush1.bf16.msra.mxu0 %v6277_v32  ;;  %5263 = vmatprep.subr.bf16.mxu1 %v6366_v63  ;;  %v625_v32 = vsub.s32 7, %v6551_v44  ;;  %v6408_v63 = vld [vmem:[%s8781_s5 + $0x18c] ss:$16 sps:$4 sm:$0xff]  }
 0x2ab   :  { %4790 = vmatprep.subr.bf16.mxu0 %v6282_v13  ;;  %v622_v13 = vrot.slane %v8451_v23, %v621_v42  ;;  %v6412_v42 = vld [vmem:[%s8781_s5 + $0x1c8] ss:$16 sps:$4 sm:$0xff]  }
 0x2ac   :  { %v626_v43 = vrot.slane %v8451_v23, %v625_v32  ;;  %v6369_v23 = vld [vmem:[%s8781_s5 + $0x1e4] ss:$16 sps:$4 sm:$0xff]   ;;  %v6417_v32 = vld [vmem:[%s8781_s5 + $0x1ec] ss:$16 sps:$4 sm:$0xff]  }
 0x2ad   :  { %5264 = vmatpush1.bf16.msra.mxu1 %v6364_v33  ;;  %v6409_v33 = vld [vmem:[%s8781_s5 + $0x1a8] ss:$16 sps:$4 sm:$0xff]  }
 0x2ae   :  { %4791 = vmatpush1.bf16.msra.mxu0 %v6280_v47  ;;  %5265 = vmatprep.subr.bf16.mxu1 %v6369_v23 }
 0x2af   :  { %4792 = vmatprep.subr.bf16.mxu0 %v6285_v31 }
 0x2b1   :  { %5266 = vmatpush1.bf16.msra.mxu1 %v6367_v58 }
 0x2b2   :  { %4793 = vmatpush1.bf16.msra.mxu0 %v6283_v50 }
 0x2b3   :  { %4794 = vmatprep.subr.bf16.mxu0 %v6288_v18 }
 0x2b6   :  { %4795 = vmatpush1.bf16.msra.mxu0 %v6286_v54 }
 0x2b7   :  { %4796 = vmatprep.subr.bf16.mxu0 %v6291_v55 }
 0x2ba   :  { %4797 = vmatpush1.bf16.msra.mxu0 %v6289_v16  ;;  %v6372_v16 = vld [vmem:[%s8781_s5 + $0xc] ss:$16 sps:$4 sm:$0xff]  }
 0x2bb   :  { %4798 = vmatprep.subr.bf16.mxu0 %v6294_v59  ;;  %5276 = vmatprep.subr.bf16.mxu1 %v6372_v16  ;;  %v4011_v59 = vld [vmem:[%s8780_s4] sm:$0x3] }
 0x2bc   :  { %v4016_v60 = vrot.slane %v4011_v59, %v7788_v0  ;;  %v4020_v11 = vrot.slane %v4011_v59, %v7802_v6 }
 0x2be   :  { %4799 = vmatpush1.bf16.msra.mxu0 %v6292_v61 }
 0x2bf   :  { %4800 = vmatprep.subr.bf16.mxu0 %v6297_v62 }
 0x2c2   :  { %4801 = vmatpush1.bf16.msra.mxu0 %v6295_v3 }
 0x2c3   :  { %4802 = vmatprep.subr.bf16.mxu0 %v6300_v57 }
 0x2c6   :  { %4803 = vmatpush1.bf16.msra.mxu0 %v6298_v9 }
 0x2c7   :  { %4804 = vmatprep.subr.bf16.mxu0 %v6303_v10  ;;  %v6375_v10 = vld [vmem:[%s8781_s5 + $0x2c] ss:$16 sps:$4 sm:$0xff]  }
 0x2ca   :  { %4805 = vmatpush1.bf16.msra.mxu0 %v6301_v38  ;;  %v6376_v38 = vld [vmem:[%s8781_s5 + $0x48] ss:$16 sps:$4 sm:$0xff]  }
 0x2cb   :  { %4806 = vmatprep.subr.bf16.mxu0 %v6306_v14  ;;  %v6381_v14 = vld [vmem:[%s8781_s5 + $0x6c] ss:$16 sps:$4 sm:$0xff]  }
 0x2ce   :  { %4807 = vmatpush1.bf16.msra.mxu0 %v6304_v19  ;;  %v6382_v19 = vld [vmem:[%s8781_s5 + $0x88] ss:$16 sps:$4 sm:$0xff]  }
 0x2cf   :  { %4808 = vmatprep.subr.bf16.mxu0 %v6309_v20  ;;  %v6387_v20 = vld [vmem:[%s8781_s5 + $0xac] ss:$16 sps:$4 sm:$0xff]  }
 0x2d2   :  { %4809 = vmatpush1.bf16.msra.mxu0 %v6307_v45  ;;  %v6388_v45 = vld [vmem:[%s8781_s5 + $0xc8] ss:$16 sps:$4 sm:$0xff]  }
 0x2d3   :  { %4810 = vmatprep.subr.bf16.mxu0 %v6312_v26  ;;  %v6393_v26 = vld [vmem:[%s8781_s5 + $0xec] ss:$16 sps:$4 sm:$0xff]  }
 0x2d6   :  { %4811 = vmatpush1.bf16.msra.mxu0 %v6310_v29  ;;  %v6394_v29 = vld [vmem:[%s8781_s5 + $0x108] ss:$16 sps:$4 sm:$0xff]  }
 0x2d7   :  { %4812 = vmatprep.subr.bf16.mxu0 %v6315_v30  ;;  %v6399_v30 = vld [vmem:[%s8781_s5 + $0x12c] ss:$16 sps:$4 sm:$0xff]  }
 0x2da   :  { %4813 = vmatpush1.bf16.msra.mxu0 %v6313_v28  ;;  %v6400_v28 = vld [vmem:[%s8781_s5 + $0x148] ss:$16 sps:$4 sm:$0xff]  }
 0x2db   :  { %4814 = vmatprep.subr.bf16.mxu0 %v6318_v4  ;;  %v6405_v4 = vld [vmem:[%s8781_s5 + $0x16c] ss:$16 sps:$4 sm:$0xff]  }
 0x2de   :  { %4815 = vmatpush1.bf16.msra.mxu0 %v6316_v39  ;;  %v6406_v39 = vld [vmem:[%s8781_s5 + $0x188] ss:$16 sps:$4 sm:$0xff]  }
 0x2df   :  { %4816 = vmatprep.subr.bf16.mxu0 %v6321_v40  ;;  %v6411_v40 = vld [vmem:[%s8781_s5 + $0x1ac] ss:$16 sps:$4 sm:$0xff]  }
 0x2e2   :  { %4817 = vmatpush1.bf16.msra.mxu0 %v6319_v5  ;;  %v6414_v5 = vld [vmem:[%s8781_s5 + $0x1cc] ss:$16 sps:$4 sm:$0xff]  }
 0x319   :  { %v3844_v46 = vpop.f32.mrb[8].mxu1 }
 0x31a   :  { %v6066_v47 = vadd.f32 %v3844_v46, %v622_v13  ;;  %v3846_v31 = vpop.f32.mrb[9].mxu1  ;;  %v6415_v13 = vld [vmem:[%s8781_s5 + $0x1e8] ss:$16 sps:$4 sm:$0xff]   ;;  %s6444_s5 = smov [#allocation2]  }
 0x31b   :  { %v6067_v48 = vadd.f32 %v3846_v31, %v626_v43  ;;  %v3848_v49 = vpop.f32.mrb[10].mxu1  ;;  %v4893_v43 = vld [vmem:[%s8782_s6] sm:$0xf]  ;;  %s5346_s6 = sshll.u32 %s6444_s5, 4  ;;  %s5347_s6 = int_to_ptr.vmem [resolvable:$true] %s5346_s6 }
 0x31c   :  { %vm3857_vm6 = vcmp.gt.f32.partialorder %v6066_v47, 0.0  ;;  %v3865_v50 = vmul.f32 0.01, %v6066_v47  ;;  %v3849_v18 = vpop.f32.mrb[11].mxu1  ;;  %v4898_v46 = vrot.slane %v4893_v43, %v7788_v0  ;;  %s6419_s1 = scalar_lea.vmem %s5347_s6, 128  ;;  %p6424_p1 = scmp.lt.s32.totalorder %s5347_s6, %s5347_s6 }
 0x31d   :  { %vm3858_vm7 = vcmp.gt.f32.partialorder %v6067_v48, 0.0  ;;  %v3866_v51 = vmul.f32 0.01, %v6067_v48  ;;  %p6420_p0 = scmp.ne.s32.totalorder %s5347_s6, %s6419_s1  ;;  %p6425_p2 = scmp.lt.s32.totalorder %s6419_s1, %s6419_s1 }
 0x31e   :  { %v3873_v52 = vsel %vm3857_vm6, %v6066_v47, %v3865_v50  ;;  %v4902_v47 = vrot.slane %v4893_v43, %v7802_v6 }
 0x31f   :  { %v3874_v54 = vsel %vm3858_vm7, %v6067_v48, %v3866_v51  ;;  %v3881_v56 = vpack.c.bf16 %v3873_v52, %v3873_v52  ;;  %p6426_p3 = por %p6425_p2, %p6424_p1 }
 0x320   :  { %v3882_v55 = vpack.c.bf16 %v3874_v54, %v3874_v54  ;;  %v4906_v54 = vrot.slane %v4893_v43, %v605_v35 }
 0x321   :  { %p6427_p4 = pnand %p6426_p3, %p6420_p0 }
 0x322   :  { %4818 = vmatprep.mubr.bf16.mxu0 %v3882_v55  ;;  %v4910_v55 = vrot.slane %v4893_v43, %v609_v22 }
 0x323   :  { %4819 = vmatmul.mubr.bf16.vlgmr.msra.gmra.mrb[8].mxu0 %v3881_v56 }
 0x3f6   :  { %v4820_v61 = vpop.f32.mrb[8].mxu0 }
 0x3f7   :  { %v6068_v62 = vadd.f32 %v4820_v61, %v4016_v60  ;;  %v4822_v21 = vpop.f32.mrb[9].mxu0 }
 0x3f8   :  { %v6069_v2 = vadd.f32 %v4822_v21, %v4020_v11  ;;  %v4824_v3 = vpop.f32.mrb[10].mxu0 }
 0x3f9   :  { %v4825_v57 = vpop.f32.mrb[11].mxu0  ;;  %v8659_v9 = vpack.c.bf16 %v6068_v62, %v6068_v62 }
 0x3fa   :  { %v4828_v7 = vpack.c.bf16 %v6069_v2, %v6069_v2 }
 0x3fc   :  { %5267 = vmatprep.mubr.bf16.mxu1 %v4828_v7 }
 0x3fd   :  { %5268 = vmatmul.mubr.bf16.vlgmr.msra.gmra.mrb[12].mxu1 %v8659_v9 }
 0x3fe   :  { %5277 = vmatpush1.bf16.msra.mxu1 %v6370_v8  ;;  %5308 = vmatprep.mubr.bf16.mxu1 %v4828_v7 }
 0x3ff   :  { %5278 = vmatprep.subr.bf16.mxu1 %v6375_v10 }
 0x402   :  { %5279 = vmatpush1.bf16.msra.mxu1 %v6373_v12 }
 0x403   :  { %5280 = vmatprep.subr.bf16.mxu1 %v6378_v1 }
 0x406   :  { %5281 = vmatpush1.bf16.msra.mxu1 %v6376_v38 }
 0x407   :  { %5282 = vmatprep.subr.bf16.mxu1 %v6381_v14 }
 0x40a   :  { %5283 = vmatpush1.bf16.msra.mxu1 %v6379_v15 }
 0x40b   :  { %5284 = vmatprep.subr.bf16.mxu1 %v6384_v17 }
 0x40e   :  { %5285 = vmatpush1.bf16.msra.mxu1 %v6382_v19 }
 0x40f   :  { %5286 = vmatprep.subr.bf16.mxu1 %v6387_v20 }
 0x412   :  { %5287 = vmatpush1.bf16.msra.mxu1 %v6385_v24 }
 0x413   :  { %5288 = vmatprep.subr.bf16.mxu1 %v6390_v25 }
 0x416   :  { %5289 = vmatpush1.bf16.msra.mxu1 %v6388_v45 }
 0x417   :  { %5290 = vmatprep.subr.bf16.mxu1 %v6393_v26 }
 0x41a   :  { %5291 = vmatpush1.bf16.msra.mxu1 %v6391_v41 }
 0x41b   :  { %5292 = vmatprep.subr.bf16.mxu1 %v6396_v27 }
 0x41e   :  { %5293 = vmatpush1.bf16.msra.mxu1 %v6394_v29 }
 0x41f   :  { %5294 = vmatprep.subr.bf16.mxu1 %v6399_v30 }
 0x422   :  { %5295 = vmatpush1.bf16.msra.mxu1 %v6397_v34 }
 0x423   :  { %5296 = vmatprep.subr.bf16.mxu1 %v6402_v36 }
 0x426   :  { %5297 = vmatpush1.bf16.msra.mxu1 %v6400_v28 }
 0x427   :  { %5298 = vmatprep.subr.bf16.mxu1 %v6405_v4 }
 0x42a   :  { %5299 = vmatpush1.bf16.msra.mxu1 %v6403_v37 }
 0x42b   :  { %5300 = vmatprep.subr.bf16.mxu1 %v6408_v63 }
 0x42e   :  { %5301 = vmatpush1.bf16.msra.mxu1 %v6406_v39 }
 0x42f   :  { %5302 = vmatprep.subr.bf16.mxu1 %v6411_v40 }
 0x432   :  { %5303 = vmatpush1.bf16.msra.mxu1 %v6409_v33 }
 0x433   :  { %5304 = vmatprep.subr.bf16.mxu1 %v6414_v5 }
 0x436   :  { %5305 = vmatpush1.bf16.msra.mxu1 %v6412_v42 }
 0x437   :  { %5306 = vmatprep.subr.bf16.mxu1 %v6417_v32 }
 0x43a   :  { %5307 = vmatpush1.bf16.msra.mxu1 %v6415_v13 }
 0x43d   :  { %5309 = vmatmul.mubr.bf16.vlgmr.msra.gmra.mrb[16].mxu1 %v8659_v9 }
 0x4d0   :  { %v5269_v31 = vpop.f32.mrb[12].mxu1 }
 0x4d1   :  { %v5270_v48 = vadd.f32 %v5269_v31, %v4898_v46  ;;  %v5271_v49 = vpop.f32.mrb[13].mxu1 }
 0x4d2   :  { %v5272_v50 = vadd.f32 %v5271_v49, %v4902_v47  ;;  %v5273_v18 = vpop.f32.mrb[14].mxu1 }
 0x4d3   :  { %v5274_v51 = vpop.f32.mrb[15].mxu1 }
 0x4d4   :  { %v5321_v52 = vcombine.low %v5270_v48, %v5272_v50 }
 0x4d6   :  { %v5329_v60 = vrot.slane %v5321_v52, %v6566_v53 }
 0x510   :  { %v5310_v56 = vpop.f32.mrb[16].mxu1 }
 0x511   :  { %v5311_v23 = vadd.f32 %v5310_v56, %v4906_v54  ;;  %v5312_v58 = vpop.f32.mrb[17].mxu1 }
 0x512   :  { %v5313_v16 = vadd.f32 %v5312_v58, %v4910_v55  ;;  %v5314_v0 = vpop.f32.mrb[18].mxu1 }
 0x513   :  { %v5315_v59 = vpop.f32.mrb[19].mxu1 }
 0x514   :  { %v5322_v6 = vcombine.low %v5311_v23, %v5313_v16 }
 0x516   :  { %v5336_v11 = vrot.slane %v5322_v6, %v6566_v53 }
 0x518   :  { %v5337_v61 = vcombine.low %v5329_v60, %v5336_v11 }
 0x51a   :  { %5339 = vst [vmem:[#allocation2] sm:$0xff] %v5337_v61 }
 0x51b   :  { %6430 = shalt.err (!%p6427_p4)
}
 0x51c   :  { %s6431_s12 = scalar_lea.hbm %s8783_s7, 128 }
 0x51d   :  { %p6432_p5 = scmp.ne.s32.totalorder %s8783_s7, %s6431_s12  ;;  %p6435_p6 = scmp.lt.u32.totalorder %s6431_s12, %s8783_s7 }
 0x51f   :  { %p6437_p7 = pnand %p6435_p6, %p6432_p5 }
 0x521   :  { %6440 = shalt.err (!%p6437_p7)
}
 0x522   :  { %5349 = dma.vmem_to_hbm [thread:$0]  %s5347_s6, 128, %s8783_s7, [#allocation3]  }
 0x523   :  { %6441 = dma.done.wait [#allocation3], 128  }
 0x524   :  { %6442 = vsyncadd [#allocation3], 4294967168 }
 0x525   :  { %5353 = vsyncpa [#allocation3], 1 }

</bundles_post_ra>
